<compile_context>
chip_gen: v6e
topology: v6e:2x2x1
jax: 0.10.0
libtpu: 0.0.40
codegen_flags: <defaults>
</compile_context>

<pallas_src>
import jax
import jax.numpy as jnp
from jax.experimental import pallas as pl
from jax.experimental.pallas import tpu as pltpu

FEAT_A = 2048                    # modelA (fc = Identity) feature width
FEAT_B = 1536                    # modelB (_fc = Identity) feature width
FEAT_TOTAL = FEAT_A + FEAT_B     # 3584
NB_CLASSES = 2
N_PAD = 128                      # classifier columns padded to one full lane group
NUM_BLOCKS = 2                   # feature-axis grid (1792 per block; /128 and /256)
FN = FEAT_TOTAL // NUM_BLOCKS    # 1792


def ensemble_kernel(x_ref, wf_ref, wc_ref, bc_ref, o_ref):
    """One feature-axis block of the fused ensemble forward.

    x_ref : [B, D]        bf16 flattened input
    wf_ref: [D, FN]       bf16 fused (wa || wb) backbone weight block
    wc_ref: [FN, N_PAD]   f32 classifier weight block (zero-padded to 128 cols)
    bc_ref: [1, N_PAD]    f32 classifier bias (zero-padded)
    o_ref : [1, B, N_PAD] f32 partial logits for this feature block
    """
    # backbone block: x @ wf_block, f32 accumulation on the MXU
    feats = jnp.dot(x_ref[...], wf_ref[...], preferred_element_type=jnp.float32)
    # relu(concat(x1, x2)) == relu applied per fused-feature block
    feats = jnp.maximum(feats, 0.0)
    # partial classifier contribution of this block
    partial = jnp.dot(feats, wc_ref[...], preferred_element_type=jnp.float32)

    @pl.when(pl.program_id(0) == 0)
    def _():
        o_ref[...] = (partial + bc_ref[...])[None]   # bias fused into block 0

    @pl.when(pl.program_id(0) != 0)
    def _():
        o_ref[...] = partial[None]


def prepare_params(wa, wb, wc, bc):
    """One-time weight prep: fuse backbones, quantize to bf16, pad classifier."""
    wf = jnp.concatenate([wa, wb], axis=1).astype(jnp.bfloat16)        # [D, 3584]
    wc_pad = jnp.zeros((FEAT_TOTAL, N_PAD), jnp.float32).at[:, :NB_CLASSES].set(wc)
    bc_pad = jnp.zeros((1, N_PAD), jnp.float32).at[0, :NB_CLASSES].set(bc)
    return wf, wc_pad, bc_pad


@jax.jit
def my_ensemble_forward(x_nchw, wf, wc_pad, bc_pad):
    B = x_nchw.shape[0]
    D = wf.shape[0]
    # NCHW -> [B, C*H*W] (row-major, matches torch .view(x.size(0), -1))
    x_flat = x_nchw.reshape(B, -1).astype(jnp.bfloat16)

    partials = pl.pallas_call(
        ensemble_kernel,
        out_shape=jax.ShapeDtypeStruct((NUM_BLOCKS, B, N_PAD), jnp.float32),
        grid=(NUM_BLOCKS,),
        in_specs=[
            pl.BlockSpec((B, D), lambda j: (0, 0)),        # x (replicated per block)
            pl.BlockSpec((D, FN), lambda j: (0, j)),       # fused backbone weight block
            pl.BlockSpec((FN, N_PAD), lambda j: (j, 0)),   # classifier weight block
            pl.BlockSpec((1, N_PAD), lambda j: (0, 0)),    # classifier bias
        ],
        out_specs=pl.BlockSpec((1, B, N_PAD), lambda j: (j, 0, 0)),
        compiler_params=pltpu.CompilerParams(
            dimension_semantics=("parallel",),             # v7x: 2 TCs split weight DMA
        ),
    )(x_flat, wf, wc_pad, bc_pad)

    # tiny cross-block reduction + un-pad (fused by XLA into the same jit)
    return partials.sum(axis=0)[:, :NB_CLASSES]


def reference_forward(x_nchw, wa, wb, wc, bc):
    # Reference uses the same bf16-quantized weights/activations as the kernel
    # path so the check isolates kernel math (bf16 storage is a perf choice).
    B = x_nchw.shape[0]
    x_flat = x_nchw.reshape(B, -1).astype(jnp.bfloat16).astype(jnp.float32)
    wa32 = wa.astype(jnp.bfloat16).astype(jnp.float32)
    wb32 = wb.astype(jnp.bfloat16).astype(jnp.float32)
    x1 = x_flat @ wa32
    x2 = x_flat @ wb32
    feats = jnp.maximum(jnp.concatenate([x1, x2], axis=1), 0.0)
    return feats @ wc + bc[None, :]


if __name__ == "__main__":
    key = jax.random.PRNGKey(0)
    kx, ka, kb, kc, kbias = jax.random.split(key, 5)

    # Small image-classifier-like input: NCHW = [2, 3, 16, 16]
    B, C, H, W = 2, 3, 16, 16
    D = C * H * W

    x = jax.random.normal(kx, (B, C, H, W), dtype=jnp.float32)

    # Deterministic synthetic parameters (no checkpoint loading).
    wa = jax.random.normal(ka, (D, FEAT_A), dtype=jnp.float32) * 0.02
    wb = jax.random.normal(kb, (D, FEAT_B), dtype=jnp.float32) * 0.02
    wc = jax.random.normal(kc, (FEAT_TOTAL, NB_CLASSES), dtype=jnp.float32) * 0.02
    bc = jax.random.normal(kbias, (NB_CLASSES,), dtype=jnp.float32) * 0.02

    wf, wc_pad, bc_pad = prepare_params(wa, wb, wc, bc)

    out = my_ensemble_forward(x, wf, wc_pad, bc_pad)
    out = jax.block_until_ready(out)

    ref = reference_forward(x, wa, wb, wc, bc)
    assert out.shape == (B, NB_CLASSES), out.shape
    assert jnp.allclose(out, ref, atol=1e-3, rtol=1e-3), (out, ref)

    print("KERNEL_OK")
</pallas_src>

<mosaic_0001>
module attributes {stable_mosaic.version = 11 : i64} {
  func.func @ensemble_kernel(%arg0: i32, %arg1: memref<2x768xbf16, #tpu.memory_space<vmem>>, %arg2: memref<768x1792xbf16, #tpu.memory_space<vmem>>, %arg3: memref<1792x128xf32, #tpu.memory_space<vmem>>, %arg4: memref<1x128xf32, #tpu.memory_space<vmem>>, %arg5: memref<1x2x128xf32, #tpu.memory_space<vmem>>) attributes {dimension_semantics = [#tpu.dimension_semantics<parallel>], iteration_bounds = array<i64: 2>, scalar_prefetch = 0 : i64, scratch_operands = 0 : i64, tpu.core_type = #tpu.core_type<tc>, window_params = [{pipeline_mode = #tpu.pipeline_mode<synchronous>, transform_indices = @transform_0, window_bounds = array<i64: 2, 768>}, {transform_indices = @transform_1, window_bounds = array<i64: 768, 1792>}, {transform_indices = @transform_2, window_bounds = array<i64: 1792, 128>}, {pipeline_mode = #tpu.pipeline_mode<synchronous>, transform_indices = @transform_3, window_bounds = array<i64: 1, 128>}, {transform_indices = @transform_4, window_bounds = array<i64: 1, 2, 128>}]} {
    %c0 = arith.constant 0 : index
    %c0_0 = arith.constant 0 : index
    %0 = vector.load %arg1[%c0, %c0_0] : memref<2x768xbf16, #tpu.memory_space<vmem>>, vector<2x768xbf16>
    %c0_1 = arith.constant 0 : index
    %c0_2 = arith.constant 0 : index
    %1 = vector.load %arg2[%c0_1, %c0_2] : memref<768x1792xbf16, #tpu.memory_space<vmem>>, vector<768x1792xbf16>
    %cst = arith.constant dense<0.000000e+00> : vector<2x1792xf32>
    %2 = tpu.matmul %0, %1, %cst {dimension_numbers = #tpu.dot_dimension_numbers<[1], [0], [0], [1], [0, 0, 1, 1], [], []>} : vector<2x768xbf16>, vector<768x1792xbf16>, vector<2x1792xf32> -> vector<2x1792xf32>
    %cst_3 = arith.constant 0.000000e+00 : f32
    %3 = vector.broadcast %cst_3 : f32 to vector<2x1792xf32>
    %4 = arith.maximumf %2, %3 : vector<2x1792xf32>
    %c0_4 = arith.constant 0 : index
    %c0_5 = arith.constant 0 : index
    %5 = vector.load %arg3[%c0_4, %c0_5] : memref<1792x128xf32, #tpu.memory_space<vmem>>, vector<1792x128xf32>
    %cst_6 = arith.constant dense<0.000000e+00> : vector<2x128xf32>
    %6 = tpu.matmul %4, %5, %cst_6 {dimension_numbers = #tpu.dot_dimension_numbers<[1], [0], [0], [1], [0, 0, 1, 1], [], []>} : vector<2x1792xf32>, vector<1792x128xf32>, vector<2x128xf32> -> vector<2x128xf32>
    %c0_i32 = arith.constant 0 : i32
    %7 = arith.cmpi eq, %arg0, %c0_i32 : i32
    %8 = arith.extui %7 : i1 to i32
    %c0_i32_7 = arith.constant 0 : i32
    %9 = arith.cmpi ne, %8, %c0_i32_7 : i32
    scf.if %9 {
      %c0_10 = arith.constant 0 : index
      %c0_11 = arith.constant 0 : index
      %13 = vector.load %arg4[%c0_10, %c0_11] : memref<1x128xf32, #tpu.memory_space<vmem>>, vector<1x128xf32>
      %14 = vector.broadcast %13 : vector<1x128xf32> to vector<2x128xf32>
      %15 = arith.addf %6, %14 : vector<2x128xf32>
      %16 = vector.shape_cast %15 : vector<2x128xf32> to vector<1x2x128xf32>
      %c0_12 = arith.constant 0 : index
      %c0_13 = arith.constant 0 : index
      %c0_14 = arith.constant 0 : index
      %17 = vector.load %arg5[%c0_12, %c0_13, %c0_14] : memref<1x2x128xf32, #tpu.memory_space<vmem>>, vector<1x2x128xf32>
      tpu.vector_store %arg5[%c0_12, %c0_13, %c0_14], %16 {strides = array<i32>} : memref<1x2x128xf32, #tpu.memory_space<vmem>>, vector<1x2x128xf32>,
    } else {
    }
    %c0_i32_8 = arith.constant 0 : i32
    %10 = arith.cmpi ne, %arg0, %c0_i32_8 : i32
    %11 = arith.extui %10 : i1 to i32
    %c0_i32_9 = arith.constant 0 : i32
    %12 = arith.cmpi ne, %11, %c0_i32_9 : i32
    scf.if %12 {
      %13 = vector.shape_cast %6 : vector<2x128xf32> to vector<1x2x128xf32>
      %c0_10 = arith.constant 0 : index
      %c0_11 = arith.constant 0 : index
      %c0_12 = arith.constant 0 : index
      %14 = vector.load %arg5[%c0_10, %c0_11, %c0_12] : memref<1x2x128xf32, #tpu.memory_space<vmem>>, vector<1x2x128xf32>
      tpu.vector_store %arg5[%c0_10, %c0_11, %c0_12], %13 {strides = array<i32>} : memref<1x2x128xf32, #tpu.memory_space<vmem>>, vector<1x2x128xf32>,
    } else {
    }
    return
  }
  func.func @transform_0(%arg0: i32) -> (i32, i32) {
    %c0_i32 = arith.constant 0 : i32
    %c0_i32_0 = arith.constant 0 : i32
    %c0_i32_1 = arith.constant 0 : i32
    return %c0_i32, %c0_i32_0 : i32, i32
  }
  func.func @transform_1(%arg0: i32) -> (i32, i32) {
    %c0_i32 = arith.constant 0 : i32
    %c0_i32_0 = arith.constant 0 : i32
    return %c0_i32, %arg0 : i32, i32
  }
  func.func @transform_2(%arg0: i32) -> (i32, i32) {
    %c0_i32 = arith.constant 0 : i32
    %c0_i32_0 = arith.constant 0 : i32
    return %arg0, %c0_i32 : i32, i32
  }
  func.func @transform_3(%arg0: i32) -> (i32, i32) {
    %c0_i32 = arith.constant 0 : i32
    %c0_i32_0 = arith.constant 0 : i32
    %c0_i32_1 = arith.constant 0 : i32
    return %c0_i32, %c0_i32_0 : i32, i32
  }
  func.func @transform_4(%arg0: i32) -> (i32, i32, i32) {
    %c0_i32 = arith.constant 0 : i32
    %c0_i32_0 = arith.constant 0 : i32
    %c0_i32_1 = arith.constant 0 : i32
    return %arg0, %c0_i32, %c0_i32_0 : i32, i32, i32
  }
}

</mosaic_0001>

<bundles_post_ra>
// kernel: my_ensemble_forward.1
= control target key start
LH: loop header
LB: loop body
LE: loop exit
PB: predicated region body
PF: predicated region fallthrough
CT: control target
= control target key end

     0   :  { %9 = vsyncpa [#allocation3], 0  ;;  %s9453_s0 = inlined_call_operand.vmem [shape: bf16[2,768], index: 0, kind: input, shape index: {}]   ;;  %s9454_s1 = inlined_call_operand.hbm [shape: bf16[768,3584], index: 1, kind: input, shape index: {}]   ;;  %s9455_s2 = inlined_call_operand.hbm [shape: f32[3584,128], index: 2, kind: input, shape index: {}]   ;;  %s9456_s3 = inlined_call_operand.hbm [shape: f32[1,128], index: 3, kind: input, shape index: {}]   ;;  %s9457_s4 = inlined_call_operand.vmem [shape: f32[2,2,128], index: 4, kind: output, shape index: {}]  }
   0x1   :  { %11 = vsyncpa [#allocation3 + $0x1], 0 }
   0x2   :  { %12 = vsyncpa [#allocation5], 0 }
   0x3   :  { %14 = vsyncpa [#allocation5 + $0x1], 0  ;;  %s8228_s15 = smov 0   ;;  %s8230_s16 = smov 0  }
   0x4   :  { %s8232_s17 = smov 0   ;;  %s8234_s18 = smov 0  }
   0x5 LB: > { %s8247_s19 = sadd.s32 4294967295, %s8192_s18   ;;  %s8250_s20 = sadd.s32 1, %s8192_s18   ;;  %s8192_s18 = sphi %s8234_s18, %s9473_s18   ;;  %s8188_s17 = sphi %s8232_s17, %s9472_s17   ;;  %s8184_s16 = sphi %s8230_s16, %s9471_s16   ;;  %s8180_s15 = sphi %s8228_s15, %s9470_s15  }
   0x6   : > { %s45_s21 = ssub.s32 %s8192_s18, %s8250_s20  ;;  %s48_s22 = sadd.s32 1, %s8188_s17 }
   0x7   : > { %p46_p0 = scmp.eq.s32.totalorder %s45_s21, 0  ;;  %p55_p1 = scmp.ne.s32.totalorder %s8188_s17, %s8184_s16 }
   0x8   : > { %p56_p2 = scmp.eq.s32.totalorder %s8192_s18, 0  ;;  %p61_p3 = scmp.ne.s32.totalorder %s8184_s16, %s8180_s15 }
   0x9   : > { %s8260_s23 = scalar_select %p46_p0, %s8188_s17, %s48_s22  }
   0xa   : > { %p8262_p4 = por %p56_p2, %p55_p1  ;;  %p9458_p5 = scmp.eq.s32.totalorder %s8247_s19, 0 }
   0xb   : > { %p6062_p6 = scmp.ge.s32.totalorder %s8192_s18, 1  ;;  %p145_p7 = scmp.lt.s32.totalorder %s8192_s18, 3 }
   0xc   : > { %p8271_p8 = por %p9458_p5, %p61_p3  ;;  %s8194_s27 = smov [#allocation6]  }
   0xd   : > { %p8276_p10 = pnand %p6062_p6, %p145_p7  ;;  %s161_s28 = sshll.u32 %s8194_s27, 4  ;;  %s162_s28 = int_to_ptr.vmem [resolvable:$true] %s161_s28 }
   0xe   : > { %s9461_s25 = scalar_select %p8271_p8, 1, 0 }
   0xf   : > { %p7006_p11 = pneg %p8276_p10  ;;  %p7018_p12 = scmp.lt.s32.totalorder %s8192_s18, 2 }
  0x10   : > { %s8284_s29 = sand.u32 1, %s8188_s17   ;;  %s6747_s7 = smul.u32 896, %s8192_s18 }
  0x11   : > { %p8288_p13 = pnand %p7006_p11, %p9458_p5  ;;  %p8294_p0 = pnand %p7018_p12, %p8262_p4 }
  0x12   : > { %s6994_s6 = smul.u32 5376, %s8284_s29  ;;  %s8079_s8 = scalar_lea.vmem %s162_s28, 16 }
  0x13   : > { %p8070_p1 = pneg %p8288_p13  ;;  %p8080_p2 = scmp.ne.s32.totalorder %s162_s28, %s8079_s8 }
  0x14   : > { %s8086_s9 = scalar_lea.vmem %s162_s28, 32  ;;  %p8087_p7 = scmp.lt.s32.totalorder %s162_s28, %s162_s28 }
  0x15   : > { %p8082_p3 = pnand %p8080_p2, %p8070_p1  ;;  %p8088_p11 = scmp.lt.s32.totalorder %s8086_s9, %s8079_s8 }
  0x17   : > { %p8083_p6 = pneg %p8082_p3  ;;  %p8089_p9 = por %p8088_p11, %p8087_p7 }
  0x19   : > { %p8090_p5 = pnand %p8089_p9, %p8083_p6 }
  0x1b   : > { %8093 = shalt.err (!%p8090_p5)
}
  0x1c   : > { %7009 = dma.hbm_to_vmem [thread:$0]  (!%p8288_p13), %s9456_s3, 16, %s162_s28, [#allocation5]  }
  0x1d   : > { %s8310_s14 = scalar_lea.hbm %s9454_s1, %s6747_s7  ;;  %s176_s15 = scalar_lea.vmem [#allocation2], %s6994_s6 }
  0x1e   : > { %s183_s21 = sshll.u32 %s176_s15, 4  ;;  %s173_s22 = scalar_lea.sflag [#allocation3], %s8284_s29  ;;  %s8312_s21 = int_to_ptr.vmem [resolvable:$true] %s183_s21 }
  0x1f   : > { %s8094_s24 = scalar_lea.hbm %s8310_s14, 86016  ;;  %p8096_p5 = pneg %p8294_p0 }
  0x20   : > { %p8095_p4 = scmp.ne.s32.totalorder %s8310_s14, %s8094_s24  ;;  %s8099_s30 = scalar_lea.hbm %s9454_s1, 172032 }
  0x21   : > { %p8100_p13 = scmp.lt.s32.totalorder %s8310_s14, %s9454_s1  ;;  %p8101_p1 = scmp.lt.s32.totalorder %s8099_s30, %s8094_s24 }
  0x22   : > { %p8097_p9 = pnand %p8096_p5, %p8095_p4 }
  0x23   : > { %p8102_p2 = por %p8101_p1, %p8100_p13 }
  0x24   : > { %p8098_p12 = pneg %p8097_p9 }
  0x26   : > { %p8103_p3 = pnand %p8102_p2, %p8098_p12 }
  0x28   : > { %8106 = shalt.err (!%p8103_p3)
}
  0x29   : > { %s8107_s6 = scalar_lea.vmem %s8312_s21, 86016  ;;  %s8195_s9 = smov [#allocation2]  }
  0x2a   : > { %p8108_p6 = scmp.ne.s32.totalorder %s8312_s21, %s8107_s6  ;;  %s8112_s10 = sshll.u32 %s8195_s9, 4  ;;  %s8113_s10 = int_to_ptr.vmem [resolvable:$false] %s8112_s10 }
  0x2b   : > { %s8114_s11 = scalar_lea.vmem %s8113_s10, 172032  ;;  %p8115_p4 = scmp.lt.s32.totalorder %s8312_s21, %s8113_s10 }
  0x2c   : > { %p8110_p7 = pnand %p8108_p6, %p8096_p5  ;;  %p8116_p9 = scmp.lt.s32.totalorder %s8114_s11, %s8107_s6 }
  0x2e   : > { %p8111_p11 = pneg %p8110_p7  ;;  %p8117_p8 = por %p8116_p9, %p8115_p4 }
  0x30   : > { %p8118_p13 = pnand %p8117_p8, %p8111_p11 }
  0x32   : > { %8121 = shalt.err (!%p8118_p13)
}
  0x33   : > { %s8196_s12 = smov 1792   ;;  %s8197_s13 = smov 896  }
  0x34   : > { %s8198_s15 = smov 56   ;;  %s193_s24 = sand.u32 1, %s8192_s18  }
  0x35   : > { %7013 = dma.hbm_to_vmem [thread:$0]  (!%p8294_p0), %s8310_s14, 86016, %s8312_s21, %s173_s22, %s8196_s12, %s8197_s13, %s8198_s15  }
  0x36   : > { %s6995_s27 = smul.u32 1792, %s8284_s29  ;;  %s8351_s10 = scalar_lea.sflag [#allocation5], %s193_s24 }
  0x37   : > { %s6748_s28 = smul.u32 28672, %s8192_s18  ;;  %s8127_s14 = scalar_lea.hbm %s9455_s2, 57344 }
  0x38   : > { %s197_s6 = scalar_lea.vmem [#allocation4], %s6995_s27 }
  0x39   : > { %s8347_s8 = scalar_lea.hbm %s9455_s2, %s6748_s28  ;;  %s204_s9 = sshll.u32 %s197_s6, 4  ;;  %s8349_s9 = int_to_ptr.vmem [resolvable:$true] %s204_s9 }
  0x3a   : > { %s8122_s11 = scalar_lea.hbm %s8347_s8, 28672  ;;  %p8128_p2 = scmp.lt.s32.totalorder %s8347_s8, %s9455_s2 }
  0x3b   : > { %p8123_p8 = scmp.ne.s32.totalorder %s8347_s8, %s8122_s11  ;;  %p8129_p3 = scmp.lt.s32.totalorder %s8127_s14, %s8122_s11 }
  0x3d   : > { %p8125_p12 = pnand %p8123_p8, %p8096_p5  ;;  %p8130_p6 = por %p8129_p3, %p8128_p2 }
  0x3f   : > { %p8126_p1 = pneg %p8125_p12 }
  0x41   : > { %p8131_p7 = pnand %p8130_p6, %p8126_p1 }
  0x43   : > { %8134 = shalt.err (!%p8131_p7)
}
  0x44   : > { %s8135_s12 = scalar_lea.vmem %s8349_s9, 28672  ;;  %s8199_s13 = smov [#allocation4]  }
  0x45   : > { %p8136_p11 = scmp.ne.s32.totalorder %s8349_s9, %s8135_s12  ;;  %s8140_s15 = sshll.u32 %s8199_s13, 4  ;;  %s8141_s15 = int_to_ptr.vmem [resolvable:$false] %s8140_s15 }
  0x46   : > { %s8142_s24 = scalar_lea.vmem %s8141_s15, 57344  ;;  %p8143_p13 = scmp.lt.s32.totalorder %s8349_s9, %s8141_s15 }
  0x47   : > { %p8138_p4 = pnand %p8136_p11, %p8096_p5  ;;  %p8144_p8 = scmp.lt.s32.totalorder %s8142_s24, %s8135_s12 }
  0x49   : > { %p8139_p9 = pneg %p8138_p4  ;;  %p8145_p12 = por %p8144_p8, %p8143_p13 }
  0x4b   : > { %p8146_p2 = pnand %p8145_p12, %p8139_p9 }
  0x4d   : > { %8149 = shalt.err (!%p8146_p2)
}
  0x4e   : > { %s8200_s27 = smov 128   ;;  %s8201_s28 = smov 8  }
  0x4f   : > { %7016 = dma.hbm_to_vmem [thread:$0]  (!%p8294_p0), %s8347_s8, 28672, %s8349_s9, %s8351_s10, %s8200_s27, %s8200_s27, %s8201_s28  }
  0x50   : > { %216 = sbr.rel (%p8276_p10) target bundleno = 1209 (0x4b9), region = 36  ;;  %s218_s30 = sand.u32 (!%p8276_p10), 1, %s8184_s16  }
  0x51   : > { %s6996_s7 = smul.u32 (!%p8276_p10), 5376, %s218_s30  ;;  %s219_s6 = scalar_lea.sflag (!%p8276_p10), [#allocation3], %s218_s30 }
  0x52   : > { %p9465_p5 = scmp.ne.s32.totalorder (!%p8276_p10), %s9461_s25, 0 }
  0x53   : > { %s8379_s11 = scalar_lea.vmem (!%p8276_p10), [#allocation2], %s6996_s7 }
  0x55   : > { %8167 = dma.done.wait (%p9465_p5), %s219_s6, 86016  }
  0x56   : > { %8169 = vsyncadd (%p9465_p5), %s219_s6, 4294881280  ;;  %s227_s18 = sand.u32 1, %s8247_s19   ;;  %s6997_s5 = smul.u32 1792, %s218_s30 }
  0x57   : > { %s228_s8 = scalar_lea.sflag [#allocation5], %s227_s18 }
  0x58   : > { %s8386_s9 = scalar_lea.vmem [#allocation4], %s6997_s5 }
  0x59   : > { %8171 = dma.done.wait (%p9465_p5), %s228_s8, 28672  }
  0x5a   : > { %8173 = vsyncadd (%p9465_p5), %s228_s8, 4294938624  ;;  %p9466_p10 = scmp.eq.s32.totalorder %s8247_s19, 0 }
  0x5c   : > { %8175 = dma.done.wait (%p9466_p10), [#allocation5], 16   ;;  %p9467_p0 = pmov %p9466_p10 }
  0x5d   : > { %p266_p1 = scmp.lt.s32.totalorder %s8247_s19, 1  ;;  %v7059_v0 = vld [vmem:[%s8379_s11 + $0x314] ss:$56 sps:$4 sm:$0xff]   ;;  %v7063_v2 = vld [vmem:[%s8379_s11 + $0x310] ss:$56 sps:$4 sm:$0xff]   ;;  %v948_v38 = vlaneseq  ;;  %p9468_p3 = scmp.ne.s32.totalorder %s8247_s19, 0 }
  0x5e   : > { %8177 = vsyncadd (%p9467_p0), [#allocation5], 4294967280  ;;  %v7061_v1 = vld [vmem:[%s8379_s11 + $0xa14] ss:$56 sps:$4 sm:$0xff]   ;;  %4357 = vmatprep.subr.bf16.mxu0 %v7059_v0  ;;  %v7064_v3 = vld [vmem:[%s8379_s11 + $0xa10] ss:$56 sps:$4 sm:$0xff]  }
  0x5f   : > { %s267_s26 = scalar_select %p266_p1, %s8247_s19, 1  ;;  %4398 = vmatprep.subr.bf16.mxu1 %v7061_v1  ;;  %v7065_v4 = vld [vmem:[%s8379_s11 + $0x2a4] ss:$56 sps:$4 sm:$0xff]   ;;  %4358 = vmatpush1.bf16.msra.mxu0 %v7063_v2  ;;  %v7069_v6 = vld [vmem:[%s8379_s11 + $0x2a0] ss:$56 sps:$4 sm:$0xff]   ;;  %v949_v43 = vshrl.u32 %v948_v38, 7 }
  0x60   : > { %4399 = vmatpush1.bf16.msra.mxu1 %v7064_v3  ;;  %v7067_v5 = vld [vmem:[%s8379_s11 + $0x9a4] ss:$56 sps:$4 sm:$0xff]   ;;  %4359 = vmatprep.subr.bf16.mxu0 %v7065_v4  ;;  %v7070_v7 = vld [vmem:[%s8379_s11 + $0x9a0] ss:$56 sps:$4 sm:$0xff]   ;;  %v7071_v8 = vld [vmem:[%s8379_s11 + $0x234] ss:$56 sps:$4 sm:$0xff]  }
  0x61   : > { %s6069_s25 = sshll.u32 %s267_s26, 1  ;;  %4400 = vmatprep.subr.bf16.mxu1 %v7067_v5  ;;  %v7073_v9 = vld [vmem:[%s8379_s11 + $0x934] ss:$56 sps:$4 sm:$0xff]   ;;  %v7075_v10 = vld [vmem:[%s8379_s11 + $0x230] ss:$56 sps:$4 sm:$0xff]  }
  0x62   : > { %s8401_s14 = scalar_lea.vmem %s9457_s4, %s6069_s25  ;;  %v7076_v11 = vld [vmem:[%s8379_s11 + $0x930] ss:$56 sps:$4 sm:$0xff]   ;;  %v7077_v12 = vld [vmem:[%s8379_s11 + $0x1c4] ss:$56 sps:$4 sm:$0xff]   ;;  %v7081_v14 = vld [vmem:[%s8379_s11 + $0x1c0] ss:$56 sps:$4 sm:$0xff]  }
  0x63   : > { %4360 = vmatpush1.bf16.msra.mxu0 %v7069_v6  ;;  %v7079_v13 = vld [vmem:[%s8379_s11 + $0x8c4] ss:$56 sps:$4 sm:$0xff]   ;;  %v7082_v15 = vld [vmem:[%s8379_s11 + $0x8c0] ss:$56 sps:$4 sm:$0xff]   ;;  %v7083_v16 = vld [vmem:[%s8379_s11 + $0x154] ss:$56 sps:$4 sm:$0xff]  }
  0x64   : > { %4401 = vmatpush1.bf16.msra.mxu1 %v7070_v7  ;;  %4361 = vmatprep.subr.bf16.mxu0 %v7071_v8  ;;  %v7085_v17 = vld [vmem:[%s8379_s11 + $0x854] ss:$56 sps:$4 sm:$0xff]   ;;  %v7087_v18 = vld [vmem:[%s8379_s11 + $0x150] ss:$56 sps:$4 sm:$0xff]   ;;  %v7089_v20 = vld [vmem:[%s8379_s11 + $0xe4] ss:$56 sps:$4 sm:$0xff]  }
  0x65   : > { %4402 = vmatprep.subr.bf16.mxu1 %v7073_v9  ;;  %v7088_v19 = vld [vmem:[%s8379_s11 + $0x850] ss:$56 sps:$4 sm:$0xff]   ;;  %v7091_v21 = vld [vmem:[%s8379_s11 + $0x7e4] ss:$56 sps:$4 sm:$0xff]   ;;  %v7093_v22 = vld [vmem:[%s8379_s11 + $0xe0] ss:$56 sps:$4 sm:$0xff]  }
  0x66   : > { %v7094_v23 = vld [vmem:[%s8379_s11 + $0x7e0] ss:$56 sps:$4 sm:$0xff]   ;;  %v7095_v24 = vld [vmem:[%s8379_s11 + $0x74] ss:$56 sps:$4 sm:$0xff]   ;;  %v7099_v26 = vld [vmem:[%s8379_s11 + $0x70] ss:$56 sps:$4 sm:$0xff]  }
  0x67   : > { %4362 = vmatpush1.bf16.msra.mxu0 %v7075_v10  ;;  %v7097_v25 = vld [vmem:[%s8379_s11 + $0x774] ss:$56 sps:$4 sm:$0xff]   ;;  %v7100_v27 = vld [vmem:[%s8379_s11 + $0x770] ss:$56 sps:$4 sm:$0xff]   ;;  %v7101_v28 = vld [vmem:[%s8379_s11 + $0x4] ss:$56 sps:$4 sm:$0xff]  }
  0x68   : > { %4403 = vmatpush1.bf16.msra.mxu1 %v7076_v11  ;;  %4363 = vmatprep.subr.bf16.mxu0 %v7077_v12  ;;  %v7103_v29 = vld [vmem:[%s8379_s11 + $0x704] ss:$56 sps:$4 sm:$0xff]   ;;  %v7105_v30 = vld [vmem:[%s8379_s11] ss:$56 sps:$4 sm:$0xff]   ;;  %v7107_v32 = vld [vmem:[%s8379_s11 + $0x694] ss:$56 sps:$4 sm:$0xff]  }
  0x69   : > { %4404 = vmatprep.subr.bf16.mxu1 %v7079_v13  ;;  %v7106_v31 = vld [vmem:[%s8379_s11 + $0x700] ss:$56 sps:$4 sm:$0xff]   ;;  %v7109_v33 = vld [vmem:[%s8379_s11 + $0xd94] ss:$56 sps:$4 sm:$0xff]   ;;  %v7111_v34 = vld [vmem:[%s8379_s11 + $0x690] ss:$56 sps:$4 sm:$0xff]  }
  0x6a   : > { %v7112_v35 = vld [vmem:[%s8379_s11 + $0xd90] ss:$56 sps:$4 sm:$0xff]   ;;  %v8202_v36 = vmov 1966171168   ;;  %v7113_v39 = vld [vmem:[%s8379_s11 + $0x624] ss:$56 sps:$4 sm:$0xff]  }
  0x6b   : > { %4364 = vmatpush1.bf16.msra.mxu0 %v7081_v14  ;;  %v946_v37 = vunpack.c.l.s4 %v8202_v36  ;;  %v7115_v40 = vld [vmem:[%s8379_s11 + $0xd24] ss:$56 sps:$4 sm:$0xff]   ;;  %v7117_v41 = vld [vmem:[%s8379_s11 + $0x620] ss:$56 sps:$4 sm:$0xff]   ;;  %v7119_v45 = vld [vmem:[%s8379_s11 + $0x5b4] ss:$56 sps:$4 sm:$0xff]  }
  0x6c   : > { %4405 = vmatpush1.bf16.msra.mxu1 %v7082_v15  ;;  %4365 = vmatprep.subr.bf16.mxu0 %v7083_v16  ;;  %v7118_v44 = vld [vmem:[%s8379_s11 + $0xd20] ss:$56 sps:$4 sm:$0xff]   ;;  %v7121_v46 = vld [vmem:[%s8379_s11 + $0xcb4] ss:$56 sps:$4 sm:$0xff]   ;;  %v7123_v47 = vld [vmem:[%s8379_s11 + $0x5b0] ss:$56 sps:$4 sm:$0xff]  }
  0x6d   : > { %4406 = vmatprep.subr.bf16.mxu1 %v7085_v17  ;;  %v947_v42 = vunpack.c.0.s8 %v946_v37  ;;  %v7124_v48 = vld [vmem:[%s8379_s11 + $0xcb0] ss:$56 sps:$4 sm:$0xff]   ;;  %v7125_v50 = vld [vmem:[%s8379_s11 + $0x544] ss:$56 sps:$4 sm:$0xff]   ;;  %v7129_v53 = vld [vmem:[%s8379_s11 + $0x540] ss:$56 sps:$4 sm:$0xff]  }
  0x6e   : > { %v7127_v51 = vld [vmem:[%s8379_s11 + $0xc44] ss:$56 sps:$4 sm:$0xff]   ;;  %v7130_v56 = vld [vmem:[%s8379_s11 + $0xc40] ss:$56 sps:$4 sm:$0xff]   ;;  %v7131_v57 = vld [vmem:[%s8379_s11 + $0x4d4] ss:$56 sps:$4 sm:$0xff]  }
  0x6f   : > { %4366 = vmatpush1.bf16.msra.mxu0 %v7087_v18  ;;  %v8447_v49 = vsub.s32 %v947_v42, %v949_v43  ;;  %v270_v52 = vld [vmem:[%s9453_s0] sm:$0x3f]  ;;  %v7133_v58 = vld [vmem:[%s8379_s11 + $0xbd4] ss:$56 sps:$4 sm:$0xff]   ;;  %v7135_v61 = vld [vmem:[%s8379_s11 + $0x4d0] ss:$56 sps:$4 sm:$0xff]  }
  0x70   : > { %4407 = vmatpush1.bf16.msra.mxu1 %v7088_v19  ;;  %4367 = vmatprep.subr.bf16.mxu0 %v7089_v20  ;;  %v944_v55 = vcombine.high %v270_v52, %v270_v52  ;;  %v7136_v0 = vld [vmem:[%s8379_s11 + $0xbd0] ss:$56 sps:$4 sm:$0xff]   ;;  %v7137_v1 = vld [vmem:[%s8379_s11 + $0x464] ss:$56 sps:$4 sm:$0xff]   ;;  %v7141_v4 = vld [vmem:[%s8379_s11 + $0x460] ss:$56 sps:$4 sm:$0xff]  }
  0x71   : > { %4408 = vmatprep.subr.bf16.mxu1 %v7091_v21  ;;  %v951_v54 = vrot.slane %v270_v52, %v8447_v49  ;;  %v7139_v2 = vld [vmem:[%s8379_s11 + $0xb64] ss:$56 sps:$4 sm:$0xff]   ;;  %v7142_v5 = vld [vmem:[%s8379_s11 + $0xb60] ss:$56 sps:$4 sm:$0xff]   ;;  %v7143_v6 = vld [vmem:[%s8379_s11 + $0x3f4] ss:$56 sps:$4 sm:$0xff]  }
  0x72   : > { %v958_v60 = vrot.slane %v944_v55, %v8447_v49  ;;  %v7145_v7 = vld [vmem:[%s8379_s11 + $0xaf4] ss:$56 sps:$4 sm:$0xff]   ;;  %v7147_v8 = vld [vmem:[%s8379_s11 + $0x3f0] ss:$56 sps:$4 sm:$0xff]   ;;  %v7149_v10 = vld [vmem:[%s8379_s11 + $0x384] ss:$56 sps:$4 sm:$0xff]  }
  0x73   : > { %4368 = vmatpush1.bf16.msra.mxu0 %v7093_v22  ;;  %v959_v59 = vcombine.high %v951_v54, %v951_v54  ;;  %v7148_v9 = vld [vmem:[%s8379_s11 + $0xaf0] ss:$56 sps:$4 sm:$0xff]   ;;  %v7151_v11 = vld [vmem:[%s8379_s11 + $0xa84] ss:$56 sps:$4 sm:$0xff]   ;;  %v7153_v12 = vld [vmem:[%s8379_s11 + $0x380] ss:$56 sps:$4 sm:$0xff]   ;;  %v8486_v13 = vrot.slane %v951_v54, %v8447_v49 }
  0x74   : > { %4409 = vmatpush1.bf16.msra.mxu1 %v7094_v23  ;;  %4369 = vmatprep.subr.bf16.mxu0 %v7095_v24  ;;  %v8465_v63 = vrot.slane %v958_v60, %v8447_v49  ;;  %v7154_v14 = vld [vmem:[%s8379_s11 + $0xa80] ss:$56 sps:$4 sm:$0xff]   ;;  %v7157_v15 = vld [vmem:[%s8379_s11 + $0x1114] ss:$56 sps:$4 sm:$0xff]   ;;  %v960_v17 = vcombine.high %v958_v60, %v958_v60  ;;  %v7155_v19 = vld [vmem:[%s8379_s11 + $0x1110] ss:$56 sps:$4 sm:$0xff]  }
  0x75   : > { %4410 = vmatprep.subr.bf16.mxu1 %v7097_v25  ;;  %v8462_v62 = vrot.slane %v959_v59, %v8447_v49  ;;  %v7160_v16 = vld [vmem:[%s8379_s11 + $0x31c] ss:$56 sps:$4 sm:$0xff]   ;;  %v8493_v18 = vcombine.high %v8486_v13, %v8486_v13  ;;  %v7158_v20 = vld [vmem:[%s8379_s11 + $0x318] ss:$56 sps:$4 sm:$0xff]   ;;  %v7166_v22 = vld [vmem:[%s8379_s11 + $0x2ac] ss:$56 sps:$4 sm:$0xff]  }
  0x76   : > { %v7163_v21 = vld [vmem:[%s8379_s11 + $0x10a4] ss:$56 sps:$4 sm:$0xff]   ;;  %v8500_v23 = vrot.slane %v960_v17, %v8447_v49  ;;  %v7161_v24 = vld [vmem:[%s8379_s11 + $0x10a0] ss:$56 sps:$4 sm:$0xff]   ;;  %v7179_v36 = vld [vmem:[%s8379_s11 + $0xf50] ss:$56 sps:$4 sm:$0xff]  }
  0x77   : > { %4370 = vmatpush1.bf16.msra.mxu0 %v7099_v26  ;;  %v8472_v3 = vcombine.high %v8462_v62, %v8462_v62  ;;  %4389 = vmatprep.mubr.bf16.mxu0 %v8462_v62  ;;  %v7164_v25 = vld [vmem:[%s8379_s11 + $0x2a8] ss:$56 sps:$4 sm:$0xff]   ;;  %v7169_v26 = vld [vmem:[%s8379_s11 + $0x1034] ss:$56 sps:$4 sm:$0xff]   ;;  %v7182_v37 = vld [vmem:[%s8379_s11 + $0x158] ss:$56 sps:$4 sm:$0xff]  }
  0x78   : > { %4411 = vmatpush1.bf16.msra.mxu1 %v7100_v27  ;;  %4371 = vmatprep.subr.bf16.mxu0 %v7101_v28  ;;  %v7172_v27 = vld [vmem:[%s8379_s11 + $0x23c] ss:$56 sps:$4 sm:$0xff]   ;;  %v7167_v28 = vld [vmem:[%s8379_s11 + $0x1030] ss:$56 sps:$4 sm:$0xff]   ;;  %v7214_v55 = vld [vmem:[%s8379_s11 + $0x62c] ss:$56 sps:$4 sm:$0xff]  }
  0x79   : > { %4412 = vmatprep.subr.bf16.mxu1 %v7103_v29  ;;  %4430 = vmatprep.mubr.bf16.mxu1 %v8472_v3  ;;  %v7170_v29 = vld [vmem:[%s8379_s11 + $0x238] ss:$56 sps:$4 sm:$0xff]   ;;  %v7187_v38 = vld [vmem:[%s8379_s11 + $0xee4] ss:$56 sps:$4 sm:$0xff]   ;;  %v7193_v42 = vld [vmem:[%s8379_s11 + $0xe74] ss:$56 sps:$4 sm:$0xff]  }
  0x7a   : > { %v7196_v43 = vld [vmem:[%s8379_s11 + $0x7c] ss:$56 sps:$4 sm:$0xff]   ;;  %v7200_v49 = vld [vmem:[%s8379_s11 + $0x8] ss:$56 sps:$4 sm:$0xff]   ;;  %v7242_v17 = vld [vmem:[%s8379_s11 + $0x3f8] ss:$56 sps:$4 sm:$0xff]  }
  0x7b   : > { %4372 = vmatpush1.bf16.msra.mxu0 %v7105_v30  ;;  %v7175_v30 = vld [vmem:[%s8379_s11 + $0xfc4] ss:$56 sps:$4 sm:$0xff]   ;;  %v7203_v52 = vld [vmem:[%s8379_s11 + $0x1490] ss:$56 sps:$4 sm:$0xff]  }
  0x7c   : > { %4413 = vmatpush1.bf16.msra.mxu1 %v7106_v31  ;;  %4373 = vmatprep.subr.bf16.mxu0 %v7107_v32  ;;  %v7178_v31 = vld [vmem:[%s8379_s11 + $0x1cc] ss:$56 sps:$4 sm:$0xff]   ;;  %v7173_v32 = vld [vmem:[%s8379_s11 + $0xfc0] ss:$56 sps:$4 sm:$0xff]   ;;  %v7220_v59 = vld [vmem:[%s8379_s11 + $0x5bc] ss:$56 sps:$4 sm:$0xff]  }
  0x7d   : > { %4414 = vmatprep.subr.bf16.mxu1 %v7109_v33  ;;  %v7176_v33 = vld [vmem:[%s8379_s11 + $0x1c8] ss:$56 sps:$4 sm:$0xff]   ;;  %v7211_v54 = vld [vmem:[%s8379_s11 + $0x1424] ss:$56 sps:$4 sm:$0xff]  }
  0x7e   : > { %v7215_v60 = vld [vmem:[%s8379_s11 + $0x13b0] ss:$56 sps:$4 sm:$0xff]  }
  0x7f   : > { %4374 = vmatpush2.bf16.msra.mxu0 %v7111_v34  ;;  %v7181_v34 = vld [vmem:[%s8379_s11 + $0xf54] ss:$56 sps:$4 sm:$0xff]  }
  0x80   : > { %4415 = vmatpush2.bf16.msra.mxu1 %v7112_v35  ;;  %4375 = vmatprep.subr.bf16.mxu0 %v7113_v39  ;;  %v7184_v35 = vld [vmem:[%s8379_s11 + $0x15c] ss:$56 sps:$4 sm:$0xff]   ;;  %v7190_v39 = vld [vmem:[%s8379_s11 + $0xec] ss:$56 sps:$4 sm:$0xff]  }
  0x81   : > { %4416 = vmatprep.subr.bf16.mxu1 %v7115_v40  ;;  %v7185_v40 = vld [vmem:[%s8379_s11 + $0xee0] ss:$56 sps:$4 sm:$0xff]  }
  0x83   : > { %4376 = vmatpush2.bf16.msra.mxu0 %v7117_v41  ;;  %v7188_v41 = vld [vmem:[%s8379_s11 + $0xe8] ss:$56 sps:$4 sm:$0xff]  }
  0x84   : > { %4417 = vmatpush2.bf16.msra.mxu1 %v7118_v44  ;;  %4377 = vmatprep.subr.bf16.mxu0 %v7119_v45  ;;  %v7191_v44 = vld [vmem:[%s8379_s11 + $0xe70] ss:$56 sps:$4 sm:$0xff]  }
  0x85   : > { %4418 = vmatprep.subr.bf16.mxu1 %v7121_v46  ;;  %v7194_v45 = vld [vmem:[%s8379_s11 + $0x78] ss:$56 sps:$4 sm:$0xff]   ;;  %v7199_v46 = vld [vmem:[%s8379_s11 + $0xe04] ss:$56 sps:$4 sm:$0xff]  }
  0x87   : > { %4378 = vmatpush2.bf16.msra.mxu0 %v7123_v47  ;;  %v7202_v47 = vld [vmem:[%s8379_s11 + $0xc] ss:$56 sps:$4 sm:$0xff]  }
  0x88   : > { %4419 = vmatpush2.bf16.msra.mxu1 %v7124_v48  ;;  %4379 = vmatprep.subr.bf16.mxu0 %v7125_v50  ;;  %v7197_v48 = vld [vmem:[%s8379_s11 + $0xe00] ss:$56 sps:$4 sm:$0xff]   ;;  %v7205_v50 = vld [vmem:[%s8379_s11 + $0x1494] ss:$56 sps:$4 sm:$0xff]  }
  0x89   : > { %4420 = vmatprep.subr.bf16.mxu1 %v7127_v51  ;;  %v7208_v51 = vld [vmem:[%s8379_s11 + $0x69c] ss:$56 sps:$4 sm:$0xff]  }
  0x8b   : > { %4380 = vmatpush2.bf16.msra.mxu0 %v7129_v53  ;;  %v7206_v53 = vld [vmem:[%s8379_s11 + $0x698] ss:$56 sps:$4 sm:$0xff]  }
  0x8c   : > { %4421 = vmatpush2.bf16.msra.mxu1 %v7130_v56  ;;  %4381 = vmatprep.subr.bf16.mxu0 %v7131_v57  ;;  %v7209_v56 = vld [vmem:[%s8379_s11 + $0x1420] ss:$56 sps:$4 sm:$0xff]  }
  0x8d   : > { %4422 = vmatprep.subr.bf16.mxu1 %v7133_v58  ;;  %v7212_v57 = vld [vmem:[%s8379_s11 + $0x628] ss:$56 sps:$4 sm:$0xff]   ;;  %v7217_v58 = vld [vmem:[%s8379_s11 + $0x13b4] ss:$56 sps:$4 sm:$0xff]  }
  0x8f   : > { %4382 = vmatpush2.bf16.msra.mxu0 %v7135_v61  ;;  %v7218_v61 = vld [vmem:[%s8379_s11 + $0x5b8] ss:$56 sps:$4 sm:$0xff]  }
  0x90   : > { %4423 = vmatpush2.bf16.msra.mxu1 %v7136_v0  ;;  %4383 = vmatprep.subr.bf16.mxu0 %v7137_v1  ;;  %v7223_v0 = vld [vmem:[%s8379_s11 + $0x1344] ss:$56 sps:$4 sm:$0xff]  }
  0x91   : > { %4424 = vmatprep.subr.bf16.mxu1 %v7139_v2  ;;  %v7226_v1 = vld [vmem:[%s8379_s11 + $0x54c] ss:$56 sps:$4 sm:$0xff]   ;;  %v7221_v2 = vld [vmem:[%s8379_s11 + $0x1340] ss:$56 sps:$4 sm:$0xff]  }
  0x93   : > { %4384 = vmatpush2.bf16.msra.mxu0 %v7141_v4  ;;  %v7224_v4 = vld [vmem:[%s8379_s11 + $0x548] ss:$56 sps:$4 sm:$0xff]  }
  0x94   : > { %4425 = vmatpush2.bf16.msra.mxu1 %v7142_v5  ;;  %4385 = vmatprep.subr.bf16.mxu0 %v7143_v6  ;;  %v7229_v5 = vld [vmem:[%s8379_s11 + $0x12d4] ss:$56 sps:$4 sm:$0xff]  }
  0x95   : > { %4426 = vmatprep.subr.bf16.mxu1 %v7145_v7  ;;  %v7232_v6 = vld [vmem:[%s8379_s11 + $0x4dc] ss:$56 sps:$4 sm:$0xff]   ;;  %v7227_v7 = vld [vmem:[%s8379_s11 + $0x12d0] ss:$56 sps:$4 sm:$0xff]  }
  0x97   : > { %4386 = vmatpush2.bf16.msra.mxu0 %v7147_v8  ;;  %v7230_v8 = vld [vmem:[%s8379_s11 + $0x4d8] ss:$56 sps:$4 sm:$0xff]  }
  0x98   : > { %4427 = vmatpush2.bf16.msra.mxu1 %v7148_v9  ;;  %4387 = vmatprep.subr.bf16.mxu0 %v7149_v10  ;;  %v7235_v9 = vld [vmem:[%s8379_s11 + $0x1264] ss:$56 sps:$4 sm:$0xff]  }
  0x99   : > { %4428 = vmatprep.subr.bf16.mxu1 %v7151_v11  ;;  %v7238_v10 = vld [vmem:[%s8379_s11 + $0x46c] ss:$56 sps:$4 sm:$0xff]   ;;  %v7233_v11 = vld [vmem:[%s8379_s11 + $0x1260] ss:$56 sps:$4 sm:$0xff]  }
  0x9b   : > { %4388 = vmatpush2.bf16.msra.mxu0 %v7153_v12  ;;  %v7236_v12 = vld [vmem:[%s8379_s11 + $0x468] ss:$56 sps:$4 sm:$0xff]  }
  0x9c   : > { %4429 = vmatpush2.bf16.msra.mxu1 %v7154_v14  ;;  %4439 = vmatprep.subr.bf16.mxu0 %v7157_v15  ;;  %v7241_v14 = vld [vmem:[%s8379_s11 + $0x11f4] ss:$56 sps:$4 sm:$0xff]  }
  0x9d   : > { %4480 = vmatprep.subr.bf16.mxu1 %v7160_v16  ;;  %v7244_v15 = vld [vmem:[%s8379_s11 + $0x3fc] ss:$56 sps:$4 sm:$0xff]   ;;  %v7239_v16 = vld [vmem:[%s8379_s11 + $0x11f0] ss:$56 sps:$4 sm:$0xff]  }
  0x9e   : > { %4390 = vmatmul.mubr.bf16.vlgmr.msra.gmra.mxu0 %v8486_v13 }
  0x9f   : > { %4431 = vmatmul.mubr.bf16.vlgmr.msra.gmra.mxu1 %v8493_v18  ;;  %4440 = vmatpush1.bf16.msra.mxu0 %v7155_v19  ;;  %v7247_v19 = vld [vmem:[%s8379_s11 + $0x1184] ss:$56 sps:$4 sm:$0xff]  }
  0xa0   : > { %4481 = vmatpush1.bf16.msra.mxu1 %v7158_v20  ;;  %4441 = vmatprep.subr.bf16.mxu0 %v7163_v21  ;;  %v7250_v20 = vld [vmem:[%s8379_s11 + $0x38c] ss:$56 sps:$4 sm:$0xff]   ;;  %v7245_v21 = vld [vmem:[%s8379_s11 + $0x1180] ss:$56 sps:$4 sm:$0xff]  }
  0xa1   : > { %4482 = vmatprep.subr.bf16.mxu1 %v7166_v22  ;;  %4471 = vmatprep.mubr.bf16.mxu0 %v8500_v23  ;;  %v7248_v22 = vld [vmem:[%s8379_s11 + $0x388] ss:$56 sps:$4 sm:$0xff]  }
  0xa2   : > { %4512 = vmatprep.mubr.bf16.mxu1 %v8462_v62 }
  0xa3   : > { %4442 = vmatpush1.bf16.msra.mxu0 %v7161_v24  ;;  %v7254_v24 = vld [vmem:[%s8379_s11 + $0xa1c] ss:$56 sps:$4 sm:$0xff]  }
  0xa4   : > { %4483 = vmatpush1.bf16.msra.mxu1 %v7164_v25  ;;  %4443 = vmatprep.subr.bf16.mxu0 %v7169_v26  ;;  %v7257_v25 = vld [vmem:[%s8379_s11 + $0x111c] ss:$56 sps:$4 sm:$0xff]   ;;  %v7252_v26 = vld [vmem:[%s8379_s11 + $0xa18] ss:$56 sps:$4 sm:$0xff]  }
  0xa5   : > { %4484 = vmatprep.subr.bf16.mxu1 %v7172_v27  ;;  %v7255_v27 = vld [vmem:[%s8379_s11 + $0x1118] ss:$56 sps:$4 sm:$0xff]  }
  0xa7   : > { %4444 = vmatpush1.bf16.msra.mxu0 %v7167_v28  ;;  %v7260_v28 = vld [vmem:[%s8379_s11 + $0x9ac] ss:$56 sps:$4 sm:$0xff]  }
  0xa8   : > { %4485 = vmatpush1.bf16.msra.mxu1 %v7170_v29  ;;  %4445 = vmatprep.subr.bf16.mxu0 %v7175_v30  ;;  %v7263_v29 = vld [vmem:[%s8379_s11 + $0x10ac] ss:$56 sps:$4 sm:$0xff]   ;;  %v7258_v30 = vld [vmem:[%s8379_s11 + $0x9a8] ss:$56 sps:$4 sm:$0xff]  }
  0xa9   : > { %4486 = vmatprep.subr.bf16.mxu1 %v7178_v31  ;;  %v7261_v31 = vld [vmem:[%s8379_s11 + $0x10a8] ss:$56 sps:$4 sm:$0xff]  }
  0xab   : > { %4446 = vmatpush1.bf16.msra.mxu0 %v7173_v32  ;;  %v7266_v32 = vld [vmem:[%s8379_s11 + $0x93c] ss:$56 sps:$4 sm:$0xff]  }
  0xac   : > { %4487 = vmatpush1.bf16.msra.mxu1 %v7176_v33  ;;  %4447 = vmatprep.subr.bf16.mxu0 %v7181_v34  ;;  %v7269_v33 = vld [vmem:[%s8379_s11 + $0x103c] ss:$56 sps:$4 sm:$0xff]   ;;  %v7264_v34 = vld [vmem:[%s8379_s11 + $0x938] ss:$56 sps:$4 sm:$0xff]  }
  0xad   : > { %4488 = vmatprep.subr.bf16.mxu1 %v7184_v35  ;;  %v7267_v35 = vld [vmem:[%s8379_s11 + $0x1038] ss:$56 sps:$4 sm:$0xff]  }
  0xaf   : > { %4448 = vmatpush1.bf16.msra.mxu0 %v7179_v36  ;;  %v7272_v36 = vld [vmem:[%s8379_s11 + $0x8cc] ss:$56 sps:$4 sm:$0xff]  }
  0xb0   : > { %4489 = vmatpush1.bf16.msra.mxu1 %v7182_v37  ;;  %4449 = vmatprep.subr.bf16.mxu0 %v7187_v38  ;;  %v7275_v37 = vld [vmem:[%s8379_s11 + $0xfcc] ss:$56 sps:$4 sm:$0xff]   ;;  %v7270_v38 = vld [vmem:[%s8379_s11 + $0x8c8] ss:$56 sps:$4 sm:$0xff]  }
  0xb1   : > { %4490 = vmatprep.subr.bf16.mxu1 %v7190_v39  ;;  %v7273_v39 = vld [vmem:[%s8379_s11 + $0xfc8] ss:$56 sps:$4 sm:$0xff]  }
  0xb3   : > { %4450 = vmatpush1.bf16.msra.mxu0 %v7185_v40  ;;  %v7278_v40 = vld [vmem:[%s8379_s11 + $0x85c] ss:$56 sps:$4 sm:$0xff]  }
  0xb4   : > { %4491 = vmatpush1.bf16.msra.mxu1 %v7188_v41  ;;  %4451 = vmatprep.subr.bf16.mxu0 %v7193_v42  ;;  %v7281_v41 = vld [vmem:[%s8379_s11 + $0xf5c] ss:$56 sps:$4 sm:$0xff]   ;;  %v7276_v42 = vld [vmem:[%s8379_s11 + $0x858] ss:$56 sps:$4 sm:$0xff]  }
  0xb5   : > { %4492 = vmatprep.subr.bf16.mxu1 %v7196_v43  ;;  %v7279_v43 = vld [vmem:[%s8379_s11 + $0xf58] ss:$56 sps:$4 sm:$0xff]  }
  0xb7   : > { %4452 = vmatpush1.bf16.msra.mxu0 %v7191_v44  ;;  %v7284_v44 = vld [vmem:[%s8379_s11 + $0x7ec] ss:$56 sps:$4 sm:$0xff]  }
  0xb8   : > { %4493 = vmatpush1.bf16.msra.mxu1 %v7194_v45  ;;  %4453 = vmatprep.subr.bf16.mxu0 %v7199_v46  ;;  %v7287_v45 = vld [vmem:[%s8379_s11 + $0xeec] ss:$56 sps:$4 sm:$0xff]   ;;  %v7282_v46 = vld [vmem:[%s8379_s11 + $0x7e8] ss:$56 sps:$4 sm:$0xff]  }
  0xb9   : > { %4494 = vmatprep.subr.bf16.mxu1 %v7202_v47  ;;  %v7285_v47 = vld [vmem:[%s8379_s11 + $0xee8] ss:$56 sps:$4 sm:$0xff]  }
  0xbb   : > { %4454 = vmatpush1.bf16.msra.mxu0 %v7197_v48  ;;  %v7290_v48 = vld [vmem:[%s8379_s11 + $0x77c] ss:$56 sps:$4 sm:$0xff]  }
  0xbc   : > { %4495 = vmatpush1.bf16.msra.mxu1 %v7200_v49  ;;  %4455 = vmatprep.subr.bf16.mxu0 %v7205_v50  ;;  %v7293_v49 = vld [vmem:[%s8379_s11 + $0xe7c] ss:$56 sps:$4 sm:$0xff]   ;;  %v7288_v50 = vld [vmem:[%s8379_s11 + $0x778] ss:$56 sps:$4 sm:$0xff]  }
  0xbd   : > { %4496 = vmatprep.subr.bf16.mxu1 %v7208_v51  ;;  %v7291_v51 = vld [vmem:[%s8379_s11 + $0xe78] ss:$56 sps:$4 sm:$0xff]  }
  0xbf   : > { %4456 = vmatpush2.bf16.msra.mxu0 %v7203_v52  ;;  %v7296_v52 = vld [vmem:[%s8379_s11 + $0x70c] ss:$56 sps:$4 sm:$0xff]  }
  0xc0   : > { %4497 = vmatpush2.bf16.msra.mxu1 %v7206_v53  ;;  %4457 = vmatprep.subr.bf16.mxu0 %v7211_v54  ;;  %v7299_v53 = vld [vmem:[%s8379_s11 + $0xe0c] ss:$56 sps:$4 sm:$0xff]   ;;  %v7294_v54 = vld [vmem:[%s8379_s11 + $0x708] ss:$56 sps:$4 sm:$0xff]  }
  0xc1   : > { %4498 = vmatprep.subr.bf16.mxu1 %v7214_v55  ;;  %v7297_v55 = vld [vmem:[%s8379_s11 + $0xe08] ss:$56 sps:$4 sm:$0xff]  }
  0xc3   : > { %4458 = vmatpush2.bf16.msra.mxu0 %v7209_v56  ;;  %v7302_v56 = vld [vmem:[%s8379_s11 + $0xd9c] ss:$56 sps:$4 sm:$0xff]  }
  0xc4   : > { %4499 = vmatpush2.bf16.msra.mxu1 %v7212_v57  ;;  %4459 = vmatprep.subr.bf16.mxu0 %v7217_v58  ;;  %v7305_v57 = vld [vmem:[%s8379_s11 + $0x149c] ss:$56 sps:$4 sm:$0xff]   ;;  %v7300_v58 = vld [vmem:[%s8379_s11 + $0xd98] ss:$56 sps:$4 sm:$0xff]  }
  0xc5   : > { %4500 = vmatprep.subr.bf16.mxu1 %v7220_v59  ;;  %v7303_v59 = vld [vmem:[%s8379_s11 + $0x1498] ss:$56 sps:$4 sm:$0xff]  }
  0xc7   : > { %4460 = vmatpush2.bf16.msra.mxu0 %v7215_v60  ;;  %v7308_v60 = vld [vmem:[%s8379_s11 + $0xd2c] ss:$56 sps:$4 sm:$0xff]  }
  0xc8   : > { %4501 = vmatpush2.bf16.msra.mxu1 %v7218_v61  ;;  %4461 = vmatprep.subr.bf16.mxu0 %v7223_v0  ;;  %v7311_v61 = vld [vmem:[%s8379_s11 + $0x142c] ss:$56 sps:$4 sm:$0xff]   ;;  %v7306_v0 = vld [vmem:[%s8379_s11 + $0xd28] ss:$56 sps:$4 sm:$0xff]  }
  0xc9   : > { %4502 = vmatprep.subr.bf16.mxu1 %v7226_v1  ;;  %v7309_v1 = vld [vmem:[%s8379_s11 + $0x1428] ss:$56 sps:$4 sm:$0xff]  }
  0xcb   : > { %4462 = vmatpush2.bf16.msra.mxu0 %v7221_v2  ;;  %v7314_v2 = vld [vmem:[%s8379_s11 + $0xcbc] ss:$56 sps:$4 sm:$0xff]  }
  0xcc   : > { %4503 = vmatpush2.bf16.msra.mxu1 %v7224_v4  ;;  %4463 = vmatprep.subr.bf16.mxu0 %v7229_v5  ;;  %v7317_v4 = vld [vmem:[%s8379_s11 + $0x13bc] ss:$56 sps:$4 sm:$0xff]   ;;  %v7312_v5 = vld [vmem:[%s8379_s11 + $0xcb8] ss:$56 sps:$4 sm:$0xff]  }
  0xcd   : > { %4504 = vmatprep.subr.bf16.mxu1 %v7232_v6  ;;  %v7315_v6 = vld [vmem:[%s8379_s11 + $0x13b8] ss:$56 sps:$4 sm:$0xff]  }
  0xcf   : > { %4464 = vmatpush2.bf16.msra.mxu0 %v7227_v7  ;;  %v7320_v7 = vld [vmem:[%s8379_s11 + $0xc4c] ss:$56 sps:$4 sm:$0xff]  }
  0xd0   : > { %4505 = vmatpush2.bf16.msra.mxu1 %v7230_v8  ;;  %4465 = vmatprep.subr.bf16.mxu0 %v7235_v9  ;;  %v7323_v8 = vld [vmem:[%s8379_s11 + $0x134c] ss:$56 sps:$4 sm:$0xff]   ;;  %v7318_v9 = vld [vmem:[%s8379_s11 + $0xc48] ss:$56 sps:$4 sm:$0xff]  }
  0xd1   : > { %4506 = vmatprep.subr.bf16.mxu1 %v7238_v10  ;;  %v7321_v10 = vld [vmem:[%s8379_s11 + $0x1348] ss:$56 sps:$4 sm:$0xff]  }
  0xd3   : > { %4466 = vmatpush2.bf16.msra.mxu0 %v7233_v11  ;;  %v7326_v11 = vld [vmem:[%s8379_s11 + $0xbdc] ss:$56 sps:$4 sm:$0xff]  }
  0xd4   : > { %4507 = vmatpush2.bf16.msra.mxu1 %v7236_v12  ;;  %4467 = vmatprep.subr.bf16.mxu0 %v7241_v14  ;;  %v7329_v12 = vld [vmem:[%s8379_s11 + $0x12dc] ss:$56 sps:$4 sm:$0xff]   ;;  %v7324_v14 = vld [vmem:[%s8379_s11 + $0xbd8] ss:$56 sps:$4 sm:$0xff]  }
  0xd5   : > { %4508 = vmatprep.subr.bf16.mxu1 %v7244_v15  ;;  %v7327_v15 = vld [vmem:[%s8379_s11 + $0x12d8] ss:$56 sps:$4 sm:$0xff]  }
  0xd7   : > { %4468 = vmatpush2.bf16.msra.mxu0 %v7239_v16  ;;  %v7332_v16 = vld [vmem:[%s8379_s11 + $0xb6c] ss:$56 sps:$4 sm:$0xff]  }
  0xd8   : > { %4509 = vmatpush2.bf16.msra.mxu1 %v7242_v17  ;;  %4469 = vmatprep.subr.bf16.mxu0 %v7247_v19  ;;  %v7335_v17 = vld [vmem:[%s8379_s11 + $0x126c] ss:$56 sps:$4 sm:$0xff]   ;;  %v7330_v19 = vld [vmem:[%s8379_s11 + $0xb68] ss:$56 sps:$4 sm:$0xff]  }
  0xd9   : > { %4510 = vmatprep.subr.bf16.mxu1 %v7250_v20  ;;  %v7333_v20 = vld [vmem:[%s8379_s11 + $0x1268] ss:$56 sps:$4 sm:$0xff]  }
  0xdb   : > { %4470 = vmatpush2.bf16.msra.mxu0 %v7245_v21  ;;  %v7338_v21 = vld [vmem:[%s8379_s11 + $0xafc] ss:$56 sps:$4 sm:$0xff]  }
  0xdc   : > { %4511 = vmatpush2.bf16.msra.mxu1 %v7248_v22  ;;  %4521 = vmatprep.subr.bf16.mxu0 %v7254_v24  ;;  %v7341_v22 = vld [vmem:[%s8379_s11 + $0x11fc] ss:$56 sps:$4 sm:$0xff]   ;;  %v7336_v24 = vld [vmem:[%s8379_s11 + $0xaf8] ss:$56 sps:$4 sm:$0xff]  }
  0xdd   : > { %4562 = vmatprep.subr.bf16.mxu1 %v7257_v25  ;;  %v7339_v25 = vld [vmem:[%s8379_s11 + $0x11f8] ss:$56 sps:$4 sm:$0xff]  }
  0xde   : > { %4472 = vmatmul.mubr.bf16.vlgmr.msra.gmra.mxu0 %v8465_v63 }
  0xdf   : > { %4513 = vmatmul.mubr.bf16.vlgmr.msra.gmra.mxu1 %v8486_v13  ;;  %4522 = vmatpush1.bf16.msra.mxu0 %v7252_v26  ;;  %v7344_v26 = vld [vmem:[%s8379_s11 + $0xa8c] ss:$56 sps:$4 sm:$0xff]  }
  0xe0   : > { %4563 = vmatpush1.bf16.msra.mxu1 %v7255_v27  ;;  %4523 = vmatprep.subr.bf16.mxu0 %v7260_v28  ;;  %v7347_v27 = vld [vmem:[%s8379_s11 + $0x118c] ss:$56 sps:$4 sm:$0xff]   ;;  %v7342_v28 = vld [vmem:[%s8379_s11 + $0xa88] ss:$56 sps:$4 sm:$0xff]  }
  0xe1   : > { %4564 = vmatprep.subr.bf16.mxu1 %v7263_v29  ;;  %4553 = vmatprep.mubr.bf16.mxu0 %v8472_v3  ;;  %v7345_v29 = vld [vmem:[%s8379_s11 + $0x1188] ss:$56 sps:$4 sm:$0xff]  }
  0xe2   : > { %4594 = vmatprep.mubr.bf16.mxu1 %v8500_v23 }
  0xe3   : > { %4524 = vmatpush1.bf16.msra.mxu0 %v7258_v30  ;;  %v7350_v30 = vld [vmem:[%s8379_s11 + $0x324] ss:$56 sps:$4 sm:$0xff]  }
  0xe4   : > { %4565 = vmatpush1.bf16.msra.mxu1 %v7261_v31  ;;  %4525 = vmatprep.subr.bf16.mxu0 %v7266_v32  ;;  %v7353_v31 = vld [vmem:[%s8379_s11 + $0xa24] ss:$56 sps:$4 sm:$0xff]   ;;  %v7348_v32 = vld [vmem:[%s8379_s11 + $0x320] ss:$56 sps:$4 sm:$0xff]  }
  0xe5   : > { %4566 = vmatprep.subr.bf16.mxu1 %v7269_v33  ;;  %v7351_v33 = vld [vmem:[%s8379_s11 + $0xa20] ss:$56 sps:$4 sm:$0xff]  }
  0xe7   : > { %4526 = vmatpush1.bf16.msra.mxu0 %v7264_v34  ;;  %v7356_v34 = vld [vmem:[%s8379_s11 + $0x2b4] ss:$56 sps:$4 sm:$0xff]  }
  0xe8   : > { %4567 = vmatpush1.bf16.msra.mxu1 %v7267_v35  ;;  %4527 = vmatprep.subr.bf16.mxu0 %v7272_v36  ;;  %v7359_v35 = vld [vmem:[%s8379_s11 + $0x9b4] ss:$56 sps:$4 sm:$0xff]   ;;  %v7354_v36 = vld [vmem:[%s8379_s11 + $0x2b0] ss:$56 sps:$4 sm:$0xff]  }
  0xe9   : > { %4568 = vmatprep.subr.bf16.mxu1 %v7275_v37  ;;  %v7357_v37 = vld [vmem:[%s8379_s11 + $0x9b0] ss:$56 sps:$4 sm:$0xff]  }
  0xeb   : > { %4528 = vmatpush1.bf16.msra.mxu0 %v7270_v38  ;;  %v7362_v38 = vld [vmem:[%s8379_s11 + $0x244] ss:$56 sps:$4 sm:$0xff]  }
  0xec   : > { %4569 = vmatpush1.bf16.msra.mxu1 %v7273_v39  ;;  %4529 = vmatprep.subr.bf16.mxu0 %v7278_v40  ;;  %v7365_v39 = vld [vmem:[%s8379_s11 + $0x944] ss:$56 sps:$4 sm:$0xff]   ;;  %v7360_v40 = vld [vmem:[%s8379_s11 + $0x240] ss:$56 sps:$4 sm:$0xff]  }
  0xed   : > { %4570 = vmatprep.subr.bf16.mxu1 %v7281_v41  ;;  %v7363_v41 = vld [vmem:[%s8379_s11 + $0x940] ss:$56 sps:$4 sm:$0xff]  }
  0xef   : > { %4530 = vmatpush1.bf16.msra.mxu0 %v7276_v42  ;;  %v7368_v42 = vld [vmem:[%s8379_s11 + $0x1d4] ss:$56 sps:$4 sm:$0xff]  }
  0xf0   : > { %4571 = vmatpush1.bf16.msra.mxu1 %v7279_v43  ;;  %4531 = vmatprep.subr.bf16.mxu0 %v7284_v44  ;;  %v7371_v43 = vld [vmem:[%s8379_s11 + $0x8d4] ss:$56 sps:$4 sm:$0xff]   ;;  %v7366_v44 = vld [vmem:[%s8379_s11 + $0x1d0] ss:$56 sps:$4 sm:$0xff]  }
  0xf1   : > { %4572 = vmatprep.subr.bf16.mxu1 %v7287_v45  ;;  %v7369_v45 = vld [vmem:[%s8379_s11 + $0x8d0] ss:$56 sps:$4 sm:$0xff]  }
  0xf3   : > { %4532 = vmatpush1.bf16.msra.mxu0 %v7282_v46  ;;  %v7374_v46 = vld [vmem:[%s8379_s11 + $0x164] ss:$56 sps:$4 sm:$0xff]  }
  0xf4   : > { %4573 = vmatpush1.bf16.msra.mxu1 %v7285_v47  ;;  %4533 = vmatprep.subr.bf16.mxu0 %v7290_v48  ;;  %v7377_v47 = vld [vmem:[%s8379_s11 + $0x864] ss:$56 sps:$4 sm:$0xff]   ;;  %v7372_v48 = vld [vmem:[%s8379_s11 + $0x160] ss:$56 sps:$4 sm:$0xff]  }
  0xf5   : > { %4574 = vmatprep.subr.bf16.mxu1 %v7293_v49  ;;  %v7375_v49 = vld [vmem:[%s8379_s11 + $0x860] ss:$56 sps:$4 sm:$0xff]  }
  0xf7   : > { %4534 = vmatpush1.bf16.msra.mxu0 %v7288_v50  ;;  %v7380_v50 = vld [vmem:[%s8379_s11 + $0xf4] ss:$56 sps:$4 sm:$0xff]  }
  0xf8   : > { %4575 = vmatpush1.bf16.msra.mxu1 %v7291_v51  ;;  %4535 = vmatprep.subr.bf16.mxu0 %v7296_v52  ;;  %v7383_v51 = vld [vmem:[%s8379_s11 + $0x7f4] ss:$56 sps:$4 sm:$0xff]   ;;  %v7378_v52 = vld [vmem:[%s8379_s11 + $0xf0] ss:$56 sps:$4 sm:$0xff]  }
  0xf9   : > { %4576 = vmatprep.subr.bf16.mxu1 %v7299_v53  ;;  %v7381_v53 = vld [vmem:[%s8379_s11 + $0x7f0] ss:$56 sps:$4 sm:$0xff]  }
  0xfb   : > { %4536 = vmatpush1.bf16.msra.mxu0 %v7294_v54  ;;  %v7386_v54 = vld [vmem:[%s8379_s11 + $0x84] ss:$56 sps:$4 sm:$0xff]  }
  0xfc   : > { %4577 = vmatpush1.bf16.msra.mxu1 %v7297_v55  ;;  %4537 = vmatprep.subr.bf16.mxu0 %v7302_v56  ;;  %v7389_v55 = vld [vmem:[%s8379_s11 + $0x784] ss:$56 sps:$4 sm:$0xff]   ;;  %v7384_v56 = vld [vmem:[%s8379_s11 + $0x80] ss:$56 sps:$4 sm:$0xff]  }
  0xfd   : > { %4578 = vmatprep.subr.bf16.mxu1 %v7305_v57  ;;  %v7387_v57 = vld [vmem:[%s8379_s11 + $0x780] ss:$56 sps:$4 sm:$0xff]  }
  0xff   : > { %4538 = vmatpush2.bf16.msra.mxu0 %v7300_v58  ;;  %v7392_v58 = vld [vmem:[%s8379_s11 + $0x14] ss:$56 sps:$4 sm:$0xff]  }
 0x100   : > { %4579 = vmatpush2.bf16.msra.mxu1 %v7303_v59  ;;  %4539 = vmatprep.subr.bf16.mxu0 %v7308_v60  ;;  %v7395_v59 = vld [vmem:[%s8379_s11 + $0x714] ss:$56 sps:$4 sm:$0xff]   ;;  %v7390_v60 = vld [vmem:[%s8379_s11 + $0x10] ss:$56 sps:$4 sm:$0xff]  }
 0x101   : > { %4580 = vmatprep.subr.bf16.mxu1 %v7311_v61  ;;  %v7393_v61 = vld [vmem:[%s8379_s11 + $0x710] ss:$56 sps:$4 sm:$0xff]  }
 0x103   : > { %4540 = vmatpush2.bf16.msra.mxu0 %v7306_v0  ;;  %v7398_v0 = vld [vmem:[%s8379_s11 + $0x6a4] ss:$56 sps:$4 sm:$0xff]  }
 0x104   : > { %4581 = vmatpush2.bf16.msra.mxu1 %v7309_v1  ;;  %4541 = vmatprep.subr.bf16.mxu0 %v7314_v2  ;;  %v7401_v1 = vld [vmem:[%s8379_s11 + $0xda4] ss:$56 sps:$4 sm:$0xff]   ;;  %v7396_v2 = vld [vmem:[%s8379_s11 + $0x6a0] ss:$56 sps:$4 sm:$0xff]  }
 0x105   : > { %4582 = vmatprep.subr.bf16.mxu1 %v7317_v4  ;;  %v7399_v4 = vld [vmem:[%s8379_s11 + $0xda0] ss:$56 sps:$4 sm:$0xff]  }
 0x107   : > { %4542 = vmatpush2.bf16.msra.mxu0 %v7312_v5  ;;  %v7404_v5 = vld [vmem:[%s8379_s11 + $0x634] ss:$56 sps:$4 sm:$0xff]  }
 0x108   : > { %4583 = vmatpush2.bf16.msra.mxu1 %v7315_v6  ;;  %4543 = vmatprep.subr.bf16.mxu0 %v7320_v7  ;;  %v7407_v6 = vld [vmem:[%s8379_s11 + $0xd34] ss:$56 sps:$4 sm:$0xff]   ;;  %v7402_v7 = vld [vmem:[%s8379_s11 + $0x630] ss:$56 sps:$4 sm:$0xff]  }
 0x109   : > { %4584 = vmatprep.subr.bf16.mxu1 %v7323_v8  ;;  %v7405_v8 = vld [vmem:[%s8379_s11 + $0xd30] ss:$56 sps:$4 sm:$0xff]  }
 0x10b   : > { %4544 = vmatpush2.bf16.msra.mxu0 %v7318_v9  ;;  %v7410_v9 = vld [vmem:[%s8379_s11 + $0x5c4] ss:$56 sps:$4 sm:$0xff]  }
 0x10c   : > { %4585 = vmatpush2.bf16.msra.mxu1 %v7321_v10  ;;  %4545 = vmatprep.subr.bf16.mxu0 %v7326_v11  ;;  %v7413_v10 = vld [vmem:[%s8379_s11 + $0xcc4] ss:$56 sps:$4 sm:$0xff]   ;;  %v7408_v11 = vld [vmem:[%s8379_s11 + $0x5c0] ss:$56 sps:$4 sm:$0xff]  }
 0x10d   : > { %4586 = vmatprep.subr.bf16.mxu1 %v7329_v12  ;;  %v7411_v12 = vld [vmem:[%s8379_s11 + $0xcc0] ss:$56 sps:$4 sm:$0xff]  }
 0x10f   : > { %4546 = vmatpush2.bf16.msra.mxu0 %v7324_v14  ;;  %v7416_v14 = vld [vmem:[%s8379_s11 + $0x554] ss:$56 sps:$4 sm:$0xff]  }
 0x110   : > { %4587 = vmatpush2.bf16.msra.mxu1 %v7327_v15  ;;  %4547 = vmatprep.subr.bf16.mxu0 %v7332_v16  ;;  %v7419_v15 = vld [vmem:[%s8379_s11 + $0xc54] ss:$56 sps:$4 sm:$0xff]   ;;  %v7414_v16 = vld [vmem:[%s8379_s11 + $0x550] ss:$56 sps:$4 sm:$0xff]  }
 0x111   : > { %4588 = vmatprep.subr.bf16.mxu1 %v7335_v17  ;;  %v7417_v17 = vld [vmem:[%s8379_s11 + $0xc50] ss:$56 sps:$4 sm:$0xff]  }
 0x113   : > { %4548 = vmatpush2.bf16.msra.mxu0 %v7330_v19  ;;  %v7422_v19 = vld [vmem:[%s8379_s11 + $0x4e4] ss:$56 sps:$4 sm:$0xff]  }
 0x114   : > { %4589 = vmatpush2.bf16.msra.mxu1 %v7333_v20  ;;  %4549 = vmatprep.subr.bf16.mxu0 %v7338_v21  ;;  %v7425_v20 = vld [vmem:[%s8379_s11 + $0xbe4] ss:$56 sps:$4 sm:$0xff]   ;;  %v7420_v21 = vld [vmem:[%s8379_s11 + $0x4e0] ss:$56 sps:$4 sm:$0xff]  }
 0x115   : > { %4590 = vmatprep.subr.bf16.mxu1 %v7341_v22  ;;  %v7423_v22 = vld [vmem:[%s8379_s11 + $0xbe0] ss:$56 sps:$4 sm:$0xff]  }
 0x117   : > { %4550 = vmatpush2.bf16.msra.mxu0 %v7336_v24  ;;  %v7428_v24 = vld [vmem:[%s8379_s11 + $0x474] ss:$56 sps:$4 sm:$0xff]  }
 0x118   : > { %4591 = vmatpush2.bf16.msra.mxu1 %v7339_v25  ;;  %4551 = vmatprep.subr.bf16.mxu0 %v7344_v26  ;;  %v7431_v25 = vld [vmem:[%s8379_s11 + $0xb74] ss:$56 sps:$4 sm:$0xff]   ;;  %v7426_v26 = vld [vmem:[%s8379_s11 + $0x470] ss:$56 sps:$4 sm:$0xff]  }
 0x119   : > { %4592 = vmatprep.subr.bf16.mxu1 %v7347_v27  ;;  %v7429_v27 = vld [vmem:[%s8379_s11 + $0xb70] ss:$56 sps:$4 sm:$0xff]  }
 0x11b   : > { %4552 = vmatpush2.bf16.msra.mxu0 %v7342_v28  ;;  %v7434_v28 = vld [vmem:[%s8379_s11 + $0x404] ss:$56 sps:$4 sm:$0xff]  }
 0x11c   : > { %4593 = vmatpush2.bf16.msra.mxu1 %v7345_v29  ;;  %4603 = vmatprep.subr.bf16.mxu0 %v7350_v30  ;;  %v7437_v29 = vld [vmem:[%s8379_s11 + $0xb04] ss:$56 sps:$4 sm:$0xff]   ;;  %v7432_v30 = vld [vmem:[%s8379_s11 + $0x400] ss:$56 sps:$4 sm:$0xff]  }
 0x11d   : > { %4644 = vmatprep.subr.bf16.mxu1 %v7353_v31  ;;  %v7435_v31 = vld [vmem:[%s8379_s11 + $0xb00] ss:$56 sps:$4 sm:$0xff]  }
 0x11e   : > { %4554 = vmatmul.mubr.bf16.vlgmr.msra.gmra.mxu0 %v8493_v18 }
 0x11f   : > { %4595 = vmatmul.mubr.bf16.vlgmr.msra.gmra.mxu1 %v8465_v63  ;;  %4604 = vmatpush1.bf16.msra.mxu0 %v7348_v32  ;;  %v7440_v32 = vld [vmem:[%s8379_s11 + $0x394] ss:$56 sps:$4 sm:$0xff]  }
 0x120   : > { %4645 = vmatpush1.bf16.msra.mxu1 %v7351_v33  ;;  %4605 = vmatprep.subr.bf16.mxu0 %v7356_v34  ;;  %v7443_v33 = vld [vmem:[%s8379_s11 + $0xa94] ss:$56 sps:$4 sm:$0xff]   ;;  %v7438_v34 = vld [vmem:[%s8379_s11 + $0x390] ss:$56 sps:$4 sm:$0xff]  }
 0x121   : > { %4646 = vmatprep.subr.bf16.mxu1 %v7359_v35  ;;  %4635 = vmatprep.mubr.bf16.mxu0 %v8462_v62  ;;  %v7441_v35 = vld [vmem:[%s8379_s11 + $0xa90] ss:$56 sps:$4 sm:$0xff]  }
 0x122   : > { %4676 = vmatprep.mubr.bf16.mxu1 %v8472_v3 }
 0x123   : > { %4606 = vmatpush1.bf16.msra.mxu0 %v7354_v36  ;;  %v7446_v36 = vld [vmem:[%s8379_s11 + $0x1124] ss:$56 sps:$4 sm:$0xff]  }
 0x124   : > { %4647 = vmatpush1.bf16.msra.mxu1 %v7357_v37  ;;  %4607 = vmatprep.subr.bf16.mxu0 %v7362_v38  ;;  %v7449_v37 = vld [vmem:[%s8379_s11 + $0x32c] ss:$56 sps:$4 sm:$0xff]   ;;  %v7444_v38 = vld [vmem:[%s8379_s11 + $0x1120] ss:$56 sps:$4 sm:$0xff]  }
 0x125   : > { %4648 = vmatprep.subr.bf16.mxu1 %v7365_v39  ;;  %v7447_v39 = vld [vmem:[%s8379_s11 + $0x328] ss:$56 sps:$4 sm:$0xff]  }
 0x127   : > { %4608 = vmatpush1.bf16.msra.mxu0 %v7360_v40  ;;  %v7452_v40 = vld [vmem:[%s8379_s11 + $0x10b4] ss:$56 sps:$4 sm:$0xff]  }
 0x128   : > { %4649 = vmatpush1.bf16.msra.mxu1 %v7363_v41  ;;  %4609 = vmatprep.subr.bf16.mxu0 %v7368_v42  ;;  %v7455_v41 = vld [vmem:[%s8379_s11 + $0x2bc] ss:$56 sps:$4 sm:$0xff]   ;;  %v7450_v42 = vld [vmem:[%s8379_s11 + $0x10b0] ss:$56 sps:$4 sm:$0xff]  }
 0x129   : > { %4650 = vmatprep.subr.bf16.mxu1 %v7371_v43  ;;  %v7453_v43 = vld [vmem:[%s8379_s11 + $0x2b8] ss:$56 sps:$4 sm:$0xff]  }
 0x12b   : > { %4610 = vmatpush1.bf16.msra.mxu0 %v7366_v44 }
 0x12c   : > { %4651 = vmatpush1.bf16.msra.mxu1 %v7369_v45  ;;  %4611 = vmatprep.subr.bf16.mxu0 %v7374_v46 }
 0x12d   : > { %4652 = vmatprep.subr.bf16.mxu1 %v7377_v47 }
 0x12f   : > { %4612 = vmatpush1.bf16.msra.mxu0 %v7372_v48 }
 0x130   : > { %4653 = vmatpush1.bf16.msra.mxu1 %v7375_v49  ;;  %4613 = vmatprep.subr.bf16.mxu0 %v7380_v50  ;;  %v7458_v49 = vld [vmem:[%s8379_s11 + $0x1044] ss:$56 sps:$4 sm:$0xff]  }
 0x131   : > { %4654 = vmatprep.subr.bf16.mxu1 %v7383_v51  ;;  %v7461_v50 = vld [vmem:[%s8379_s11 + $0x24c] ss:$56 sps:$4 sm:$0xff]  }
 0x133   : > { %4614 = vmatpush1.bf16.msra.mxu0 %v7378_v52  ;;  %v7456_v52 = vld [vmem:[%s8379_s11 + $0x1040] ss:$56 sps:$4 sm:$0xff]  }
 0x134   : > { %4655 = vmatpush1.bf16.msra.mxu1 %v7381_v53  ;;  %4615 = vmatprep.subr.bf16.mxu0 %v7386_v54  ;;  %v7459_v53 = vld [vmem:[%s8379_s11 + $0x248] ss:$56 sps:$4 sm:$0xff]  }
 0x135   : > { %4656 = vmatprep.subr.bf16.mxu1 %v7389_v55 }
 0x137   : > { %4616 = vmatpush1.bf16.msra.mxu0 %v7384_v56 }
 0x138   : > { %4657 = vmatpush1.bf16.msra.mxu1 %v7387_v57  ;;  %4617 = vmatprep.subr.bf16.mxu0 %v7392_v58  ;;  %v7464_v57 = vld [vmem:[%s8379_s11 + $0xfd4] ss:$56 sps:$4 sm:$0xff]  }
 0x139   : > { %4658 = vmatprep.subr.bf16.mxu1 %v7395_v59  ;;  %v7467_v58 = vld [vmem:[%s8379_s11 + $0x1dc] ss:$56 sps:$4 sm:$0xff]  }
 0x13b   : > { %4618 = vmatpush1.bf16.msra.mxu0 %v7390_v60  ;;  %v7462_v60 = vld [vmem:[%s8379_s11 + $0xfd0] ss:$56 sps:$4 sm:$0xff]  }
 0x13c   : > { %4659 = vmatpush1.bf16.msra.mxu1 %v7393_v61  ;;  %4619 = vmatprep.subr.bf16.mxu0 %v7398_v0  ;;  %v7465_v61 = vld [vmem:[%s8379_s11 + $0x1d8] ss:$56 sps:$4 sm:$0xff]   ;;  %v7470_v0 = vld [vmem:[%s8379_s11 + $0xf64] ss:$56 sps:$4 sm:$0xff]  }
 0x13d   : > { %4660 = vmatprep.subr.bf16.mxu1 %v7401_v1  ;;  %v7473_v1 = vld [vmem:[%s8379_s11 + $0x16c] ss:$56 sps:$4 sm:$0xff]  }
 0x13f   : > { %4620 = vmatpush2.bf16.msra.mxu0 %v7396_v2  ;;  %v7468_v2 = vld [vmem:[%s8379_s11 + $0xf60] ss:$56 sps:$4 sm:$0xff]  }
 0x140   : > { %4661 = vmatpush2.bf16.msra.mxu1 %v7399_v4  ;;  %4621 = vmatprep.subr.bf16.mxu0 %v7404_v5  ;;  %v7471_v4 = vld [vmem:[%s8379_s11 + $0x168] ss:$56 sps:$4 sm:$0xff]   ;;  %v7476_v5 = vld [vmem:[%s8379_s11 + $0xef4] ss:$56 sps:$4 sm:$0xff]  }
 0x141   : > { %4662 = vmatprep.subr.bf16.mxu1 %v7407_v6  ;;  %v7479_v6 = vld [vmem:[%s8379_s11 + $0xfc] ss:$56 sps:$4 sm:$0xff]  }
 0x143   : > { %4622 = vmatpush2.bf16.msra.mxu0 %v7402_v7  ;;  %v7474_v7 = vld [vmem:[%s8379_s11 + $0xef0] ss:$56 sps:$4 sm:$0xff]  }
 0x144   : > { %4663 = vmatpush2.bf16.msra.mxu1 %v7405_v8  ;;  %4623 = vmatprep.subr.bf16.mxu0 %v7410_v9  ;;  %v7477_v8 = vld [vmem:[%s8379_s11 + $0xf8] ss:$56 sps:$4 sm:$0xff]   ;;  %v7482_v9 = vld [vmem:[%s8379_s11 + $0xe84] ss:$56 sps:$4 sm:$0xff]  }
 0x145   : > { %4664 = vmatprep.subr.bf16.mxu1 %v7413_v10  ;;  %v7485_v10 = vld [vmem:[%s8379_s11 + $0x8c] ss:$56 sps:$4 sm:$0xff]  }
 0x147   : > { %4624 = vmatpush2.bf16.msra.mxu0 %v7408_v11  ;;  %v7480_v11 = vld [vmem:[%s8379_s11 + $0xe80] ss:$56 sps:$4 sm:$0xff]  }
 0x148   : > { %4665 = vmatpush2.bf16.msra.mxu1 %v7411_v12  ;;  %4625 = vmatprep.subr.bf16.mxu0 %v7416_v14  ;;  %v7483_v12 = vld [vmem:[%s8379_s11 + $0x88] ss:$56 sps:$4 sm:$0xff]   ;;  %v7488_v14 = vld [vmem:[%s8379_s11 + $0xe14] ss:$56 sps:$4 sm:$0xff]  }
 0x149   : > { %4666 = vmatprep.subr.bf16.mxu1 %v7419_v15  ;;  %v7491_v15 = vld [vmem:[%s8379_s11 + $0x1c] ss:$56 sps:$4 sm:$0xff]  }
 0x14b   : > { %4626 = vmatpush2.bf16.msra.mxu0 %v7414_v16  ;;  %v7486_v16 = vld [vmem:[%s8379_s11 + $0xe10] ss:$56 sps:$4 sm:$0xff]  }
 0x14c   : > { %4667 = vmatpush2.bf16.msra.mxu1 %v7417_v17  ;;  %4627 = vmatprep.subr.bf16.mxu0 %v7422_v19  ;;  %v7489_v17 = vld [vmem:[%s8379_s11 + $0x18] ss:$56 sps:$4 sm:$0xff]   ;;  %v7494_v19 = vld [vmem:[%s8379_s11 + $0x14a4] ss:$56 sps:$4 sm:$0xff]  }
 0x14d   : > { %4668 = vmatprep.subr.bf16.mxu1 %v7425_v20  ;;  %v7497_v20 = vld [vmem:[%s8379_s11 + $0x6ac] ss:$56 sps:$4 sm:$0xff]  }
 0x14f   : > { %4628 = vmatpush2.bf16.msra.mxu0 %v7420_v21  ;;  %v7492_v21 = vld [vmem:[%s8379_s11 + $0x14a0] ss:$56 sps:$4 sm:$0xff]  }
 0x150   : > { %4669 = vmatpush2.bf16.msra.mxu1 %v7423_v22  ;;  %4629 = vmatprep.subr.bf16.mxu0 %v7428_v24  ;;  %v7495_v22 = vld [vmem:[%s8379_s11 + $0x6a8] ss:$56 sps:$4 sm:$0xff]   ;;  %v7500_v24 = vld [vmem:[%s8379_s11 + $0x1434] ss:$56 sps:$4 sm:$0xff]  }
 0x151   : > { %4670 = vmatprep.subr.bf16.mxu1 %v7431_v25  ;;  %v7503_v25 = vld [vmem:[%s8379_s11 + $0x63c] ss:$56 sps:$4 sm:$0xff]  }
 0x153   : > { %4630 = vmatpush2.bf16.msra.mxu0 %v7426_v26  ;;  %v7498_v26 = vld [vmem:[%s8379_s11 + $0x1430] ss:$56 sps:$4 sm:$0xff]  }
 0x154   : > { %4671 = vmatpush2.bf16.msra.mxu1 %v7429_v27  ;;  %4631 = vmatprep.subr.bf16.mxu0 %v7434_v28  ;;  %v7501_v27 = vld [vmem:[%s8379_s11 + $0x638] ss:$56 sps:$4 sm:$0xff]   ;;  %v7506_v28 = vld [vmem:[%s8379_s11 + $0x13c4] ss:$56 sps:$4 sm:$0xff]  }
 0x155   : > { %4672 = vmatprep.subr.bf16.mxu1 %v7437_v29  ;;  %v7509_v29 = vld [vmem:[%s8379_s11 + $0x5cc] ss:$56 sps:$4 sm:$0xff]  }
 0x157   : > { %4632 = vmatpush2.bf16.msra.mxu0 %v7432_v30  ;;  %v7504_v30 = vld [vmem:[%s8379_s11 + $0x13c0] ss:$56 sps:$4 sm:$0xff]  }
 0x158   : > { %4673 = vmatpush2.bf16.msra.mxu1 %v7435_v31  ;;  %4633 = vmatprep.subr.bf16.mxu0 %v7440_v32  ;;  %v7507_v31 = vld [vmem:[%s8379_s11 + $0x5c8] ss:$56 sps:$4 sm:$0xff]   ;;  %v7512_v32 = vld [vmem:[%s8379_s11 + $0x1354] ss:$56 sps:$4 sm:$0xff]  }
 0x159   : > { %4674 = vmatprep.subr.bf16.mxu1 %v7443_v33  ;;  %v7515_v33 = vld [vmem:[%s8379_s11 + $0x55c] ss:$56 sps:$4 sm:$0xff]  }
 0x15b   : > { %4634 = vmatpush2.bf16.msra.mxu0 %v7438_v34  ;;  %v7510_v34 = vld [vmem:[%s8379_s11 + $0x1350] ss:$56 sps:$4 sm:$0xff]  }
 0x15c   : > { %4675 = vmatpush2.bf16.msra.mxu1 %v7441_v35  ;;  %4685 = vmatprep.subr.bf16.mxu0 %v7446_v36  ;;  %v7513_v35 = vld [vmem:[%s8379_s11 + $0x558] ss:$56 sps:$4 sm:$0xff]   ;;  %v7518_v36 = vld [vmem:[%s8379_s11 + $0x12e4] ss:$56 sps:$4 sm:$0xff]  }
 0x15d   : > { %4726 = vmatprep.subr.bf16.mxu1 %v7449_v37  ;;  %v7521_v37 = vld [vmem:[%s8379_s11 + $0x4ec] ss:$56 sps:$4 sm:$0xff]  }
 0x15e   : > { %v4391_v44 = vpop.f32.mrf.mxu0  ;;  %4636 = vmatmul.mubr.bf16.vlgmr.msra.gmra.mxu0 %v8486_v13 }
 0x15f   : > { %v4432_v45 = vpop.f32.mrf.mxu1  ;;  %4677 = vmatmul.mubr.bf16.vlgmr.msra.gmra.mxu1 %v8493_v18  ;;  %4686 = vmatpush1.bf16.msra.mxu0 %v7444_v38  ;;  %v7516_v38 = vld [vmem:[%s8379_s11 + $0x12e0] ss:$56 sps:$4 sm:$0xff]  }
 0x160   : > { %v8710_v46 = vadd.f32 %v4432_v45, %v4391_v44  ;;  %4727 = vmatpush1.bf16.msra.mxu1 %v7447_v39  ;;  %v4393_v47 = vpop.f32.mrf.mxu0  ;;  %4687 = vmatprep.subr.bf16.mxu0 %v7452_v40  ;;  %v7519_v39 = vld [vmem:[%s8379_s11 + $0x4e8] ss:$56 sps:$4 sm:$0xff]   ;;  %v7524_v40 = vld [vmem:[%s8379_s11 + $0x1274] ss:$56 sps:$4 sm:$0xff]   ;;  %v7530_v44 = vld [vmem:[%s8379_s11 + $0x1204] ss:$56 sps:$4 sm:$0xff]  }
 0x161   : > { %v4434_v48 = vpop.f32.mrf.mxu1  ;;  %4728 = vmatprep.subr.bf16.mxu1 %v7455_v41  ;;  %4717 = vmatprep.mubr.bf16.mxu0 %v8500_v23  ;;  %v7527_v41 = vld [vmem:[%s8379_s11 + $0x47c] ss:$56 sps:$4 sm:$0xff]   ;;  %v7533_v45 = vld [vmem:[%s8379_s11 + $0x40c] ss:$56 sps:$4 sm:$0xff]  }
 0x162   : > { %v8714_v51 = vadd.f32 %v4434_v48, %v4393_v47  ;;  %4758 = vmatprep.mubr.bf16.mxu1 %v8462_v62  ;;  %v4395_v54 = vpop.f32.mrf.mxu0  ;;  %v7528_v47 = vld [vmem:[%s8379_s11 + $0x1200] ss:$56 sps:$4 sm:$0xff]  }
 0x163   : > { %v4436_v55 = vpop.f32.mrf.mxu1  ;;  %4688 = vmatpush1.bf16.msra.mxu0 %v7450_v42  ;;  %v7522_v42 = vld [vmem:[%s8379_s11 + $0x1270] ss:$56 sps:$4 sm:$0xff]   ;;  %v7542_v54 = vld [vmem:[%s8379_s11 + $0xa2c] ss:$56 sps:$4 sm:$0xff]  }
 0x164   : > { %4729 = vmatpush1.bf16.msra.mxu1 %v7453_v43  ;;  %v4396_v56 = vpop.f32.mrf.mxu0  ;;  %4689 = vmatprep.subr.bf16.mxu0 %v7458_v49  ;;  %v7525_v43 = vld [vmem:[%s8379_s11 + $0x478] ss:$56 sps:$4 sm:$0xff]   ;;  %v7531_v48 = vld [vmem:[%s8379_s11 + $0x408] ss:$56 sps:$4 sm:$0xff]   ;;  %v7536_v49 = vld [vmem:[%s8379_s11 + $0x1194] ss:$56 sps:$4 sm:$0xff]  }
 0x165   : > { %4730 = vmatprep.subr.bf16.mxu1 %v7461_v50  ;;  %v4437_v59 = vpop.f32.mrf.mxu1  ;;  %v7539_v50 = vld [vmem:[%s8379_s11 + $0x39c] ss:$56 sps:$4 sm:$0xff]   ;;  %v7545_v55 = vld [vmem:[%s8379_s11 + $0x112c] ss:$56 sps:$4 sm:$0xff]   ;;  %v7540_v56 = vld [vmem:[%s8379_s11 + $0xa28] ss:$56 sps:$4 sm:$0xff]  }
 0x166   : > { %v7551_v59 = vld [vmem:[%s8379_s11 + $0x10bc] ss:$56 sps:$4 sm:$0xff]  }
 0x167   : > { %4690 = vmatpush1.bf16.msra.mxu0 %v7456_v52  ;;  %v7534_v52 = vld [vmem:[%s8379_s11 + $0x1190] ss:$56 sps:$4 sm:$0xff]  }
 0x168   : > { %4731 = vmatpush1.bf16.msra.mxu1 %v7459_v53  ;;  %4691 = vmatprep.subr.bf16.mxu0 %v7464_v57  ;;  %v7537_v53 = vld [vmem:[%s8379_s11 + $0x398] ss:$56 sps:$4 sm:$0xff]   ;;  %v7543_v57 = vld [vmem:[%s8379_s11 + $0x1128] ss:$56 sps:$4 sm:$0xff]  }
 0x169   : > { %4732 = vmatprep.subr.bf16.mxu1 %v7467_v58  ;;  %v7548_v58 = vld [vmem:[%s8379_s11 + $0x9bc] ss:$56 sps:$4 sm:$0xff]  }
 0x16b   : > { %4692 = vmatpush1.bf16.msra.mxu0 %v7462_v60  ;;  %v7546_v60 = vld [vmem:[%s8379_s11 + $0x9b8] ss:$56 sps:$4 sm:$0xff]  }
 0x16c   : > { %4733 = vmatpush1.bf16.msra.mxu1 %v7465_v61  ;;  %4693 = vmatprep.subr.bf16.mxu0 %v7470_v0  ;;  %v7549_v61 = vld [vmem:[%s8379_s11 + $0x10b8] ss:$56 sps:$4 sm:$0xff]  }
 0x16d   : > { %4734 = vmatprep.subr.bf16.mxu1 %v7473_v1 }
 0x16f   : > { %4694 = vmatpush1.bf16.msra.mxu0 %v7468_v2 }
 0x170   : > { %4735 = vmatpush1.bf16.msra.mxu1 %v7471_v4  ;;  %4695 = vmatprep.subr.bf16.mxu0 %v7476_v5  ;;  %v7554_v5 = vld [vmem:[%s8379_s11 + $0x94c] ss:$56 sps:$4 sm:$0xff]  }
 0x171   : > { %4736 = vmatprep.subr.bf16.mxu1 %v7479_v6  ;;  %v7557_v6 = vld [vmem:[%s8379_s11 + $0x104c] ss:$56 sps:$4 sm:$0xff]  }
 0x173   : > { %4696 = vmatpush1.bf16.msra.mxu0 %v7474_v7 }
 0x174   : > { %4737 = vmatpush1.bf16.msra.mxu1 %v7477_v8  ;;  %4697 = vmatprep.subr.bf16.mxu0 %v7482_v9  ;;  %v7552_v9 = vld [vmem:[%s8379_s11 + $0x948] ss:$56 sps:$4 sm:$0xff]  }
 0x175   : > { %4738 = vmatprep.subr.bf16.mxu1 %v7485_v10  ;;  %v7555_v10 = vld [vmem:[%s8379_s11 + $0x1048] ss:$56 sps:$4 sm:$0xff]  }
 0x177   : > { %4698 = vmatpush1.bf16.msra.mxu0 %v7480_v11 }
 0x178   : > { %4739 = vmatpush1.bf16.msra.mxu1 %v7483_v12  ;;  %4699 = vmatprep.subr.bf16.mxu0 %v7488_v14  ;;  %v7563_v14 = vld [vmem:[%s8379_s11 + $0xfdc] ss:$56 sps:$4 sm:$0xff]  }
 0x179   : > { %4740 = vmatprep.subr.bf16.mxu1 %v7491_v15 }
 0x17b   : > { %4700 = vmatpush1.bf16.msra.mxu0 %v7486_v16  ;;  %v7558_v16 = vld [vmem:[%s8379_s11 + $0x8d8] ss:$56 sps:$4 sm:$0xff]  }
 0x17c   : > { %4741 = vmatpush1.bf16.msra.mxu1 %v7489_v17  ;;  %4701 = vmatprep.subr.bf16.mxu0 %v7494_v19  ;;  %v7561_v17 = vld [vmem:[%s8379_s11 + $0xfd8] ss:$56 sps:$4 sm:$0xff]   ;;  %v7566_v19 = vld [vmem:[%s8379_s11 + $0x86c] ss:$56 sps:$4 sm:$0xff]  }
 0x17d   : > { %4742 = vmatprep.subr.bf16.mxu1 %v7497_v20  ;;  %v7569_v20 = vld [vmem:[%s8379_s11 + $0xf6c] ss:$56 sps:$4 sm:$0xff]  }
 0x17f   : > { %4702 = vmatpush2.bf16.msra.mxu0 %v7492_v21  ;;  %v7564_v21 = vld [vmem:[%s8379_s11 + $0x868] ss:$56 sps:$4 sm:$0xff]  }
 0x180   : > { %4743 = vmatpush2.bf16.msra.mxu1 %v7495_v22  ;;  %4703 = vmatprep.subr.bf16.mxu0 %v7500_v24  ;;  %v7567_v22 = vld [vmem:[%s8379_s11 + $0xf68] ss:$56 sps:$4 sm:$0xff]   ;;  %v7572_v24 = vld [vmem:[%s8379_s11 + $0x7fc] ss:$56 sps:$4 sm:$0xff]  }
 0x181   : > { %4744 = vmatprep.subr.bf16.mxu1 %v7503_v25  ;;  %v7575_v25 = vld [vmem:[%s8379_s11 + $0xefc] ss:$56 sps:$4 sm:$0xff]  }
 0x183   : > { %4704 = vmatpush2.bf16.msra.mxu0 %v7498_v26  ;;  %v7570_v26 = vld [vmem:[%s8379_s11 + $0x7f8] ss:$56 sps:$4 sm:$0xff]  }
 0x184   : > { %4745 = vmatpush2.bf16.msra.mxu1 %v7501_v27  ;;  %4705 = vmatprep.subr.bf16.mxu0 %v7506_v28  ;;  %v7573_v27 = vld [vmem:[%s8379_s11 + $0xef8] ss:$56 sps:$4 sm:$0xff]   ;;  %v7578_v28 = vld [vmem:[%s8379_s11 + $0x78c] ss:$56 sps:$4 sm:$0xff]  }
 0x185   : > { %4746 = vmatprep.subr.bf16.mxu1 %v7509_v29  ;;  %v7581_v29 = vld [vmem:[%s8379_s11 + $0xe8c] ss:$56 sps:$4 sm:$0xff]  }
 0x187   : > { %4706 = vmatpush2.bf16.msra.mxu0 %v7504_v30  ;;  %v7576_v30 = vld [vmem:[%s8379_s11 + $0x788] ss:$56 sps:$4 sm:$0xff]  }
 0x188   : > { %4747 = vmatpush2.bf16.msra.mxu1 %v7507_v31  ;;  %4707 = vmatprep.subr.bf16.mxu0 %v7512_v32  ;;  %v7579_v31 = vld [vmem:[%s8379_s11 + $0xe88] ss:$56 sps:$4 sm:$0xff]   ;;  %v7584_v32 = vld [vmem:[%s8379_s11 + $0x71c] ss:$56 sps:$4 sm:$0xff]  }
 0x189   : > { %4748 = vmatprep.subr.bf16.mxu1 %v7515_v33  ;;  %v7587_v33 = vld [vmem:[%s8379_s11 + $0xe1c] ss:$56 sps:$4 sm:$0xff]  }
 0x18b   : > { %4708 = vmatpush2.bf16.msra.mxu0 %v7510_v34  ;;  %v7582_v34 = vld [vmem:[%s8379_s11 + $0x718] ss:$56 sps:$4 sm:$0xff]  }
 0x18c   : > { %4749 = vmatpush2.bf16.msra.mxu1 %v7513_v35  ;;  %4709 = vmatprep.subr.bf16.mxu0 %v7518_v36  ;;  %v7585_v35 = vld [vmem:[%s8379_s11 + $0xe18] ss:$56 sps:$4 sm:$0xff]   ;;  %v7590_v36 = vld [vmem:[%s8379_s11 + $0xdac] ss:$56 sps:$4 sm:$0xff]  }
 0x18d   : > { %4750 = vmatprep.subr.bf16.mxu1 %v7521_v37  ;;  %v7593_v37 = vld [vmem:[%s8379_s11 + $0x14ac] ss:$56 sps:$4 sm:$0xff]  }
 0x18f   : > { %4710 = vmatpush2.bf16.msra.mxu0 %v7516_v38  ;;  %v7588_v38 = vld [vmem:[%s8379_s11 + $0xda8] ss:$56 sps:$4 sm:$0xff]  }
 0x190   : > { %4751 = vmatpush2.bf16.msra.mxu1 %v7519_v39  ;;  %4711 = vmatprep.subr.bf16.mxu0 %v7524_v40  ;;  %v7591_v39 = vld [vmem:[%s8379_s11 + $0x14a8] ss:$56 sps:$4 sm:$0xff]   ;;  %v7596_v40 = vld [vmem:[%s8379_s11 + $0xd3c] ss:$56 sps:$4 sm:$0xff]  }
 0x191   : > { %4752 = vmatprep.subr.bf16.mxu1 %v7527_v41  ;;  %v7599_v41 = vld [vmem:[%s8379_s11 + $0x143c] ss:$56 sps:$4 sm:$0xff]  }
 0x193   : > { %4712 = vmatpush2.bf16.msra.mxu0 %v7522_v42  ;;  %v7594_v42 = vld [vmem:[%s8379_s11 + $0xd38] ss:$56 sps:$4 sm:$0xff]  }
 0x194   : > { %4753 = vmatpush2.bf16.msra.mxu1 %v7525_v43  ;;  %4713 = vmatprep.subr.bf16.mxu0 %v7530_v44  ;;  %v7597_v43 = vld [vmem:[%s8379_s11 + $0x1438] ss:$56 sps:$4 sm:$0xff]   ;;  %v7602_v44 = vld [vmem:[%s8379_s11 + $0xccc] ss:$56 sps:$4 sm:$0xff]  }
 0x195   : > { %4754 = vmatprep.subr.bf16.mxu1 %v7533_v45  ;;  %v7605_v45 = vld [vmem:[%s8379_s11 + $0x13cc] ss:$56 sps:$4 sm:$0xff]  }
 0x197   : > { %4714 = vmatpush2.bf16.msra.mxu0 %v7528_v47  ;;  %v7600_v47 = vld [vmem:[%s8379_s11 + $0xcc8] ss:$56 sps:$4 sm:$0xff]  }
 0x198   : > { %4755 = vmatpush2.bf16.msra.mxu1 %v7531_v48  ;;  %4715 = vmatprep.subr.bf16.mxu0 %v7536_v49  ;;  %v7603_v48 = vld [vmem:[%s8379_s11 + $0x13c8] ss:$56 sps:$4 sm:$0xff]   ;;  %v7608_v49 = vld [vmem:[%s8379_s11 + $0xc5c] ss:$56 sps:$4 sm:$0xff]  }
 0x199   : > { %4756 = vmatprep.subr.bf16.mxu1 %v7539_v50  ;;  %v7611_v50 = vld [vmem:[%s8379_s11 + $0x135c] ss:$56 sps:$4 sm:$0xff]  }
 0x19b   : > { %4716 = vmatpush2.bf16.msra.mxu0 %v7534_v52  ;;  %v7606_v52 = vld [vmem:[%s8379_s11 + $0xc58] ss:$56 sps:$4 sm:$0xff]  }
 0x19c   : > { %4757 = vmatpush2.bf16.msra.mxu1 %v7537_v53  ;;  %4767 = vmatprep.subr.bf16.mxu0 %v7542_v54  ;;  %v7609_v53 = vld [vmem:[%s8379_s11 + $0x1358] ss:$56 sps:$4 sm:$0xff]   ;;  %v7614_v54 = vld [vmem:[%s8379_s11 + $0xbec] ss:$56 sps:$4 sm:$0xff]  }
 0x19d   : > { %4808 = vmatprep.subr.bf16.mxu1 %v7545_v55  ;;  %v7617_v55 = vld [vmem:[%s8379_s11 + $0x12ec] ss:$56 sps:$4 sm:$0xff]  }
 0x19e   : > { %v4473_v0 = vpop.f32.mrf.mxu0  ;;  %4718 = vmatmul.mubr.bf16.vlgmr.msra.gmra.mxu0 %v8465_v63 }
 0x19f   : > { %4759 = vmatmul.mubr.bf16.vlgmr.msra.gmra.mxu1 %v8486_v13  ;;  %v8782_v1 = vpop.f32.mrf.mxu1  ;;  %v8785_v2 = vadd.f32 %v4473_v0, %v8710_v46  ;;  %4768 = vmatpush1.bf16.msra.mxu0 %v7540_v56  ;;  %v7612_v56 = vld [vmem:[%s8379_s11 + $0xbe8] ss:$56 sps:$4 sm:$0xff]   ;;  %v7626_v0 = vld [vmem:[%s8379_s11 + $0xb0c] ss:$56 sps:$4 sm:$0xff]  }
 0x1a0   : > { %4809 = vmatpush1.bf16.msra.mxu1 %v7543_v57  ;;  %v4475_v4 = vpop.f32.mrf.mxu0  ;;  %4769 = vmatprep.subr.bf16.mxu0 %v7548_v58  ;;  %v7615_v57 = vld [vmem:[%s8379_s11 + $0x12e8] ss:$56 sps:$4 sm:$0xff]   ;;  %v7620_v58 = vld [vmem:[%s8379_s11 + $0xb7c] ss:$56 sps:$4 sm:$0xff]  }
 0x1a1   : > { %4810 = vmatprep.subr.bf16.mxu1 %v7551_v59  ;;  %v8789_v7 = vpop.f32.mrf.mxu1  ;;  %v8792_v8 = vadd.f32 %v4475_v4, %v8714_v51  ;;  %4799 = vmatprep.mubr.bf16.mxu0 %v8472_v3  ;;  %v7560_v51 = vld [vmem:[%s8379_s11 + $0x8dc] ss:$56 sps:$4 sm:$0xff]   ;;  %v7629_v4 = vld [vmem:[%s8379_s11 + $0x120c] ss:$56 sps:$4 sm:$0xff]  }
 0x1a2   : > { %4840 = vmatprep.mubr.bf16.mxu1 %v8500_v23  ;;  %v4477_v46 = vpop.f32.mrf.mxu0  ;;  %v7623_v59 = vld [vmem:[%s8379_s11 + $0x127c] ss:$56 sps:$4 sm:$0xff]  }
 0x1a3   : > { %v4518_v11 = vpop.f32.mrf.mxu1  ;;  %4770 = vmatpush1.bf16.msra.mxu0 %v7546_v60  ;;  %v7618_v60 = vld [vmem:[%s8379_s11 + $0xb78] ss:$56 sps:$4 sm:$0xff]  }
 0x1a4   : > { %4811 = vmatpush1.bf16.msra.mxu1 %v7549_v61  ;;  %v4478_v12 = vpop.f32.mrf.mxu0  ;;  %4771 = vmatprep.subr.bf16.mxu0 %v7554_v5  ;;  %v7621_v61 = vld [vmem:[%s8379_s11 + $0x1278] ss:$56 sps:$4 sm:$0xff]   ;;  %v7624_v5 = vld [vmem:[%s8379_s11 + $0xb08] ss:$56 sps:$4 sm:$0xff]  }
 0x1a5   : > { %4812 = vmatprep.subr.bf16.mxu1 %v7557_v6  ;;  %v4519_v15 = vpop.f32.mrf.mxu1  ;;  %v7627_v6 = vld [vmem:[%s8379_s11 + $0x1208] ss:$56 sps:$4 sm:$0xff]   ;;  %v7630_v46 = vld [vmem:[%s8379_s11 + $0xa98] ss:$56 sps:$4 sm:$0xff]   ;;  %v7638_v12 = vld [vmem:[%s8379_s11 + $0x334] ss:$56 sps:$4 sm:$0xff]  }
 0x1a6   : > { %v7633_v11 = vld [vmem:[%s8379_s11 + $0x1198] ss:$56 sps:$4 sm:$0xff]  }
 0x1a7   : > { %4772 = vmatpush1.bf16.msra.mxu0 %v7552_v9  ;;  %v7632_v9 = vld [vmem:[%s8379_s11 + $0xa9c] ss:$56 sps:$4 sm:$0xff]   ;;  %v7639_v15 = vld [vmem:[%s8379_s11 + $0xa30] ss:$56 sps:$4 sm:$0xff]  }
 0x1a8   : > { %4813 = vmatpush1.bf16.msra.mxu1 %v7555_v10  ;;  %4773 = vmatprep.subr.bf16.mxu0 %v7560_v51  ;;  %v7635_v10 = vld [vmem:[%s8379_s11 + $0x119c] ss:$56 sps:$4 sm:$0xff]  }
 0x1a9   : > { %4814 = vmatprep.subr.bf16.mxu1 %v7563_v14  ;;  %v7641_v51 = vld [vmem:[%s8379_s11 + $0xa34] ss:$56 sps:$4 sm:$0xff]   ;;  %v7636_v14 = vld [vmem:[%s8379_s11 + $0x330] ss:$56 sps:$4 sm:$0xff]  }
 0x1ab   : > { %4774 = vmatpush1.bf16.msra.mxu0 %v7558_v16  ;;  %v7644_v16 = vld [vmem:[%s8379_s11 + $0x2c4] ss:$56 sps:$4 sm:$0xff]  }
 0x1ac   : > { %4815 = vmatpush1.bf16.msra.mxu1 %v7561_v17  ;;  %4775 = vmatprep.subr.bf16.mxu0 %v7566_v19  ;;  %v7647_v17 = vld [vmem:[%s8379_s11 + $0x9c4] ss:$56 sps:$4 sm:$0xff]   ;;  %v7642_v19 = vld [vmem:[%s8379_s11 + $0x2c0] ss:$56 sps:$4 sm:$0xff]  }
 0x1ad   : > { %4816 = vmatprep.subr.bf16.mxu1 %v7569_v20  ;;  %v7645_v20 = vld [vmem:[%s8379_s11 + $0x9c0] ss:$56 sps:$4 sm:$0xff]  }
 0x1af   : > { %4776 = vmatpush1.bf16.msra.mxu0 %v7564_v21 }
 0x1b0   : > { %4817 = vmatpush1.bf16.msra.mxu1 %v7567_v22  ;;  %4777 = vmatprep.subr.bf16.mxu0 %v7572_v24 }
 0x1b1   : > { %4818 = vmatprep.subr.bf16.mxu1 %v7575_v25 }
 0x1b3   : > { %4778 = vmatpush1.bf16.msra.mxu0 %v7570_v26 }
 0x1b4   : > { %4819 = vmatpush1.bf16.msra.mxu1 %v7573_v27  ;;  %4779 = vmatprep.subr.bf16.mxu0 %v7578_v28  ;;  %v7650_v27 = vld [vmem:[%s8379_s11 + $0x254] ss:$56 sps:$4 sm:$0xff]  }
 0x1b5   : > { %4820 = vmatprep.subr.bf16.mxu1 %v7581_v29  ;;  %v7653_v28 = vld [vmem:[%s8379_s11 + $0x954] ss:$56 sps:$4 sm:$0xff]  }
 0x1b7   : > { %4780 = vmatpush1.bf16.msra.mxu0 %v7576_v30 }
 0x1b8   : > { %4821 = vmatpush1.bf16.msra.mxu1 %v7579_v31  ;;  %4781 = vmatprep.subr.bf16.mxu0 %v7584_v32  ;;  %v7648_v31 = vld [vmem:[%s8379_s11 + $0x250] ss:$56 sps:$4 sm:$0xff]  }
 0x1b9   : > { %4822 = vmatprep.subr.bf16.mxu1 %v7587_v33  ;;  %v7651_v32 = vld [vmem:[%s8379_s11 + $0x950] ss:$56 sps:$4 sm:$0xff]  }
 0x1bb   : > { %4782 = vmatpush1.bf16.msra.mxu0 %v7582_v34 }
 0x1bc   : > { %4823 = vmatpush1.bf16.msra.mxu1 %v7585_v35  ;;  %4783 = vmatprep.subr.bf16.mxu0 %v7590_v36  ;;  %v7659_v36 = vld [vmem:[%s8379_s11 + $0x8e4] ss:$56 sps:$4 sm:$0xff]  }
 0x1bd   : > { %4824 = vmatprep.subr.bf16.mxu1 %v7593_v37 }
 0x1bf   : > { %4784 = vmatpush2.bf16.msra.mxu0 %v7588_v38  ;;  %v7654_v38 = vld [vmem:[%s8379_s11 + $0x1e0] ss:$56 sps:$4 sm:$0xff]  }
 0x1c0   : > { %4825 = vmatpush2.bf16.msra.mxu1 %v7591_v39  ;;  %4785 = vmatprep.subr.bf16.mxu0 %v7596_v40  ;;  %v7657_v39 = vld [vmem:[%s8379_s11 + $0x8e0] ss:$56 sps:$4 sm:$0xff]   ;;  %v7662_v40 = vld [vmem:[%s8379_s11 + $0x174] ss:$56 sps:$4 sm:$0xff]  }
 0x1c1   : > { %4826 = vmatprep.subr.bf16.mxu1 %v7599_v41  ;;  %v7665_v41 = vld [vmem:[%s8379_s11 + $0x874] ss:$56 sps:$4 sm:$0xff]  }
 0x1c3   : > { %4786 = vmatpush2.bf16.msra.mxu0 %v7594_v42  ;;  %v7660_v42 = vld [vmem:[%s8379_s11 + $0x170] ss:$56 sps:$4 sm:$0xff]  }
 0x1c4   : > { %4827 = vmatpush2.bf16.msra.mxu1 %v7597_v43  ;;  %4787 = vmatprep.subr.bf16.mxu0 %v7602_v44  ;;  %v7663_v43 = vld [vmem:[%s8379_s11 + $0x870] ss:$56 sps:$4 sm:$0xff]   ;;  %v7668_v44 = vld [vmem:[%s8379_s11 + $0x104] ss:$56 sps:$4 sm:$0xff]  }
 0x1c5   : > { %4828 = vmatprep.subr.bf16.mxu1 %v7605_v45  ;;  %v7671_v45 = vld [vmem:[%s8379_s11 + $0x804] ss:$56 sps:$4 sm:$0xff]  }
 0x1c7   : > { %4788 = vmatpush2.bf16.msra.mxu0 %v7600_v47  ;;  %v7666_v47 = vld [vmem:[%s8379_s11 + $0x100] ss:$56 sps:$4 sm:$0xff]  }
 0x1c8   : > { %4829 = vmatpush2.bf16.msra.mxu1 %v7603_v48  ;;  %4789 = vmatprep.subr.bf16.mxu0 %v7608_v49  ;;  %v7669_v48 = vld [vmem:[%s8379_s11 + $0x800] ss:$56 sps:$4 sm:$0xff]   ;;  %v7674_v49 = vld [vmem:[%s8379_s11 + $0x94] ss:$56 sps:$4 sm:$0xff]  }
 0x1c9   : > { %4830 = vmatprep.subr.bf16.mxu1 %v7611_v50  ;;  %v7677_v50 = vld [vmem:[%s8379_s11 + $0x794] ss:$56 sps:$4 sm:$0xff]  }
 0x1cb   : > { %4790 = vmatpush2.bf16.msra.mxu0 %v7606_v52  ;;  %v7672_v52 = vld [vmem:[%s8379_s11 + $0x90] ss:$56 sps:$4 sm:$0xff]  }
 0x1cc   : > { %4831 = vmatpush2.bf16.msra.mxu1 %v7609_v53  ;;  %4791 = vmatprep.subr.bf16.mxu0 %v7614_v54  ;;  %v7675_v53 = vld [vmem:[%s8379_s11 + $0x790] ss:$56 sps:$4 sm:$0xff]   ;;  %v7680_v54 = vld [vmem:[%s8379_s11 + $0x24] ss:$56 sps:$4 sm:$0xff]  }
 0x1cd   : > { %4832 = vmatprep.subr.bf16.mxu1 %v7617_v55  ;;  %v7683_v55 = vld [vmem:[%s8379_s11 + $0x724] ss:$56 sps:$4 sm:$0xff]  }
 0x1cf   : > { %4792 = vmatpush2.bf16.msra.mxu0 %v7612_v56  ;;  %v7678_v56 = vld [vmem:[%s8379_s11 + $0x20] ss:$56 sps:$4 sm:$0xff]  }
 0x1d0   : > { %4833 = vmatpush2.bf16.msra.mxu1 %v7615_v57  ;;  %4793 = vmatprep.subr.bf16.mxu0 %v7620_v58  ;;  %v7681_v57 = vld [vmem:[%s8379_s11 + $0x720] ss:$56 sps:$4 sm:$0xff]   ;;  %v7686_v58 = vld [vmem:[%s8379_s11 + $0x6b4] ss:$56 sps:$4 sm:$0xff]  }
 0x1d1   : > { %4834 = vmatprep.subr.bf16.mxu1 %v7623_v59  ;;  %v7689_v59 = vld [vmem:[%s8379_s11 + $0xdb4] ss:$56 sps:$4 sm:$0xff]  }
 0x1d3   : > { %4794 = vmatpush2.bf16.msra.mxu0 %v7618_v60  ;;  %v7684_v60 = vld [vmem:[%s8379_s11 + $0x6b0] ss:$56 sps:$4 sm:$0xff]  }
 0x1d4   : > { %4835 = vmatpush2.bf16.msra.mxu1 %v7621_v61  ;;  %4795 = vmatprep.subr.bf16.mxu0 %v7626_v0  ;;  %v7687_v61 = vld [vmem:[%s8379_s11 + $0xdb0] ss:$56 sps:$4 sm:$0xff]   ;;  %v7692_v0 = vld [vmem:[%s8379_s11 + $0x644] ss:$56 sps:$4 sm:$0xff]  }
 0x1d5   : > { %4836 = vmatprep.subr.bf16.mxu1 %v7629_v4  ;;  %v7695_v4 = vld [vmem:[%s8379_s11 + $0xd44] ss:$56 sps:$4 sm:$0xff]  }
 0x1d7   : > { %4796 = vmatpush2.bf16.msra.mxu0 %v7624_v5  ;;  %v7690_v5 = vld [vmem:[%s8379_s11 + $0x640] ss:$56 sps:$4 sm:$0xff]  }
 0x1d8   : > { %4837 = vmatpush2.bf16.msra.mxu1 %v7627_v6  ;;  %4797 = vmatprep.subr.bf16.mxu0 %v7632_v9  ;;  %v7693_v6 = vld [vmem:[%s8379_s11 + $0xd40] ss:$56 sps:$4 sm:$0xff]   ;;  %v7698_v9 = vld [vmem:[%s8379_s11 + $0x5d4] ss:$56 sps:$4 sm:$0xff]  }
 0x1d9   : > { %4838 = vmatprep.subr.bf16.mxu1 %v7635_v10  ;;  %v7701_v10 = vld [vmem:[%s8379_s11 + $0xcd4] ss:$56 sps:$4 sm:$0xff]  }
 0x1db   : > { %4798 = vmatpush2.bf16.msra.mxu0 %v7630_v46  ;;  %v7696_v46 = vld [vmem:[%s8379_s11 + $0x5d0] ss:$56 sps:$4 sm:$0xff]  }
 0x1dc   : > { %4839 = vmatpush2.bf16.msra.mxu1 %v7633_v11  ;;  %4849 = vmatprep.subr.bf16.mxu0 %v7638_v12  ;;  %v7699_v11 = vld [vmem:[%s8379_s11 + $0xcd0] ss:$56 sps:$4 sm:$0xff]   ;;  %v7704_v12 = vld [vmem:[%s8379_s11 + $0x564] ss:$56 sps:$4 sm:$0xff]  }
 0x1dd   : > { %4890 = vmatprep.subr.bf16.mxu1 %v7641_v51  ;;  %v7707_v51 = vld [vmem:[%s8379_s11 + $0xc64] ss:$56 sps:$4 sm:$0xff]  }
 0x1de   : > { %v4555_v21 = vpop.f32.mrf.mxu0  ;;  %4800 = vmatmul.mubr.bf16.vlgmr.msra.gmra.mxu0 %v8493_v18 }
 0x1df   : > { %4841 = vmatmul.mubr.bf16.vlgmr.msra.gmra.mxu1 %v8465_v63  ;;  %v4596_v22 = vpop.f32.mrf.mxu1  ;;  %v4556_v24 = vadd.f32 %v4555_v21, %v8782_v1  ;;  %4850 = vmatpush1.bf16.msra.mxu0 %v7636_v14  ;;  %v7702_v14 = vld [vmem:[%s8379_s11 + $0x560] ss:$56 sps:$4 sm:$0xff]   ;;  %v7716_v21 = vld [vmem:[%s8379_s11 + $0x484] ss:$56 sps:$4 sm:$0xff]  }
 0x1e0   : > { %4891 = vmatpush1.bf16.msra.mxu1 %v7639_v15  ;;  %v4557_v25 = vpop.f32.mrf.mxu0  ;;  %4851 = vmatprep.subr.bf16.mxu0 %v7644_v16  ;;  %v7705_v15 = vld [vmem:[%s8379_s11 + $0xc60] ss:$56 sps:$4 sm:$0xff]   ;;  %v7710_v16 = vld [vmem:[%s8379_s11 + $0x4f4] ss:$56 sps:$4 sm:$0xff]  }
 0x1e1   : > { %v4598_v26 = vpop.f32.mrf.mxu1  ;;  %4892 = vmatprep.subr.bf16.mxu1 %v7647_v17  ;;  %v4558_v29 = vadd.f32 %v4557_v25, %v8789_v7  ;;  %v8864_v30 = vadd.f32 %v4596_v22, %v4556_v24  ;;  %4881 = vmatprep.mubr.bf16.mxu0 %v8462_v62  ;;  %v7656_v7 = vld [vmem:[%s8379_s11 + $0x1e4] ss:$56 sps:$4 sm:$0xff]   ;;  %v7713_v17 = vld [vmem:[%s8379_s11 + $0xbf4] ss:$56 sps:$4 sm:$0xff]   ;;  %v7714_v24 = vld [vmem:[%s8379_s11 + $0x480] ss:$56 sps:$4 sm:$0xff]  }
 0x1e2   : > { %4922 = vmatprep.mubr.bf16.mxu1 %v8472_v3  ;;  %v4559_v1 = vpop.f32.mrf.mxu0  ;;  %v7719_v22 = vld [vmem:[%s8379_s11 + $0xb84] ss:$56 sps:$4 sm:$0xff]   ;;  %v7717_v25 = vld [vmem:[%s8379_s11 + $0xb80] ss:$56 sps:$4 sm:$0xff]  }
 0x1e3   : > { %v4600_v33 = vpop.f32.mrf.mxu1  ;;  %v8870_v34 = vadd.f32 %v4598_v26, %v4558_v29  ;;  %4852 = vmatpush1.bf16.msra.mxu0 %v7642_v19  ;;  %v7708_v19 = vld [vmem:[%s8379_s11 + $0x4f0] ss:$56 sps:$4 sm:$0xff]   ;;  %v7722_v26 = vld [vmem:[%s8379_s11 + $0x414] ss:$56 sps:$4 sm:$0xff]   ;;  %v7726_v1 = vld [vmem:[%s8379_s11 + $0x3a0] ss:$56 sps:$4 sm:$0xff]  }
 0x1e4   : > { %4893 = vmatpush1.bf16.msra.mxu1 %v7645_v20  ;;  %v4560_v35 = vpop.f32.mrf.mxu0  ;;  %4853 = vmatprep.subr.bf16.mxu0 %v7650_v27  ;;  %v7711_v20 = vld [vmem:[%s8379_s11 + $0xbf0] ss:$56 sps:$4 sm:$0xff]   ;;  %v7725_v27 = vld [vmem:[%s8379_s11 + $0xb14] ss:$56 sps:$4 sm:$0xff]   ;;  %v7729_v33 = vld [vmem:[%s8379_s11 + $0xaa0] ss:$56 sps:$4 sm:$0xff]  }
 0x1e5   : > { %4894 = vmatprep.subr.bf16.mxu1 %v7653_v28  ;;  %v4601_v37 = vpop.f32.mrf.mxu1  ;;  %v7720_v28 = vld [vmem:[%s8379_s11 + $0x410] ss:$56 sps:$4 sm:$0xff]   ;;  %v7734_v35 = vld [vmem:[%s8379_s11 + $0x1134] ss:$56 sps:$4 sm:$0xff]  }
 0x1e6   : > { %v7723_v29 = vld [vmem:[%s8379_s11 + $0xb10] ss:$56 sps:$4 sm:$0xff]  }
 0x1e7   : > { %4854 = vmatpush1.bf16.msra.mxu0 %v7648_v31  ;;  %v7728_v31 = vld [vmem:[%s8379_s11 + $0x3a4] ss:$56 sps:$4 sm:$0xff]   ;;  %v7735_v37 = vld [vmem:[%s8379_s11 + $0x338] ss:$56 sps:$4 sm:$0xff]  }
 0x1e8   : > { %4895 = vmatpush1.bf16.msra.mxu1 %v7651_v32  ;;  %4855 = vmatprep.subr.bf16.mxu0 %v7656_v7  ;;  %v7731_v32 = vld [vmem:[%s8379_s11 + $0xaa4] ss:$56 sps:$4 sm:$0xff]  }
 0x1e9   : > { %4896 = vmatprep.subr.bf16.mxu1 %v7659_v36  ;;  %v7737_v7 = vld [vmem:[%s8379_s11 + $0x33c] ss:$56 sps:$4 sm:$0xff]   ;;  %v7732_v36 = vld [vmem:[%s8379_s11 + $0x1130] ss:$56 sps:$4 sm:$0xff]  }
 0x1eb   : > { %4856 = vmatpush1.bf16.msra.mxu0 %v7654_v38  ;;  %v7740_v38 = vld [vmem:[%s8379_s11 + $0x10c4] ss:$56 sps:$4 sm:$0xff]  }
 0x1ec   : > { %4897 = vmatpush1.bf16.msra.mxu1 %v7657_v39  ;;  %4857 = vmatprep.subr.bf16.mxu0 %v7662_v40  ;;  %v7743_v39 = vld [vmem:[%s8379_s11 + $0x2cc] ss:$56 sps:$4 sm:$0xff]  }
 0x1ed   : > { %4898 = vmatprep.subr.bf16.mxu1 %v7665_v41 }
 0x1ef   : > { %4858 = vmatpush1.bf16.msra.mxu0 %v7660_v42 }
 0x1f0   : > { %4899 = vmatpush1.bf16.msra.mxu1 %v7663_v43  ;;  %4859 = vmatprep.subr.bf16.mxu0 %v7668_v44  ;;  %v7738_v43 = vld [vmem:[%s8379_s11 + $0x10c0] ss:$56 sps:$4 sm:$0xff]  }
 0x1f1   : > { %4900 = vmatprep.subr.bf16.mxu1 %v7671_v45  ;;  %v7741_v44 = vld [vmem:[%s8379_s11 + $0x2c8] ss:$56 sps:$4 sm:$0xff]  }
 0x1f3   : > { %4860 = vmatpush1.bf16.msra.mxu0 %v7666_v47 }
 0x1f4   : > { %4901 = vmatpush1.bf16.msra.mxu1 %v7669_v48  ;;  %4861 = vmatprep.subr.bf16.mxu0 %v7674_v49  ;;  %v7746_v48 = vld [vmem:[%s8379_s11 + $0x1054] ss:$56 sps:$4 sm:$0xff]  }
 0x1f5   : > { %4902 = vmatprep.subr.bf16.mxu1 %v7677_v50  ;;  %v7749_v49 = vld [vmem:[%s8379_s11 + $0x25c] ss:$56 sps:$4 sm:$0xff]  }
 0x1f7   : > { %4862 = vmatpush1.bf16.msra.mxu0 %v7672_v52 }
 0x1f8   : > { %4903 = vmatpush1.bf16.msra.mxu1 %v7675_v53  ;;  %4863 = vmatprep.subr.bf16.mxu0 %v7680_v54  ;;  %v7744_v54 = vld [vmem:[%s8379_s11 + $0x1050] ss:$56 sps:$4 sm:$0xff]  }
 0x1f9   : > { %4904 = vmatprep.subr.bf16.mxu1 %v7683_v55  ;;  %v7747_v55 = vld [vmem:[%s8379_s11 + $0x258] ss:$56 sps:$4 sm:$0xff]  }
 0x1fb   : > { %4864 = vmatpush1.bf16.msra.mxu0 %v7678_v56 }
 0x1fc   : > { %4905 = vmatpush1.bf16.msra.mxu1 %v7681_v57  ;;  %4865 = vmatprep.subr.bf16.mxu0 %v7686_v58  ;;  %v7752_v57 = vld [vmem:[%s8379_s11 + $0xfe4] ss:$56 sps:$4 sm:$0xff]  }
 0x1fd   : > { %4906 = vmatprep.subr.bf16.mxu1 %v7689_v59  ;;  %v7755_v58 = vld [vmem:[%s8379_s11 + $0x1ec] ss:$56 sps:$4 sm:$0xff]  }
 0x1ff   : > { %4866 = vmatpush2.bf16.msra.mxu0 %v7684_v60  ;;  %v7750_v60 = vld [vmem:[%s8379_s11 + $0xfe0] ss:$56 sps:$4 sm:$0xff]  }
 0x200   : > { %4907 = vmatpush2.bf16.msra.mxu1 %v7687_v61  ;;  %4867 = vmatprep.subr.bf16.mxu0 %v7692_v0  ;;  %v7753_v61 = vld [vmem:[%s8379_s11 + $0x1e8] ss:$56 sps:$4 sm:$0xff]   ;;  %v7758_v0 = vld [vmem:[%s8379_s11 + $0xf74] ss:$56 sps:$4 sm:$0xff]  }
 0x201   : > { %4908 = vmatprep.subr.bf16.mxu1 %v7695_v4  ;;  %v7761_v4 = vld [vmem:[%s8379_s11 + $0x17c] ss:$56 sps:$4 sm:$0xff]  }
 0x203   : > { %4868 = vmatpush2.bf16.msra.mxu0 %v7690_v5  ;;  %v7756_v5 = vld [vmem:[%s8379_s11 + $0xf70] ss:$56 sps:$4 sm:$0xff]  }
 0x204   : > { %4909 = vmatpush2.bf16.msra.mxu1 %v7693_v6  ;;  %4869 = vmatprep.subr.bf16.mxu0 %v7698_v9  ;;  %v7759_v6 = vld [vmem:[%s8379_s11 + $0x178] ss:$56 sps:$4 sm:$0xff]   ;;  %v7764_v9 = vld [vmem:[%s8379_s11 + $0xf04] ss:$56 sps:$4 sm:$0xff]  }
 0x205   : > { %4910 = vmatprep.subr.bf16.mxu1 %v7701_v10  ;;  %v7767_v10 = vld [vmem:[%s8379_s11 + $0x10c] ss:$56 sps:$4 sm:$0xff]  }
 0x207   : > { %4870 = vmatpush2.bf16.msra.mxu0 %v7696_v46  ;;  %v7762_v46 = vld [vmem:[%s8379_s11 + $0xf00] ss:$56 sps:$4 sm:$0xff]  }
 0x208   : > { %4911 = vmatpush2.bf16.msra.mxu1 %v7699_v11  ;;  %4871 = vmatprep.subr.bf16.mxu0 %v7704_v12  ;;  %v7765_v11 = vld [vmem:[%s8379_s11 + $0x108] ss:$56 sps:$4 sm:$0xff]   ;;  %v7770_v12 = vld [vmem:[%s8379_s11 + $0xe94] ss:$56 sps:$4 sm:$0xff]  }
 0x209   : > { %4912 = vmatprep.subr.bf16.mxu1 %v7707_v51  ;;  %v7773_v51 = vld [vmem:[%s8379_s11 + $0x9c] ss:$56 sps:$4 sm:$0xff]  }
 0x20b   : > { %4872 = vmatpush2.bf16.msra.mxu0 %v7702_v14  ;;  %v7768_v14 = vld [vmem:[%s8379_s11 + $0xe90] ss:$56 sps:$4 sm:$0xff]  }
 0x20c   : > { %4913 = vmatpush2.bf16.msra.mxu1 %v7705_v15  ;;  %4873 = vmatprep.subr.bf16.mxu0 %v7710_v16  ;;  %v7771_v15 = vld [vmem:[%s8379_s11 + $0x98] ss:$56 sps:$4 sm:$0xff]   ;;  %v7776_v16 = vld [vmem:[%s8379_s11 + $0xe24] ss:$56 sps:$4 sm:$0xff]  }
 0x20d   : > { %4914 = vmatprep.subr.bf16.mxu1 %v7713_v17  ;;  %v7779_v17 = vld [vmem:[%s8379_s11 + $0x2c] ss:$56 sps:$4 sm:$0xff]  }
 0x20f   : > { %4874 = vmatpush2.bf16.msra.mxu0 %v7708_v19  ;;  %v7774_v19 = vld [vmem:[%s8379_s11 + $0xe20] ss:$56 sps:$4 sm:$0xff]  }
 0x210   : > { %4915 = vmatpush2.bf16.msra.mxu1 %v7711_v20  ;;  %4875 = vmatprep.subr.bf16.mxu0 %v7716_v21  ;;  %v7777_v20 = vld [vmem:[%s8379_s11 + $0x28] ss:$56 sps:$4 sm:$0xff]   ;;  %v7782_v21 = vld [vmem:[%s8379_s11 + $0x14b4] ss:$56 sps:$4 sm:$0xff]  }
 0x211   : > { %4916 = vmatprep.subr.bf16.mxu1 %v7719_v22  ;;  %v7785_v22 = vld [vmem:[%s8379_s11 + $0x6bc] ss:$56 sps:$4 sm:$0xff]  }
 0x213   : > { %4876 = vmatpush2.bf16.msra.mxu0 %v7714_v24  ;;  %v7780_v24 = vld [vmem:[%s8379_s11 + $0x14b0] ss:$56 sps:$4 sm:$0xff]  }
 0x214   : > { %4917 = vmatpush2.bf16.msra.mxu1 %v7717_v25  ;;  %4877 = vmatprep.subr.bf16.mxu0 %v7722_v26  ;;  %v7783_v25 = vld [vmem:[%s8379_s11 + $0x6b8] ss:$56 sps:$4 sm:$0xff]   ;;  %v7788_v26 = vld [vmem:[%s8379_s11 + $0x1444] ss:$56 sps:$4 sm:$0xff]  }
 0x215   : > { %4918 = vmatprep.subr.bf16.mxu1 %v7725_v27  ;;  %v7791_v27 = vld [vmem:[%s8379_s11 + $0x64c] ss:$56 sps:$4 sm:$0xff]  }
 0x217   : > { %4878 = vmatpush2.bf16.msra.mxu0 %v7720_v28  ;;  %v7786_v28 = vld [vmem:[%s8379_s11 + $0x1440] ss:$56 sps:$4 sm:$0xff]  }
 0x218   : > { %4919 = vmatpush2.bf16.msra.mxu1 %v7723_v29  ;;  %4879 = vmatprep.subr.bf16.mxu0 %v7728_v31  ;;  %v7789_v29 = vld [vmem:[%s8379_s11 + $0x648] ss:$56 sps:$4 sm:$0xff]   ;;  %v7794_v31 = vld [vmem:[%s8379_s11 + $0x13d4] ss:$56 sps:$4 sm:$0xff]  }
 0x219   : > { %4920 = vmatprep.subr.bf16.mxu1 %v7731_v32  ;;  %v7797_v32 = vld [vmem:[%s8379_s11 + $0x5dc] ss:$56 sps:$4 sm:$0xff]  }
 0x21b   : > { %4880 = vmatpush2.bf16.msra.mxu0 %v7726_v1  ;;  %v7792_v1 = vld [vmem:[%s8379_s11 + $0x13d0] ss:$56 sps:$4 sm:$0xff]  }
 0x21c   : > { %4921 = vmatpush2.bf16.msra.mxu1 %v7729_v33  ;;  %4931 = vmatprep.subr.bf16.mxu0 %v7734_v35  ;;  %v7795_v33 = vld [vmem:[%s8379_s11 + $0x5d8] ss:$56 sps:$4 sm:$0xff]   ;;  %v7800_v35 = vld [vmem:[%s8379_s11 + $0x1364] ss:$56 sps:$4 sm:$0xff]  }
 0x21d   : > { %4972 = vmatprep.subr.bf16.mxu1 %v7737_v7  ;;  %v7803_v7 = vld [vmem:[%s8379_s11 + $0x56c] ss:$56 sps:$4 sm:$0xff]  }
 0x21e   : > { %v4637_v40 = vpop.f32.mrf.mxu0  ;;  %4882 = vmatmul.mubr.bf16.vlgmr.msra.gmra.mxu0 %v8486_v13 }
 0x21f   : > { %v4678_v41 = vpop.f32.mrf.mxu1  ;;  %4923 = vmatmul.mubr.bf16.vlgmr.msra.gmra.mxu1 %v8493_v18  ;;  %4932 = vmatpush1.bf16.msra.mxu0 %v7732_v36  ;;  %v7798_v36 = vld [vmem:[%s8379_s11 + $0x1360] ss:$56 sps:$4 sm:$0xff]  }
 0x220   : > { %v8932_v42 = vadd.f32 %v4678_v41, %v4637_v40  ;;  %4973 = vmatpush1.bf16.msra.mxu1 %v7735_v37  ;;  %v4639_v45 = vpop.f32.mrf.mxu0  ;;  %4933 = vmatprep.subr.bf16.mxu0 %v7740_v38  ;;  %v7801_v37 = vld [vmem:[%s8379_s11 + $0x568] ss:$56 sps:$4 sm:$0xff]   ;;  %v7806_v38 = vld [vmem:[%s8379_s11 + $0x12f4] ss:$56 sps:$4 sm:$0xff]   ;;  %v7807_v41 = vld [vmem:[%s8379_s11 + $0x4f8] ss:$56 sps:$4 sm:$0xff]  }
 0x221   : > { %v4680_v47 = vpop.f32.mrf.mxu1  ;;  %4974 = vmatprep.subr.bf16.mxu1 %v7743_v39  ;;  %4963 = vmatprep.mubr.bf16.mxu0 %v8500_v23  ;;  %v7809_v39 = vld [vmem:[%s8379_s11 + $0x4fc] ss:$56 sps:$4 sm:$0xff]   ;;  %v7804_v40 = vld [vmem:[%s8379_s11 + $0x12f0] ss:$56 sps:$4 sm:$0xff]  }
 0x222   : > { %v8938_v50 = vadd.f32 %v4680_v47, %v4639_v45  ;;  %5004 = vmatprep.mubr.bf16.mxu1 %v8462_v62  ;;  %v4641_v52 = vpop.f32.mrf.mxu0  ;;  %v7810_v45 = vld [vmem:[%s8379_s11 + $0x1280] ss:$56 sps:$4 sm:$0xff]  }
 0x223   : > { %v4682_v53 = vpop.f32.mrf.mxu1  ;;  %4934 = vmatpush1.bf16.msra.mxu0 %v7738_v43  ;;  %v7812_v43 = vld [vmem:[%s8379_s11 + $0x1284] ss:$56 sps:$4 sm:$0xff]   ;;  %v7813_v47 = vld [vmem:[%s8379_s11 + $0x488] ss:$56 sps:$4 sm:$0xff]  }
 0x224   : > { %4975 = vmatpush1.bf16.msra.mxu1 %v7741_v44  ;;  %v4642_v56 = vpop.f32.mrf.mxu0  ;;  %4935 = vmatprep.subr.bf16.mxu0 %v7746_v48  ;;  %v7815_v44 = vld [vmem:[%s8379_s11 + $0x48c] ss:$56 sps:$4 sm:$0xff]   ;;  %v7816_v52 = vld [vmem:[%s8379_s11 + $0x1210] ss:$56 sps:$4 sm:$0xff]  }
 0x225   : > { %4976 = vmatprep.subr.bf16.mxu1 %v7749_v49  ;;  %v4683_v59 = vpop.f32.mrf.mxu1  ;;  %v7818_v48 = vld [vmem:[%s8379_s11 + $0x1214] ss:$56 sps:$4 sm:$0xff]   ;;  %v7819_v53 = vld [vmem:[%s8379_s11 + $0x418] ss:$56 sps:$4 sm:$0xff]  }
 0x226   : > { %v7821_v49 = vld [vmem:[%s8379_s11 + $0x41c] ss:$56 sps:$4 sm:$0xff]   ;;  %v7822_v56 = vld [vmem:[%s8379_s11 + $0x11a0] ss:$56 sps:$4 sm:$0xff]  }
 0x227   : > { %4936 = vmatpush1.bf16.msra.mxu0 %v7744_v54  ;;  %v7824_v54 = vld [vmem:[%s8379_s11 + $0x11a4] ss:$56 sps:$4 sm:$0xff]  }
 0x228   : > { %4977 = vmatpush1.bf16.msra.mxu1 %v7747_v55  ;;  %4937 = vmatprep.subr.bf16.mxu0 %v7752_v57  ;;  %v7827_v55 = vld [vmem:[%s8379_s11 + $0x3ac] ss:$56 sps:$4 sm:$0xff]   ;;  %v7825_v57 = vld [vmem:[%s8379_s11 + $0x3a8] ss:$56 sps:$4 sm:$0xff]   ;;  %v7833_v59 = vld [vmem:[%s8379_s11 + $0x113c] ss:$56 sps:$4 sm:$0xff]  }
 0x229   : > { %4978 = vmatprep.subr.bf16.mxu1 %v7755_v58  ;;  %v7830_v58 = vld [vmem:[%s8379_s11 + $0xa3c] ss:$56 sps:$4 sm:$0xff]  }
 0x22b   : > { %4938 = vmatpush1.bf16.msra.mxu0 %v7750_v60  ;;  %v7828_v60 = vld [vmem:[%s8379_s11 + $0xa38] ss:$56 sps:$4 sm:$0xff]  }
 0x22c   : > { %4979 = vmatpush1.bf16.msra.mxu1 %v7753_v61  ;;  %4939 = vmatprep.subr.bf16.mxu0 %v7758_v0  ;;  %v7831_v61 = vld [vmem:[%s8379_s11 + $0x1138] ss:$56 sps:$4 sm:$0xff]   ;;  %v7836_v0 = vld [vmem:[%s8379_s11 + $0x9cc] ss:$56 sps:$4 sm:$0xff]  }
 0x22d   : > { %4980 = vmatprep.subr.bf16.mxu1 %v7761_v4  ;;  %v7839_v4 = vld [vmem:[%s8379_s11 + $0x10cc] ss:$56 sps:$4 sm:$0xff]  }
 0x22f   : > { %4940 = vmatpush1.bf16.msra.mxu0 %v7756_v5 }
 0x230   : > { %4981 = vmatpush1.bf16.msra.mxu1 %v7759_v6  ;;  %4941 = vmatprep.subr.bf16.mxu0 %v7764_v9 }
 0x231   : > { %4982 = vmatprep.subr.bf16.mxu1 %v7767_v10  ;;  %v7834_v10 = vld [vmem:[%s8379_s11 + $0x9c8] ss:$56 sps:$4 sm:$0xff]  }
 0x233   : > { %4942 = vmatpush1.bf16.msra.mxu0 %v7762_v46  ;;  %v7837_v46 = vld [vmem:[%s8379_s11 + $0x10c8] ss:$56 sps:$4 sm:$0xff]  }
 0x234   : > { %4983 = vmatpush1.bf16.msra.mxu1 %v7765_v11  ;;  %4943 = vmatprep.subr.bf16.mxu0 %v7770_v12  ;;  %v7842_v12 = vld [vmem:[%s8379_s11 + $0x95c] ss:$56 sps:$4 sm:$0xff]  }
 0x235   : > { %4984 = vmatprep.subr.bf16.mxu1 %v7773_v51  ;;  %v7845_v51 = vld [vmem:[%s8379_s11 + $0x105c] ss:$56 sps:$4 sm:$0xff]  }
 0x237   : > { %4944 = vmatpush1.bf16.msra.mxu0 %v7768_v14 }
 0x238   : > { %4985 = vmatpush1.bf16.msra.mxu1 %v7771_v15  ;;  %4945 = vmatprep.subr.bf16.mxu0 %v7776_v16 }
 0x239   : > { %4986 = vmatprep.subr.bf16.mxu1 %v7779_v17  ;;  %v7840_v17 = vld [vmem:[%s8379_s11 + $0x958] ss:$56 sps:$4 sm:$0xff]  }
 0x23b   : > { %4946 = vmatpush1.bf16.msra.mxu0 %v7774_v19  ;;  %v7843_v19 = vld [vmem:[%s8379_s11 + $0x1058] ss:$56 sps:$4 sm:$0xff]  }
 0x23c   : > { %4987 = vmatpush1.bf16.msra.mxu1 %v7777_v20  ;;  %4947 = vmatprep.subr.bf16.mxu0 %v7782_v21  ;;  %v7851_v21 = vld [vmem:[%s8379_s11 + $0xfec] ss:$56 sps:$4 sm:$0xff]  }
 0x23d   : > { %4988 = vmatprep.subr.bf16.mxu1 %v7785_v22 }
 0x23f   : > { %4948 = vmatpush2.bf16.msra.mxu0 %v7780_v24  ;;  %v7846_v24 = vld [vmem:[%s8379_s11 + $0x8e8] ss:$56 sps:$4 sm:$0xff]  }
 0x240   : > { %4989 = vmatpush2.bf16.msra.mxu1 %v7783_v25  ;;  %4949 = vmatprep.subr.bf16.mxu0 %v7788_v26  ;;  %v7849_v25 = vld [vmem:[%s8379_s11 + $0xfe8] ss:$56 sps:$4 sm:$0xff]   ;;  %v7854_v26 = vld [vmem:[%s8379_s11 + $0x87c] ss:$56 sps:$4 sm:$0xff]  }
 0x241   : > { %4990 = vmatprep.subr.bf16.mxu1 %v7791_v27  ;;  %v7857_v27 = vld [vmem:[%s8379_s11 + $0xf7c] ss:$56 sps:$4 sm:$0xff]  }
 0x243   : > { %4950 = vmatpush2.bf16.msra.mxu0 %v7786_v28  ;;  %v7852_v28 = vld [vmem:[%s8379_s11 + $0x878] ss:$56 sps:$4 sm:$0xff]  }
 0x244   : > { %4991 = vmatpush2.bf16.msra.mxu1 %v7789_v29  ;;  %4951 = vmatprep.subr.bf16.mxu0 %v7794_v31  ;;  %v7855_v29 = vld [vmem:[%s8379_s11 + $0xf78] ss:$56 sps:$4 sm:$0xff]   ;;  %v7860_v31 = vld [vmem:[%s8379_s11 + $0x80c] ss:$56 sps:$4 sm:$0xff]  }
 0x245   : > { %4992 = vmatprep.subr.bf16.mxu1 %v7797_v32  ;;  %v7863_v32 = vld [vmem:[%s8379_s11 + $0xf0c] ss:$56 sps:$4 sm:$0xff]  }
 0x247   : > { %4952 = vmatpush2.bf16.msra.mxu0 %v7792_v1  ;;  %v7858_v1 = vld [vmem:[%s8379_s11 + $0x808] ss:$56 sps:$4 sm:$0xff]  }
 0x248   : > { %4993 = vmatpush2.bf16.msra.mxu1 %v7795_v33  ;;  %4953 = vmatprep.subr.bf16.mxu0 %v7800_v35  ;;  %v7861_v33 = vld [vmem:[%s8379_s11 + $0xf08] ss:$56 sps:$4 sm:$0xff]   ;;  %v7866_v35 = vld [vmem:[%s8379_s11 + $0x79c] ss:$56 sps:$4 sm:$0xff]  }
 0x249   : > { %4994 = vmatprep.subr.bf16.mxu1 %v7803_v7  ;;  %v7869_v7 = vld [vmem:[%s8379_s11 + $0xe9c] ss:$56 sps:$4 sm:$0xff]  }
 0x24b   : > { %4954 = vmatpush2.bf16.msra.mxu0 %v7798_v36  ;;  %v7864_v36 = vld [vmem:[%s8379_s11 + $0x798] ss:$56 sps:$4 sm:$0xff]  }
 0x24c   : > { %4995 = vmatpush2.bf16.msra.mxu1 %v7801_v37  ;;  %4955 = vmatprep.subr.bf16.mxu0 %v7806_v38  ;;  %v7867_v37 = vld [vmem:[%s8379_s11 + $0xe98] ss:$56 sps:$4 sm:$0xff]   ;;  %v7872_v38 = vld [vmem:[%s8379_s11 + $0x72c] ss:$56 sps:$4 sm:$0xff]  }
 0x24d   : > { %4996 = vmatprep.subr.bf16.mxu1 %v7809_v39  ;;  %v7875_v39 = vld [vmem:[%s8379_s11 + $0xe2c] ss:$56 sps:$4 sm:$0xff]  }
 0x24f   : > { %4956 = vmatpush2.bf16.msra.mxu0 %v7804_v40  ;;  %v7870_v40 = vld [vmem:[%s8379_s11 + $0x728] ss:$56 sps:$4 sm:$0xff]  }
 0x250   : > { %4997 = vmatpush2.bf16.msra.mxu1 %v7807_v41  ;;  %4957 = vmatprep.subr.bf16.mxu0 %v7812_v43  ;;  %v7873_v41 = vld [vmem:[%s8379_s11 + $0xe28] ss:$56 sps:$4 sm:$0xff]   ;;  %v7878_v43 = vld [vmem:[%s8379_s11 + $0xdbc] ss:$56 sps:$4 sm:$0xff]  }
 0x251   : > { %4998 = vmatprep.subr.bf16.mxu1 %v7815_v44  ;;  %v7881_v44 = vld [vmem:[%s8379_s11 + $0x14bc] ss:$56 sps:$4 sm:$0xff]  }
 0x253   : > { %4958 = vmatpush2.bf16.msra.mxu0 %v7810_v45  ;;  %v7876_v45 = vld [vmem:[%s8379_s11 + $0xdb8] ss:$56 sps:$4 sm:$0xff]  }
 0x254   : > { %4999 = vmatpush2.bf16.msra.mxu1 %v7813_v47  ;;  %4959 = vmatprep.subr.bf16.mxu0 %v7818_v48  ;;  %v7879_v47 = vld [vmem:[%s8379_s11 + $0x14b8] ss:$56 sps:$4 sm:$0xff]   ;;  %v7884_v48 = vld [vmem:[%s8379_s11 + $0xd4c] ss:$56 sps:$4 sm:$0xff]  }
 0x255   : > { %5000 = vmatprep.subr.bf16.mxu1 %v7821_v49  ;;  %v7887_v49 = vld [vmem:[%s8379_s11 + $0x144c] ss:$56 sps:$4 sm:$0xff]  }
 0x257   : > { %4960 = vmatpush2.bf16.msra.mxu0 %v7816_v52  ;;  %v7882_v52 = vld [vmem:[%s8379_s11 + $0xd48] ss:$56 sps:$4 sm:$0xff]  }
 0x258   : > { %5001 = vmatpush2.bf16.msra.mxu1 %v7819_v53  ;;  %4961 = vmatprep.subr.bf16.mxu0 %v7824_v54  ;;  %v7885_v53 = vld [vmem:[%s8379_s11 + $0x1448] ss:$56 sps:$4 sm:$0xff]   ;;  %v7890_v54 = vld [vmem:[%s8379_s11 + $0xcdc] ss:$56 sps:$4 sm:$0xff]  }
 0x259   : > { %5002 = vmatprep.subr.bf16.mxu1 %v7827_v55  ;;  %v7893_v55 = vld [vmem:[%s8379_s11 + $0x13dc] ss:$56 sps:$4 sm:$0xff]  }
 0x25b   : > { %4962 = vmatpush2.bf16.msra.mxu0 %v7822_v56  ;;  %v7888_v56 = vld [vmem:[%s8379_s11 + $0xcd8] ss:$56 sps:$4 sm:$0xff]  }
 0x25c   : > { %5003 = vmatpush2.bf16.msra.mxu1 %v7825_v57  ;;  %5013 = vmatprep.subr.bf16.mxu0 %v7830_v58  ;;  %v7891_v57 = vld [vmem:[%s8379_s11 + $0x13d8] ss:$56 sps:$4 sm:$0xff]   ;;  %v7896_v58 = vld [vmem:[%s8379_s11 + $0xc6c] ss:$56 sps:$4 sm:$0xff]  }
 0x25d   : > { %5054 = vmatprep.subr.bf16.mxu1 %v7833_v59  ;;  %v7899_v59 = vld [vmem:[%s8379_s11 + $0x136c] ss:$56 sps:$4 sm:$0xff]  }
 0x25e   : > { %v4719_v5 = vpop.f32.mrf.mxu0  ;;  %4964 = vmatmul.mubr.bf16.vlgmr.msra.gmra.mxu0 %v8465_v63 }
 0x25f   : > { %5005 = vmatmul.mubr.bf16.vlgmr.msra.gmra.mxu1 %v8486_v13  ;;  %v9004_v6 = vpop.f32.mrf.mxu1  ;;  %v9007_v9 = vadd.f32 %v4719_v5, %v8932_v42  ;;  %5014 = vmatpush1.bf16.msra.mxu0 %v7828_v60  ;;  %v7894_v60 = vld [vmem:[%s8379_s11 + $0xc68] ss:$56 sps:$4 sm:$0xff]   ;;  %v7900_v5 = vld [vmem:[%s8379_s11 + $0xbf8] ss:$56 sps:$4 sm:$0xff]  }
 0x260   : > { %5055 = vmatpush1.bf16.msra.mxu1 %v7831_v61  ;;  %v4721_v11 = vpop.f32.mrf.mxu0  ;;  %5015 = vmatprep.subr.bf16.mxu0 %v7836_v0  ;;  %v7897_v61 = vld [vmem:[%s8379_s11 + $0x1368] ss:$56 sps:$4 sm:$0xff]   ;;  %v7902_v0 = vld [vmem:[%s8379_s11 + $0xbfc] ss:$56 sps:$4 sm:$0xff]  }
 0x261   : > { %5056 = vmatprep.subr.bf16.mxu1 %v7839_v4  ;;  %v9013_v14 = vpop.f32.mrf.mxu1  ;;  %v9016_v15 = vadd.f32 %v4721_v11, %v8938_v50  ;;  %5045 = vmatprep.mubr.bf16.mxu0 %v8472_v3  ;;  %v7848_v50 = vld [vmem:[%s8379_s11 + $0x8ec] ss:$56 sps:$4 sm:$0xff]   ;;  %v7905_v4 = vld [vmem:[%s8379_s11 + $0x12fc] ss:$56 sps:$4 sm:$0xff]  }
 0x262   : > { %5086 = vmatprep.mubr.bf16.mxu1 %v8500_v23  ;;  %v4723_v42 = vpop.f32.mrf.mxu0  ;;  %v7911_v11 = vld [vmem:[%s8379_s11 + $0x128c] ss:$56 sps:$4 sm:$0xff]  }
 0x263   : > { %v4764_v16 = vpop.f32.mrf.mxu1  ;;  %5016 = vmatpush1.bf16.msra.mxu0 %v7834_v10  ;;  %v7903_v10 = vld [vmem:[%s8379_s11 + $0x12f8] ss:$56 sps:$4 sm:$0xff]   ;;  %v7914_v42 = vld [vmem:[%s8379_s11 + $0xb1c] ss:$56 sps:$4 sm:$0xff]  }
 0x264   : > { %5057 = vmatpush1.bf16.msra.mxu1 %v7837_v46  ;;  %v4724_v20 = vpop.f32.mrf.mxu0  ;;  %5017 = vmatprep.subr.bf16.mxu0 %v7842_v12  ;;  %v7908_v46 = vld [vmem:[%s8379_s11 + $0xb8c] ss:$56 sps:$4 sm:$0xff]   ;;  %v7906_v12 = vld [vmem:[%s8379_s11 + $0xb88] ss:$56 sps:$4 sm:$0xff]   ;;  %v7917_v16 = vld [vmem:[%s8379_s11 + $0x121c] ss:$56 sps:$4 sm:$0xff]  }
 0x265   : > { %5058 = vmatprep.subr.bf16.mxu1 %v7845_v51  ;;  %v4765_v22 = vpop.f32.mrf.mxu1  ;;  %v7909_v51 = vld [vmem:[%s8379_s11 + $0x1288] ss:$56 sps:$4 sm:$0xff]   ;;  %v7920_v20 = vld [vmem:[%s8379_s11 + $0xaac] ss:$56 sps:$4 sm:$0xff]  }
 0x266   : > { %v7921_v22 = vld [vmem:[%s8379_s11 + $0x11a8] ss:$56 sps:$4 sm:$0xff]  }
 0x267   : > { %5018 = vmatpush1.bf16.msra.mxu0 %v7840_v17  ;;  %v7912_v17 = vld [vmem:[%s8379_s11 + $0xb18] ss:$56 sps:$4 sm:$0xff]  }
 0x268   : > { %5059 = vmatpush1.bf16.msra.mxu1 %v7843_v19  ;;  %5019 = vmatprep.subr.bf16.mxu0 %v7848_v50  ;;  %v7915_v19 = vld [vmem:[%s8379_s11 + $0x1218] ss:$56 sps:$4 sm:$0xff]   ;;  %v7923_v50 = vld [vmem:[%s8379_s11 + $0x11ac] ss:$56 sps:$4 sm:$0xff]  }
 0x269   : > { %5060 = vmatprep.subr.bf16.mxu1 %v7851_v21  ;;  %v7918_v21 = vld [vmem:[%s8379_s11 + $0xaa8] ss:$56 sps:$4 sm:$0xff]  }
 0x26b   : > { %5020 = vmatpush1.bf16.msra.mxu0 %v7846_v24  ;;  %v7926_v24 = vld [vmem:[%s8379_s11 + $0x344] ss:$56 sps:$4 sm:$0xff]  }
 0x26c   : > { %5061 = vmatpush1.bf16.msra.mxu1 %v7849_v25  ;;  %5021 = vmatprep.subr.bf16.mxu0 %v7854_v26  ;;  %v7929_v25 = vld [vmem:[%s8379_s11 + $0xa44] ss:$56 sps:$4 sm:$0xff]   ;;  %v7924_v26 = vld [vmem:[%s8379_s11 + $0x340] ss:$56 sps:$4 sm:$0xff]  }
 0x26d   : > { %5062 = vmatprep.subr.bf16.mxu1 %v7857_v27  ;;  %v7927_v27 = vld [vmem:[%s8379_s11 + $0xa40] ss:$56 sps:$4 sm:$0xff]  }
 0x26f   : > { %5022 = vmatpush1.bf16.msra.mxu0 %v7852_v28  ;;  %v7932_v28 = vld [vmem:[%s8379_s11 + $0x2d4] ss:$56 sps:$4 sm:$0xff]  }
 0x270   : > { %5063 = vmatpush1.bf16.msra.mxu1 %v7855_v29  ;;  %5023 = vmatprep.subr.bf16.mxu0 %v7860_v31  ;;  %v7935_v29 = vld [vmem:[%s8379_s11 + $0x9d4] ss:$56 sps:$4 sm:$0xff]  }
 0x271   : > { %5064 = vmatprep.subr.bf16.mxu1 %v7863_v32 }
 0x273   : > { %5024 = vmatpush1.bf16.msra.mxu0 %v7858_v1 }
 0x274   : > { %5065 = vmatpush1.bf16.msra.mxu1 %v7861_v33  ;;  %5025 = vmatprep.subr.bf16.mxu0 %v7866_v35  ;;  %v7930_v33 = vld [vmem:[%s8379_s11 + $0x2d0] ss:$56 sps:$4 sm:$0xff]  }
 0x275   : > { %5066 = vmatprep.subr.bf16.mxu1 %v7869_v7  ;;  %v7933_v35 = vld [vmem:[%s8379_s11 + $0x9d0] ss:$56 sps:$4 sm:$0xff]  }
 0x277   : > { %5026 = vmatpush1.bf16.msra.mxu0 %v7864_v36 }
 0x278   : > { %5067 = vmatpush1.bf16.msra.mxu1 %v7867_v37  ;;  %5027 = vmatprep.subr.bf16.mxu0 %v7872_v38  ;;  %v7938_v37 = vld [vmem:[%s8379_s11 + $0x264] ss:$56 sps:$4 sm:$0xff]  }
 0x279   : > { %5068 = vmatprep.subr.bf16.mxu1 %v7875_v39  ;;  %v7941_v38 = vld [vmem:[%s8379_s11 + $0x964] ss:$56 sps:$4 sm:$0xff]  }
 0x27b   : > { %5028 = vmatpush1.bf16.msra.mxu0 %v7870_v40 }
 0x27c   : > { %5069 = vmatpush1.bf16.msra.mxu1 %v7873_v41  ;;  %5029 = vmatprep.subr.bf16.mxu0 %v7878_v43 }
 0x27d   : > { %5070 = vmatprep.subr.bf16.mxu1 %v7881_v44  ;;  %v7936_v44 = vld [vmem:[%s8379_s11 + $0x260] ss:$56 sps:$4 sm:$0xff]  }
 0x27f   : > { %5030 = vmatpush2.bf16.msra.mxu0 %v7876_v45  ;;  %v7939_v45 = vld [vmem:[%s8379_s11 + $0x960] ss:$56 sps:$4 sm:$0xff]  }
 0x280   : > { %5071 = vmatpush2.bf16.msra.mxu1 %v7879_v47  ;;  %5031 = vmatprep.subr.bf16.mxu0 %v7884_v48  ;;  %v7942_v48 = vld [vmem:[%s8379_s11 + $0x1f0] ss:$56 sps:$4 sm:$0xff]  }
 0x281   : > { %5072 = vmatprep.subr.bf16.mxu1 %v7887_v49  ;;  %v7945_v49 = vld [vmem:[%s8379_s11 + $0x8f0] ss:$56 sps:$4 sm:$0xff]  }
 0x283   : > { %5032 = vmatpush2.bf16.msra.mxu0 %v7882_v52  ;;  %v7950_v52 = vld [vmem:[%s8379_s11 + $0x184] ss:$56 sps:$4 sm:$0xff]  }
 0x284   : > { %5073 = vmatpush2.bf16.msra.mxu1 %v7885_v53  ;;  %5033 = vmatprep.subr.bf16.mxu0 %v7890_v54  ;;  %v7953_v53 = vld [vmem:[%s8379_s11 + $0x884] ss:$56 sps:$4 sm:$0xff]   ;;  %v7948_v54 = vld [vmem:[%s8379_s11 + $0x180] ss:$56 sps:$4 sm:$0xff]  }
 0x285   : > { %5074 = vmatprep.subr.bf16.mxu1 %v7893_v55  ;;  %v7951_v55 = vld [vmem:[%s8379_s11 + $0x880] ss:$56 sps:$4 sm:$0xff]  }
 0x287   : > { %5034 = vmatpush2.bf16.msra.mxu0 %v7888_v56  ;;  %v7956_v56 = vld [vmem:[%s8379_s11 + $0x114] ss:$56 sps:$4 sm:$0xff]  }
 0x288   : > { %5075 = vmatpush2.bf16.msra.mxu1 %v7891_v57  ;;  %5035 = vmatprep.subr.bf16.mxu0 %v7896_v58  ;;  %v7959_v57 = vld [vmem:[%s8379_s11 + $0x814] ss:$56 sps:$4 sm:$0xff]   ;;  %v7954_v58 = vld [vmem:[%s8379_s11 + $0x110] ss:$56 sps:$4 sm:$0xff]  }
 0x289   : > { %5076 = vmatprep.subr.bf16.mxu1 %v7899_v59  ;;  %v7957_v59 = vld [vmem:[%s8379_s11 + $0x810] ss:$56 sps:$4 sm:$0xff]  }
 0x28b   : > { %5036 = vmatpush2.bf16.msra.mxu0 %v7894_v60  ;;  %v7962_v60 = vld [vmem:[%s8379_s11 + $0xa4] ss:$56 sps:$4 sm:$0xff]  }
 0x28c   : > { %5077 = vmatpush2.bf16.msra.mxu1 %v7897_v61  ;;  %5037 = vmatprep.subr.bf16.mxu0 %v7902_v0  ;;  %v7965_v61 = vld [vmem:[%s8379_s11 + $0x7a4] ss:$56 sps:$4 sm:$0xff]   ;;  %v7960_v0 = vld [vmem:[%s8379_s11 + $0xa0] ss:$56 sps:$4 sm:$0xff]  }
 0x28d   : > { %5078 = vmatprep.subr.bf16.mxu1 %v7905_v4  ;;  %v7963_v4 = vld [vmem:[%s8379_s11 + $0x7a0] ss:$56 sps:$4 sm:$0xff]  }
 0x28f   : > { %5038 = vmatpush2.bf16.msra.mxu0 %v7900_v5  ;;  %v7968_v5 = vld [vmem:[%s8379_s11 + $0x34] ss:$56 sps:$4 sm:$0xff]  }
 0x290   : > { %5079 = vmatpush2.bf16.msra.mxu1 %v7903_v10  ;;  %5039 = vmatprep.subr.bf16.mxu0 %v7908_v46  ;;  %v7971_v10 = vld [vmem:[%s8379_s11 + $0x734] ss:$56 sps:$4 sm:$0xff]   ;;  %v7966_v46 = vld [vmem:[%s8379_s11 + $0x30] ss:$56 sps:$4 sm:$0xff]  }
 0x291   : > { %5080 = vmatprep.subr.bf16.mxu1 %v7911_v11  ;;  %v7969_v11 = vld [vmem:[%s8379_s11 + $0x730] ss:$56 sps:$4 sm:$0xff]  }
 0x293   : > { %5040 = vmatpush2.bf16.msra.mxu0 %v7906_v12  ;;  %v7974_v12 = vld [vmem:[%s8379_s11 + $0x6c4] ss:$56 sps:$4 sm:$0xff]  }
 0x294   : > { %5081 = vmatpush2.bf16.msra.mxu1 %v7909_v51  ;;  %5041 = vmatprep.subr.bf16.mxu0 %v7914_v42  ;;  %v7977_v51 = vld [vmem:[%s8379_s11 + $0xdc4] ss:$56 sps:$4 sm:$0xff]   ;;  %v7972_v42 = vld [vmem:[%s8379_s11 + $0x6c0] ss:$56 sps:$4 sm:$0xff]  }
 0x295   : > { %5082 = vmatprep.subr.bf16.mxu1 %v7917_v16  ;;  %v7975_v16 = vld [vmem:[%s8379_s11 + $0xdc0] ss:$56 sps:$4 sm:$0xff]  }
 0x297   : > { %5042 = vmatpush2.bf16.msra.mxu0 %v7912_v17  ;;  %v7980_v17 = vld [vmem:[%s8379_s11 + $0x654] ss:$56 sps:$4 sm:$0xff]  }
 0x298   : > { %5083 = vmatpush2.bf16.msra.mxu1 %v7915_v19  ;;  %5043 = vmatprep.subr.bf16.mxu0 %v7920_v20  ;;  %v7983_v19 = vld [vmem:[%s8379_s11 + $0xd54] ss:$56 sps:$4 sm:$0xff]   ;;  %v7978_v20 = vld [vmem:[%s8379_s11 + $0x650] ss:$56 sps:$4 sm:$0xff]  }
 0x299   : > { %5084 = vmatprep.subr.bf16.mxu1 %v7923_v50  ;;  %v7981_v50 = vld [vmem:[%s8379_s11 + $0xd50] ss:$56 sps:$4 sm:$0xff]  }
 0x29b   : > { %5044 = vmatpush2.bf16.msra.mxu0 %v7918_v21  ;;  %v7986_v21 = vld [vmem:[%s8379_s11 + $0x5e4] ss:$56 sps:$4 sm:$0xff]  }
 0x29c   : > { %5085 = vmatpush2.bf16.msra.mxu1 %v7921_v22  ;;  %5095 = vmatprep.subr.bf16.mxu0 %v7926_v24  ;;  %v7989_v22 = vld [vmem:[%s8379_s11 + $0xce4] ss:$56 sps:$4 sm:$0xff]   ;;  %v7984_v24 = vld [vmem:[%s8379_s11 + $0x5e0] ss:$56 sps:$4 sm:$0xff]  }
 0x29d   : > { %5136 = vmatprep.subr.bf16.mxu1 %v7929_v25  ;;  %v7987_v25 = vld [vmem:[%s8379_s11 + $0xce0] ss:$56 sps:$4 sm:$0xff]  }
 0x29e   : > { %v4801_v31 = vpop.f32.mrf.mxu0  ;;  %5046 = vmatmul.mubr.bf16.vlgmr.msra.gmra.mxu0 %v8493_v18 }
 0x29f   : > { %5087 = vmatmul.mubr.bf16.vlgmr.msra.gmra.mxu1 %v8465_v63  ;;  %v4842_v32 = vpop.f32.mrf.mxu1  ;;  %v4802_v1 = vadd.f32 %v4801_v31, %v9004_v6  ;;  %5096 = vmatpush1.bf16.msra.mxu0 %v7924_v26  ;;  %v7992_v26 = vld [vmem:[%s8379_s11 + $0x574] ss:$56 sps:$4 sm:$0xff]   ;;  %v7998_v31 = vld [vmem:[%s8379_s11 + $0x504] ss:$56 sps:$4 sm:$0xff]  }
 0x2a0   : > { %5137 = vmatpush1.bf16.msra.mxu1 %v7927_v27  ;;  %v4803_v7 = vpop.f32.mrf.mxu0  ;;  %5097 = vmatprep.subr.bf16.mxu0 %v7932_v28  ;;  %v7995_v27 = vld [vmem:[%s8379_s11 + $0xc74] ss:$56 sps:$4 sm:$0xff]   ;;  %v7990_v28 = vld [vmem:[%s8379_s11 + $0x570] ss:$56 sps:$4 sm:$0xff]  }
 0x2a1   : > { %v4844_v36 = vpop.f32.mrf.mxu1  ;;  %5138 = vmatprep.subr.bf16.mxu1 %v7935_v29  ;;  %v4804_v39 = vadd.f32 %v4803_v7, %v9013_v14  ;;  %v9088_v40 = vadd.f32 %v4842_v32, %v4802_v1  ;;  %5127 = vmatprep.mubr.bf16.mxu0 %v8462_v62  ;;  %v7944_v62 = vld [vmem:[%s8379_s11 + $0x1f4] ss:$56 sps:$4 sm:$0xff]   ;;  %v7993_v29 = vld [vmem:[%s8379_s11 + $0xc70] ss:$56 sps:$4 sm:$0xff]   ;;  %v8001_v32 = vld [vmem:[%s8379_s11 + $0xc04] ss:$56 sps:$4 sm:$0xff]  }
 0x2a2   : > { %5168 = vmatprep.mubr.bf16.mxu1 %v8472_v3  ;;  %v4805_v6 = vpop.f32.mrf.mxu0  ;;  %v7947_v14 = vld [vmem:[%s8379_s11 + $0x8f4] ss:$56 sps:$4 sm:$0xff]   ;;  %v7996_v1 = vld [vmem:[%s8379_s11 + $0x500] ss:$56 sps:$4 sm:$0xff]  }
 0x2a3   : > { %v4846_v41 = vpop.f32.mrf.mxu1  ;;  %v9092_v43 = vadd.f32 %v4844_v36, %v4804_v39  ;;  %5098 = vmatpush1.bf16.msra.mxu0 %v7930_v33  ;;  %v7999_v33 = vld [vmem:[%s8379_s11 + $0xc00] ss:$56 sps:$4 sm:$0xff]   ;;  %v8007_v7 = vld [vmem:[%s8379_s11 + $0xb94] ss:$56 sps:$4 sm:$0xff]   ;;  %v8002_v36 = vld [vmem:[%s8379_s11 + $0x490] ss:$56 sps:$4 sm:$0xff]  }
 0x2a4   : > { %5139 = vmatpush1.bf16.msra.mxu1 %v7933_v35  ;;  %v4806_v47 = vpop.f32.mrf.mxu0  ;;  %5099 = vmatprep.subr.bf16.mxu0 %v7938_v37  ;;  %v8004_v35 = vld [vmem:[%s8379_s11 + $0x494] ss:$56 sps:$4 sm:$0xff]   ;;  %v8005_v37 = vld [vmem:[%s8379_s11 + $0xb90] ss:$56 sps:$4 sm:$0xff]   ;;  %v8013_v39 = vld [vmem:[%s8379_s11 + $0xb24] ss:$56 sps:$4 sm:$0xff]  }
 0x2a5   : > { %5140 = vmatprep.subr.bf16.mxu1 %v7941_v38  ;;  %v4847_v3 = vpop.f32.mrf.mxu1  ;;  %v8010_v38 = vld [vmem:[%s8379_s11 + $0x424] ss:$56 sps:$4 sm:$0xff]   ;;  %v8008_v6 = vld [vmem:[%s8379_s11 + $0x420] ss:$56 sps:$4 sm:$0xff]   ;;  %v8014_v47 = vld [vmem:[%s8379_s11 + $0x3b0] ss:$56 sps:$4 sm:$0xff]  }
 0x2a6   : > { %v8011_v41 = vld [vmem:[%s8379_s11 + $0xb20] ss:$56 sps:$4 sm:$0xff]  }
 0x2a7   : > { %5100 = vmatpush1.bf16.msra.mxu0 %v7936_v44  ;;  %v8016_v44 = vld [vmem:[%s8379_s11 + $0x3b4] ss:$56 sps:$4 sm:$0xff]   ;;  %v5263_v3 = vld [vmem:[%s8386_s9 + $0xf8] sm:$0xff] }
 0x2a8   : > { %5141 = vmatpush1.bf16.msra.mxu1 %v7939_v45  ;;  %5101 = vmatprep.subr.bf16.mxu0 %v7944_v62  ;;  %v8019_v45 = vld [vmem:[%s8379_s11 + $0xab4] ss:$56 sps:$4 sm:$0xff]   ;;  %v8017_v62 = vld [vmem:[%s8379_s11 + $0xab0] ss:$56 sps:$4 sm:$0xff]  }
 0x2a9   : > { %5142 = vmatprep.subr.bf16.mxu1 %v7947_v14  ;;  %v8022_v14 = vld [vmem:[%s8379_s11 + $0x1144] ss:$56 sps:$4 sm:$0xff]  }
 0x2ab   : > { %5102 = vmatpush1.bf16.msra.mxu0 %v7942_v48  ;;  %v8020_v48 = vld [vmem:[%s8379_s11 + $0x1140] ss:$56 sps:$4 sm:$0xff]  }
 0x2ac   : > { %5143 = vmatpush1.bf16.msra.mxu1 %v7945_v49  ;;  %5103 = vmatprep.subr.bf16.mxu0 %v7950_v52  ;;  %v5247_v49 = vld [vmem:[%s8386_s9 + $0x78] sm:$0xff]  ;;  %v5262_v52 = vld [vmem:[%s8386_s9 + $0xf0] sm:$0xff] }
 0x2ad   : > { %5144 = vmatprep.subr.bf16.mxu1 %v7953_v53  ;;  %v8025_v53 = vld [vmem:[%s8379_s11 + $0x10d4] ss:$56 sps:$4 sm:$0xff]  }
 0x2af   : > { %5104 = vmatpush1.bf16.msra.mxu0 %v7948_v54  ;;  %v5219_v54 = vmax.f32 %v8792_v8, 0.0 }
 0x2b0   : > { %5145 = vmatpush1.bf16.msra.mxu1 %v7951_v55  ;;  %5105 = vmatprep.subr.bf16.mxu0 %v7956_v56 }
 0x2b1   : > { %5146 = vmatprep.subr.bf16.mxu1 %v7959_v57  ;;  %v5246_v57 = vld [vmem:[%s8386_s9 + $0x70] sm:$0xff] }
 0x2b3   : > { %5106 = vmatpush1.bf16.msra.mxu0 %v7954_v58 }
 0x2b4   : > { %5147 = vmatpush1.bf16.msra.mxu1 %v7957_v59  ;;  %5107 = vmatprep.subr.bf16.mxu0 %v7962_v60  ;;  %v8023_v59 = vld [vmem:[%s8379_s11 + $0x10d0] ss:$56 sps:$4 sm:$0xff]  }
 0x2b5   : > { %5148 = vmatprep.subr.bf16.mxu1 %v7965_v61  ;;  %v5261_v60 = vld [vmem:[%s8386_s9 + $0xe8] sm:$0xff] }
 0x2b7   : > { %5108 = vmatpush1.bf16.msra.mxu0 %v7960_v0  ;;  %v5245_v0 = vld [vmem:[%s8386_s9 + $0x68] sm:$0xff] }
 0x2b8   : > { %5149 = vmatpush1.bf16.msra.mxu1 %v7963_v4  ;;  %5109 = vmatprep.subr.bf16.mxu0 %v7968_v5  ;;  %v8028_v4 = vld [vmem:[%s8379_s11 + $0x1064] ss:$56 sps:$4 sm:$0xff]  }
 0x2b9   : > { %5150 = vmatprep.subr.bf16.mxu1 %v7971_v10  ;;  %v5244_v10 = vld [vmem:[%s8386_s9 + $0x60] sm:$0xff] }
 0x2bb   : > { %5110 = vmatpush1.bf16.msra.mxu0 %v7966_v46 }
 0x2bc   : > { %5151 = vmatpush1.bf16.msra.mxu1 %v7969_v11  ;;  %5111 = vmatprep.subr.bf16.mxu0 %v7974_v12  ;;  %v8026_v11 = vld [vmem:[%s8379_s11 + $0x1060] ss:$56 sps:$4 sm:$0xff]  }
 0x2bd   : > { %5152 = vmatprep.subr.bf16.mxu1 %v7977_v51  ;;  %v5259_v12 = vld [vmem:[%s8386_s9 + $0xd8] sm:$0xff] }
 0x2bf   : > { %5112 = vmatpush2.bf16.msra.mxu0 %v7972_v42  ;;  %v5243_v42 = vld [vmem:[%s8386_s9 + $0x58] sm:$0xff] }
 0x2c0   : > { %5153 = vmatpush2.bf16.msra.mxu1 %v7975_v16  ;;  %5113 = vmatprep.subr.bf16.mxu0 %v7980_v17  ;;  %v8031_v16 = vld [vmem:[%s8379_s11 + $0xff4] ss:$56 sps:$4 sm:$0xff]  }
 0x2c1   : > { %5154 = vmatprep.subr.bf16.mxu1 %v7983_v19  ;;  %v5258_v19 = vld [vmem:[%s8386_s9 + $0xd0] sm:$0xff] }
 0x2c3   : > { %5114 = vmatpush2.bf16.msra.mxu0 %v7978_v20  ;;  %v8029_v20 = vld [vmem:[%s8379_s11 + $0xff0] ss:$56 sps:$4 sm:$0xff]  }
 0x2c4   : > { %5155 = vmatpush2.bf16.msra.mxu1 %v7981_v50  ;;  %5115 = vmatprep.subr.bf16.mxu0 %v7986_v21  ;;  %v5257_v50 = vld [vmem:[%s8386_s9 + $0xc8] sm:$0xff] }
 0x2c5   : > { %5156 = vmatprep.subr.bf16.mxu1 %v7989_v22  ;;  %v5241_v21 = vld [vmem:[%s8386_s9 + $0x48] sm:$0xff]  ;;  %v8034_v22 = vld [vmem:[%s8379_s11 + $0xf84] ss:$56 sps:$4 sm:$0xff]  }
 0x2c7   : > { %5116 = vmatpush2.bf16.msra.mxu0 %v7984_v24  ;;  %v5256_v24 = vld [vmem:[%s8386_s9 + $0xc0] sm:$0xff] }
 0x2c8   : > { %5157 = vmatpush2.bf16.msra.mxu1 %v7987_v25  ;;  %5117 = vmatprep.subr.bf16.mxu0 %v7992_v26  ;;  %v5240_v25 = vld [vmem:[%s8386_s9 + $0x40] sm:$0xff] }
 0x2c9   : > { %5158 = vmatprep.subr.bf16.mxu1 %v7995_v27  ;;  %v8032_v26 = vld [vmem:[%s8379_s11 + $0xf80] ss:$56 sps:$4 sm:$0xff]  }
 0x2ca   : > { %v5255_v27 = vld [vmem:[%s8386_s9 + $0xb8] sm:$0xff] }
 0x2cb   : > { %5118 = vmatpush2.bf16.msra.mxu0 %v7990_v28  ;;  %v5239_v28 = vld [vmem:[%s8386_s9 + $0x38] sm:$0xff] }
 0x2cc   : > { %5159 = vmatpush2.bf16.msra.mxu1 %v7993_v29  ;;  %5119 = vmatprep.subr.bf16.mxu0 %v7998_v31  ;;  %v8037_v29 = vld [vmem:[%s8379_s11 + $0xf14] ss:$56 sps:$4 sm:$0xff]  }
 0x2cd   : > { %5160 = vmatprep.subr.bf16.mxu1 %v8001_v32  ;;  %v5254_v31 = vld [vmem:[%s8386_s9 + $0xb0] sm:$0xff] }
 0x2ce   : > { %v5238_v32 = vld [vmem:[%s8386_s9 + $0x30] sm:$0xff] }
 0x2cf   : > { %5120 = vmatpush2.bf16.msra.mxu0 %v7996_v1  ;;  %v8035_v1 = vld [vmem:[%s8379_s11 + $0xf10] ss:$56 sps:$4 sm:$0xff]  }
 0x2d0   : > { %5161 = vmatpush2.bf16.msra.mxu1 %v7999_v33  ;;  %5121 = vmatprep.subr.bf16.mxu0 %v8004_v35  ;;  %v5253_v33 = vld [vmem:[%s8386_s9 + $0xa8] sm:$0xff] }
 0x2d1   : > { %5162 = vmatprep.subr.bf16.mxu1 %v8007_v7  ;;  %v5237_v35 = vld [vmem:[%s8386_s9 + $0x28] sm:$0xff]  ;;  %v8040_v7 = vld [vmem:[%s8379_s11 + $0xea4] ss:$56 sps:$4 sm:$0xff]  }
 0x2d3   : > { %5122 = vmatpush2.bf16.msra.mxu0 %v8002_v36  ;;  %v5252_v36 = vld [vmem:[%s8386_s9 + $0xa0] sm:$0xff] }
 0x2d4   : > { %5163 = vmatpush2.bf16.msra.mxu1 %v8005_v37  ;;  %5123 = vmatprep.subr.bf16.mxu0 %v8010_v38  ;;  %v5236_v37 = vld [vmem:[%s8386_s9 + $0x20] sm:$0xff] }
 0x2d5   : > { %5164 = vmatprep.subr.bf16.mxu1 %v8013_v39  ;;  %v8038_v38 = vld [vmem:[%s8379_s11 + $0xea0] ss:$56 sps:$4 sm:$0xff]  }
 0x2d6   : > { %v5251_v39 = vld [vmem:[%s8386_s9 + $0x98] sm:$0xff] }
 0x2d7   : > { %5124 = vmatpush2.bf16.msra.mxu0 %v8008_v6  ;;  %v5235_v6 = vld [vmem:[%s8386_s9 + $0x18] sm:$0xff] }
 0x2d8   : > { %5165 = vmatpush2.bf16.msra.mxu1 %v8011_v41  ;;  %5125 = vmatprep.subr.bf16.mxu0 %v8016_v44  ;;  %v8043_v41 = vld [vmem:[%s8379_s11 + $0xe34] ss:$56 sps:$4 sm:$0xff]  }
 0x2d9   : > { %5166 = vmatprep.subr.bf16.mxu1 %v8019_v45  ;;  %v5250_v44 = vld [vmem:[%s8386_s9 + $0x90] sm:$0xff] }
 0x2da   : > { %v5234_v45 = vld [vmem:[%s8386_s9 + $0x10] sm:$0xff] }
 0x2db   : > { %5126 = vmatpush2.bf16.msra.mxu0 %v8014_v47  ;;  %v8041_v47 = vld [vmem:[%s8379_s11 + $0xe30] ss:$56 sps:$4 sm:$0xff]  }
 0x2dc   : > { %5167 = vmatpush2.bf16.msra.mxu1 %v8017_v62  ;;  %5177 = vmatprep.subr.bf16.mxu0 %v8022_v14  ;;  %v5249_v62 = vld [vmem:[%s8386_s9 + $0x88] sm:$0xff] }
 0x2dd   : > { %6749 = vmatprep.subr.mxu1 %v5263_v3  ;;  %v5233_v14 = vld [vmem:[%s8386_s9 + $0x8] sm:$0xff]  ;;  %v8046_v3 = vld [vmem:[%s8379_s11 + $0x14c4] ss:$56 sps:$4 sm:$0xff]  }
 0x2de   : > { %v4883_v55 = vpop.f32.mrf.mxu0  ;;  %5128 = vmatmul.mubr.bf16.vlgmr.msra.gmra.mxu0 %v8486_v13 }
 0x2df   : > { %v4924_v56 = vpop.f32.mrf.mxu1  ;;  %5169 = vmatmul.mubr.bf16.vlgmr.msra.gmra.mxu1 %v8493_v18  ;;  %5178 = vmatpush1.bf16.msra.mxu0 %v8020_v48  ;;  %v5260_v18 = vld [vmem:[%s8386_s9 + $0xe0] sm:$0xff] }
 0x2e0   : > { %v9158_v58 = vadd.f32 %v4924_v56, %v4883_v55  ;;  %6750 = vmatpush3.msra.mxu1 %v5247_v49  ;;  %5520 = vmatprep.mubr.f32.mxu1 %v5219_v54  ;;  %v4885_v61 = vpop.f32.mrf.mxu0  ;;  %v5248_v48 = vld [vmem:[%s8386_s9 + $0x80] sm:$0xff]  ;;  %v5218_v54 = vmax.f32 %v8785_v2, 0.0  ;;  %v5279_v55 = vld [vmem:[%s8386_s9 + $0x178] sm:$0xff]  ;;  %v5294_v56 = vld [vmem:[%s8386_s9 + $0x1f0] sm:$0xff] }
 0x2e1   : > { %v4926_v8 = vpop.f32.mrf.mxu1  ;;  %6751 = vmatprep.subr.mxu1 %v5262_v52  ;;  %5179 = vmatprep.subr.bf16.mxu0 %v8025_v53  ;;  %v5232_v49 = vld [vmem:[%s8386_s9] sm:$0xff]  ;;  %v5295_v53 = vld [vmem:[%s8386_s9 + $0x1f8] sm:$0xff]  ;;  %v8047_v2 = vld [vmem:[%s8379_s11 + $0x1450] ss:$56 sps:$4 sm:$0xff]  }
 0x2e2   : > { %v9164_v13 = vadd.f32 %v4926_v8, %v4885_v61  ;;  %6752 = vmatpush3.msra.mxu1 %v5246_v57  ;;  %v4887_v5 = vpop.f32.mrf.mxu0  ;;  %5209 = vmatprep.mubr.bf16.mxu0 %v8500_v23  ;;  %v5242_v23 = vld [vmem:[%s8386_s9 + $0x50] sm:$0xff]  ;;  %v8044_v52 = vld [vmem:[%s8379_s11 + $0x14c0] ss:$56 sps:$4 sm:$0xff]   ;;  %v5293_v61 = vld [vmem:[%s8386_s9 + $0x1e8] sm:$0xff] }
 0x2e3   : > { %6753 = vmatprep.subr.mxu1 %v5261_v60  ;;  %v4928_v46 = vpop.f32.mrf.mxu1  ;;  %5180 = vmatpush1.bf16.msra.mxu0 %v8023_v59  ;;  %v8049_v57 = vld [vmem:[%s8379_s11 + $0x1454] ss:$56 sps:$4 sm:$0xff]   ;;  %v5221_v59 = vmax.f32 %v8870_v34, 0.0  ;;  %v5292_v34 = vld [vmem:[%s8386_s9 + $0x1e0] sm:$0xff]  ;;  %v5291_v5 = vld [vmem:[%s8386_s9 + $0x1d8] sm:$0xff] }
 0x2e4   : > { %6754 = vmatpush3.msra.mxu1 %v5245_v0  ;;  %v4888_v51 = vpop.f32.mrf.mxu0  ;;  %5181 = vmatprep.subr.bf16.mxu0 %v8028_v4  ;;  %v5278_v60 = vld [vmem:[%s8386_s9 + $0x170] sm:$0xff]  ;;  %v5277_v8 = vld [vmem:[%s8386_s9 + $0x168] sm:$0xff]  ;;  %v8052_v0 = vld [vmem:[%s8379_s11 + $0x13e4] ss:$56 sps:$4 sm:$0xff]  }
 0x2e5   : > { %6755 = vmatprep.subr.mxu1 %v5260_v18  ;;  %v4929_v17 = vpop.f32.mrf.mxu1  ;;  %v5276_v4 = vld [vmem:[%s8386_s9 + $0x160] sm:$0xff]  ;;  %v8055_v46 = vld [vmem:[%s8379_s11 + $0x1374] ss:$56 sps:$4 sm:$0xff]   ;;  %v8053_v51 = vld [vmem:[%s8379_s11 + $0x1370] ss:$56 sps:$4 sm:$0xff]  }
 0x2e6   : > { %6756 = vmatpush3.msra.mxu1 %v5244_v10  ;;  %v8050_v18 = vld [vmem:[%s8379_s11 + $0x13e0] ss:$56 sps:$4 sm:$0xff]   ;;  %v8058_v17 = vld [vmem:[%s8379_s11 + $0x1304] ss:$56 sps:$4 sm:$0xff]  }
 0x2e7   : > { %6757 = vmatprep.subr.mxu1 %v5259_v12  ;;  %5182 = vmatpush1.bf16.msra.mxu0 %v8026_v11  ;;  %v5275_v10 = vld [vmem:[%s8386_s9 + $0x158] sm:$0xff]  ;;  %v5290_v11 = vld [vmem:[%s8386_s9 + $0x1d0] sm:$0xff] }
 0x2e8   : > { %6758 = vmatpush3.msra.mxu1 %v5243_v42  ;;  %5183 = vmatprep.subr.bf16.mxu0 %v8031_v16  ;;  %v5274_v12 = vld [vmem:[%s8386_s9 + $0x150] sm:$0xff]  ;;  %v5289_v42 = vld [vmem:[%s8386_s9 + $0x1c8] sm:$0xff] }
 0x2e9   : > { %6759 = vmatprep.subr.mxu1 %v5258_v19  ;;  %v5273_v16 = vld [vmem:[%s8386_s9 + $0x148] sm:$0xff]  ;;  %v5288_v19 = vld [vmem:[%s8386_s9 + $0x1c0] sm:$0xff] }
 0x2ea   : > { %6760 = vmatpush3.msra.mxu1 %v5242_v23  ;;  %v5272_v23 = vld [vmem:[%s8386_s9 + $0x140] sm:$0xff] }
 0x2eb   : > { %6761 = vmatprep.subr.mxu1 %v5257_v50  ;;  %5184 = vmatpush1.bf16.msra.mxu0 %v8029_v20  ;;  %v8056_v20 = vld [vmem:[%s8379_s11 + $0x1300] ss:$56 sps:$4 sm:$0xff]  }
 0x2ec   : > { %6762 = vmatpush3.msra.mxu1 %v5241_v21  ;;  %5185 = vmatprep.subr.bf16.mxu0 %v8034_v22  ;;  %v5287_v50 = vld [vmem:[%s8386_s9 + $0x1b8] sm:$0xff]  ;;  %v8061_v22 = vld [vmem:[%s8379_s11 + $0x1294] ss:$56 sps:$4 sm:$0xff]  }
 0x2ed   : > { %6763 = vmatprep.subr.mxu1 %v5256_v24  ;;  %v5271_v21 = vld [vmem:[%s8386_s9 + $0x138] sm:$0xff]  ;;  %v5286_v24 = vld [vmem:[%s8386_s9 + $0x1b0] sm:$0xff] }
 0x2ee   : > { %6764 = vmatpush3.msra.mxu1 %v5240_v25  ;;  %v5270_v25 = vld [vmem:[%s8386_s9 + $0x130] sm:$0xff] }
 0x2ef   : > { %6765 = vmatprep.subr.mxu1 %v5255_v27  ;;  %5186 = vmatpush1.bf16.msra.mxu0 %v8032_v26  ;;  %v8059_v26 = vld [vmem:[%s8379_s11 + $0x1290] ss:$56 sps:$4 sm:$0xff]  }
 0x2f0   : > { %6766 = vmatpush3.msra.mxu1 %v5239_v28  ;;  %5187 = vmatprep.subr.bf16.mxu0 %v8037_v29  ;;  %v5285_v27 = vld [vmem:[%s8386_s9 + $0x1a8] sm:$0xff]  ;;  %v8064_v29 = vld [vmem:[%s8379_s11 + $0x1224] ss:$56 sps:$4 sm:$0xff]  }
 0x2f1   : > { %6767 = vmatprep.subr.mxu1 %v5254_v31  ;;  %v5269_v28 = vld [vmem:[%s8386_s9 + $0x128] sm:$0xff]  ;;  %v5284_v31 = vld [vmem:[%s8386_s9 + $0x1a0] sm:$0xff] }
 0x2f2   : > { %6768 = vmatpush3.msra.mxu1 %v5238_v32  ;;  %v5268_v32 = vld [vmem:[%s8386_s9 + $0x120] sm:$0xff] }
 0x2f3   : > { %6769 = vmatprep.subr.mxu1 %v5253_v33  ;;  %5188 = vmatpush1.bf16.msra.mxu0 %v8035_v1  ;;  %v8062_v1 = vld [vmem:[%s8379_s11 + $0x1220] ss:$56 sps:$4 sm:$0xff]  }
 0x2f4   : > { %6770 = vmatpush3.msra.mxu1 %v5237_v35  ;;  %5189 = vmatprep.subr.bf16.mxu0 %v8040_v7  ;;  %v5283_v33 = vld [vmem:[%s8386_s9 + $0x198] sm:$0xff]  ;;  %v8067_v7 = vld [vmem:[%s8379_s11 + $0x11b4] ss:$56 sps:$4 sm:$0xff]  }
 0x2f5   : > { %6771 = vmatprep.subr.mxu1 %v5252_v36  ;;  %v5267_v35 = vld [vmem:[%s8386_s9 + $0x118] sm:$0xff]  ;;  %v5282_v36 = vld [vmem:[%s8386_s9 + $0x190] sm:$0xff] }
 0x2f6   : > { %6772 = vmatpush3.msra.mxu1 %v5236_v37  ;;  %v5266_v37 = vld [vmem:[%s8386_s9 + $0x110] sm:$0xff] }
 0x2f7   : > { %6773 = vmatprep.subr.mxu1 %v5251_v39  ;;  %5190 = vmatpush1.bf16.msra.mxu0 %v8038_v38  ;;  %v8065_v38 = vld [vmem:[%s8379_s11 + $0x11b0] ss:$56 sps:$4 sm:$0xff]  }
 0x2f8   : > { %6774 = vmatpush3.msra.mxu1 %v5235_v6  ;;  %5191 = vmatprep.subr.bf16.mxu0 %v8043_v41  ;;  %v5281_v39 = vld [vmem:[%s8386_s9 + $0x188] sm:$0xff]  ;;  %v5280_v41 = vld [vmem:[%s8386_s9 + $0x180] sm:$0xff] }
 0x2f9   : > { %6775 = vmatprep.subr.mxu1 %v5250_v44  ;;  %v5265_v6 = vld [vmem:[%s8386_s9 + $0x108] sm:$0xff]  ;;  %v5327_v44 = vld [vmem:[%s8386_s9 + $0x2f8] sm:$0xff] }
 0x2fa   : > { %6776 = vmatpush3.msra.mxu1 %v5234_v45  ;;  %v5264_v45 = vld [vmem:[%s8386_s9 + $0x100] sm:$0xff] }
 0x2fb   : > { %6777 = vmatprep.subr.mxu1 %v5249_v62  ;;  %5192 = vmatpush1.bf16.msra.mxu0 %v8041_v47  ;;  %v5220_v47 = vmax.f32 %v8864_v30, 0.0  ;;  %v5359_v62 = vld [vmem:[%s8386_s9 + $0x3f8] sm:$0xff] }
 0x2fc   : > { %6778 = vmatpush3.msra.mxu1 %v5233_v14  ;;  %5193 = vmatprep.subr.bf16.mxu0 %v8046_v3  ;;  %v5311_v14 = vld [vmem:[%s8386_s9 + $0x278] sm:$0xff] }
 0x2fd   : > { %6779 = vmatprep.subr.mxu1 %v5248_v48  ;;  %v5343_v3 = vld [vmem:[%s8386_s9 + $0x378] sm:$0xff]  ;;  %v5223_v48 = vmax.f32 %v9016_v15, 0.0 }
 0x2fe   : > { %6780 = vmatpush3.msra.mxu1 %v5232_v49 }
 0x2ff   : > { %5521 = vmatmul.mubr.f32.vlgmr.msra.gmra.mxu1 %v5218_v54  ;;  %6784 = vmatprep.subr.mxu1 %v5295_v53  ;;  %v5225_v53 = vmax.f32 %v9092_v43, 0.0  ;;  %v5358_v54 = vld [vmem:[%s8386_s9 + $0x3f0] sm:$0xff]  ;;  %v5357_v43 = vld [vmem:[%s8386_s9 + $0x3e8] sm:$0xff] }
 0x300   : > { %5194 = vmatpush2.bf16.msra.mxu0 %v8044_v52  ;;  %6785 = vmatpush3.msra.mxu1 %v5279_v55  ;;  %v5326_v52 = vld [vmem:[%s8386_s9 + $0x2f0] sm:$0xff] }
 0x301   : > { %5590 = vmatprep.mubr.f32.mxu1 %v5221_v59  ;;  %6786 = vmatprep.subr.mxu1 %v5294_v56  ;;  %v5310_v55 = vld [vmem:[%s8386_s9 + $0x270] sm:$0xff]  ;;  %v5325_v56 = vld [vmem:[%s8386_s9 + $0x2e8] sm:$0xff] }
 0x302   : > { %6787 = vmatpush3.msra.mxu1 %v5278_v60  ;;  %5195 = vmatprep.subr.bf16.mxu0 %v8049_v57  ;;  %v5309_v59 = vld [vmem:[%s8386_s9 + $0x268] sm:$0xff] }
 0x303   : > { %6788 = vmatprep.subr.mxu1 %v5293_v61  ;;  %v5324_v61 = vld [vmem:[%s8386_s9 + $0x2e0] sm:$0xff] }
 0x304   : > { %5196 = vmatpush2.bf16.msra.mxu0 %v8047_v2  ;;  %6789 = vmatpush3.msra.mxu1 %v5277_v8  ;;  %v5341_v2 = vld [vmem:[%s8386_s9 + $0x368] sm:$0xff] }
 0x305   : > { %6790 = vmatprep.subr.mxu1 %v5292_v34  ;;  %5197 = vmatprep.subr.bf16.mxu0 %v8052_v0  ;;  %v5356_v0 = vld [vmem:[%s8386_s9 + $0x3e0] sm:$0xff] }
 0x306   : > { %6791 = vmatpush3.msra.mxu1 %v5276_v4  ;;  %v5308_v34 = vld [vmem:[%s8386_s9 + $0x260] sm:$0xff] }
 0x307   : > { %6792 = vmatprep.subr.mxu1 %v5291_v5  ;;  %v5323_v5 = vld [vmem:[%s8386_s9 + $0x2d8] sm:$0xff] }
 0x308   : > { %5198 = vmatpush2.bf16.msra.mxu0 %v8050_v18  ;;  %6793 = vmatpush3.msra.mxu1 %v5275_v10  ;;  %v5340_v18 = vld [vmem:[%s8386_s9 + $0x360] sm:$0xff] }
 0x309   : > { %6794 = vmatprep.subr.mxu1 %v5290_v11  ;;  %5199 = vmatprep.subr.bf16.mxu0 %v8055_v46  ;;  %v5355_v46 = vld [vmem:[%s8386_s9 + $0x3d8] sm:$0xff] }
 0x30a   : > { %6795 = vmatpush3.msra.mxu1 %v5274_v12  ;;  %v5307_v11 = vld [vmem:[%s8386_s9 + $0x258] sm:$0xff] }
 0x30b   : > { %6796 = vmatprep.subr.mxu1 %v5289_v42  ;;  %v5339_v12 = vld [vmem:[%s8386_s9 + $0x358] sm:$0xff]  ;;  %v5354_v42 = vld [vmem:[%s8386_s9 + $0x3d0] sm:$0xff] }
 0x30c   : > { %5200 = vmatpush2.bf16.msra.mxu0 %v8053_v51  ;;  %6797 = vmatpush3.msra.mxu1 %v5273_v16  ;;  %v5322_v51 = vld [vmem:[%s8386_s9 + $0x2d0] sm:$0xff] }
 0x30d   : > { %6798 = vmatprep.subr.mxu1 %v5288_v19  ;;  %5201 = vmatprep.subr.bf16.mxu0 %v8058_v17  ;;  %v5306_v16 = vld [vmem:[%s8386_s9 + $0x250] sm:$0xff]  ;;  %v5321_v19 = vld [vmem:[%s8386_s9 + $0x2c8] sm:$0xff] }
 0x30e   : > { %6799 = vmatpush3.msra.mxu1 %v5272_v23  ;;  %v5338_v17 = vld [vmem:[%s8386_s9 + $0x350] sm:$0xff]  ;;  %v5353_v23 = vld [vmem:[%s8386_s9 + $0x3c8] sm:$0xff] }
 0x30f   : > { %6800 = vmatprep.subr.mxu1 %v5287_v50  ;;  %v5337_v50 = vld [vmem:[%s8386_s9 + $0x348] sm:$0xff] }
 0x310   : > { %5202 = vmatpush2.bf16.msra.mxu0 %v8056_v20  ;;  %6801 = vmatpush3.msra.mxu1 %v5271_v21  ;;  %v5305_v20 = vld [vmem:[%s8386_s9 + $0x248] sm:$0xff]  ;;  %v5320_v21 = vld [vmem:[%s8386_s9 + $0x2c0] sm:$0xff] }
 0x311   : > { %6802 = vmatprep.subr.mxu1 %v5286_v24  ;;  %5203 = vmatprep.subr.bf16.mxu0 %v8061_v22  ;;  %v5352_v22 = vld [vmem:[%s8386_s9 + $0x3c0] sm:$0xff] }
 0x312   : > { %6803 = vmatpush3.msra.mxu1 %v5270_v25  ;;  %v5304_v24 = vld [vmem:[%s8386_s9 + $0x240] sm:$0xff] }
 0x313   : > { %6804 = vmatprep.subr.mxu1 %v5285_v27  ;;  %v5336_v25 = vld [vmem:[%s8386_s9 + $0x340] sm:$0xff]  ;;  %v5351_v27 = vld [vmem:[%s8386_s9 + $0x3b8] sm:$0xff] }
 0x314   : > { %5204 = vmatpush2.bf16.msra.mxu0 %v8059_v26  ;;  %6805 = vmatpush3.msra.mxu1 %v5269_v28  ;;  %v5319_v26 = vld [vmem:[%s8386_s9 + $0x2b8] sm:$0xff] }
 0x315   : > { %6806 = vmatprep.subr.mxu1 %v5284_v31  ;;  %5205 = vmatprep.subr.bf16.mxu0 %v8064_v29  ;;  %v5303_v28 = vld [vmem:[%s8386_s9 + $0x238] sm:$0xff]  ;;  %v5318_v31 = vld [vmem:[%s8386_s9 + $0x2b0] sm:$0xff] }
 0x316   : > { %6807 = vmatpush3.msra.mxu1 %v5268_v32  ;;  %v5335_v29 = vld [vmem:[%s8386_s9 + $0x338] sm:$0xff]  ;;  %v5350_v32 = vld [vmem:[%s8386_s9 + $0x3b0] sm:$0xff] }
 0x317   : > { %6808 = vmatprep.subr.mxu1 %v5283_v33  ;;  %v5334_v33 = vld [vmem:[%s8386_s9 + $0x330] sm:$0xff] }
 0x318   : > { %5206 = vmatpush2.bf16.msra.mxu0 %v8062_v1  ;;  %6809 = vmatpush3.msra.mxu1 %v5267_v35  ;;  %v5302_v1 = vld [vmem:[%s8386_s9 + $0x230] sm:$0xff]  ;;  %v5317_v35 = vld [vmem:[%s8386_s9 + $0x2a8] sm:$0xff] }
 0x319   : > { %6810 = vmatprep.subr.mxu1 %v5282_v36  ;;  %5207 = vmatprep.subr.bf16.mxu0 %v8067_v7  ;;  %v5349_v7 = vld [vmem:[%s8386_s9 + $0x3a8] sm:$0xff] }
 0x31a   : > { %6811 = vmatpush3.msra.mxu1 %v5266_v37  ;;  %v5301_v36 = vld [vmem:[%s8386_s9 + $0x228] sm:$0xff] }
 0x31b   : > { %6812 = vmatprep.subr.mxu1 %v5281_v39  ;;  %v5333_v37 = vld [vmem:[%s8386_s9 + $0x328] sm:$0xff]  ;;  %v5348_v39 = vld [vmem:[%s8386_s9 + $0x3a0] sm:$0xff] }
 0x31c   : > { %5208 = vmatpush2.bf16.msra.mxu0 %v8065_v38  ;;  %6813 = vmatpush3.msra.mxu1 %v5265_v6  ;;  %v5316_v38 = vld [vmem:[%s8386_s9 + $0x2a0] sm:$0xff] }
 0x31d   : > { %6814 = vmatprep.subr.mxu1 %v5280_v41  ;;  %6819 = vmatprep.subr.mxu0 %v5327_v44  ;;  %v5300_v6 = vld [vmem:[%s8386_s9 + $0x220] sm:$0xff]  ;;  %v5315_v44 = vld [vmem:[%s8386_s9 + $0x298] sm:$0xff] }
 0x31e   : > { %6815 = vmatpush3.msra.mxu1 %v5264_v45  ;;  %v9260_v49 = vpop.f32.mrf.mxu0  ;;  %v5332_v41 = vld [vmem:[%s8386_s9 + $0x320] sm:$0xff]  ;;  %v5347_v45 = vld [vmem:[%s8386_s9 + $0x398] sm:$0xff] }
 0x31f   : > { %5210 = vmatmul.mubr.bf16.vlgmr.msra.gmra.mxu0 %v8465_v63  ;;  %5591 = vmatmul.mubr.f32.vlgmr.msra.gmra.mxu1 %v5220_v47  ;;  %v9264_v30 = vpop.f32.mrf.mxu1  ;;  %v5342_v63 = vld [vmem:[%s8386_s9 + $0x370] sm:$0xff]  ;;  %v5299_v47 = vld [vmem:[%s8386_s9 + $0x218] sm:$0xff] }
 0x320   : > { %6854 = vmatprep.subr.mxu1 %v5359_v62  ;;  %6820 = vmatpush3.msra.mxu0 %v5311_v14  ;;  %v9269_v15 = vpop.f32.mrf.mxu0  ;;  %v5331_v62 = vld [vmem:[%s8386_s9 + $0x318] sm:$0xff]  ;;  %v5314_v14 = vld [vmem:[%s8386_s9 + $0x290] sm:$0xff] }
 0x321   : > { %5660 = vmatprep.mubr.f32.mxu0 %v5223_v48  ;;  %6855 = vmatpush3.msra.mxu1 %v5343_v3  ;;  %v9273_v57 = vpop.f32.mrf.mxu1  ;;  %v5346_v3 = vld [vmem:[%s8386_s9 + $0x390] sm:$0xff] }
 0x322   : > { %5730 = vmatprep.mubr.f32.mxu1 %v5225_v53  ;;  %6821 = vmatprep.subr.mxu0 %v5326_v52  ;;  %v4969_v60 = vpop.f32.mrf.mxu0  ;;  %v5298_v48 = vld [vmem:[%s8386_s9 + $0x210] sm:$0xff]  ;;  %v5313_v53 = vld [vmem:[%s8386_s9 + $0x288] sm:$0xff] }
 0x323   : > { %6856 = vmatprep.subr.mxu1 %v5358_v54  ;;  %6822 = vmatpush3.msra.mxu0 %v5310_v55  ;;  %v5010_v8 = vpop.f32.mrf.mxu1  ;;  %v5330_v52 = vld [vmem:[%s8386_s9 + $0x310] sm:$0xff]  ;;  %v5345_v54 = vld [vmem:[%s8386_s9 + $0x388] sm:$0xff]  ;;  %v5296_v60 = vld [vmem:[%s8386_s9 + $0x200] sm:$0xff] }
 0x324   : > { %6857 = vmatpush3.msra.mxu1 %v5342_v63  ;;  %6823 = vmatprep.subr.mxu0 %v5325_v56  ;;  %v4970_v4 = vpop.f32.mrf.mxu0  ;;  %v5297_v55 = vld [vmem:[%s8386_s9 + $0x208] sm:$0xff]  ;;  %v5312_v56 = vld [vmem:[%s8386_s9 + $0x280] sm:$0xff]  ;;  %v5391_v8 = vld [vmem:[%s8386_s9 + $0x4f8] sm:$0xff] }
 0x325   : > { %6858 = vmatprep.subr.mxu1 %v5357_v43  ;;  %6824 = vmatpush3.msra.mxu0 %v5309_v59  ;;  %v5011_v10 = vpop.f32.mrf.mxu1  ;;  %v5329_v63 = vld [vmem:[%s8386_s9 + $0x308] sm:$0xff]  ;;  %v4968_v43 = vadd.f32 %v9269_v15, %v9164_v13  ;;  %v5344_v59 = vld [vmem:[%s8386_s9 + $0x380] sm:$0xff]  ;;  %v5375_v13 = vld [vmem:[%s8386_s9 + $0x478] sm:$0xff] }
 0x326   : > { %6859 = vmatpush3.msra.mxu1 %v5341_v2  ;;  %6825 = vmatprep.subr.mxu0 %v5324_v61  ;;  %v5328_v2 = vld [vmem:[%s8386_s9 + $0x300] sm:$0xff]  ;;  %v5222_v61 = vmax.f32 %v9007_v9, 0.0  ;;  %v5423_v4 = vld [vmem:[%s8386_s9 + $0x5f8] sm:$0xff]  ;;  %v5374_v9 = vld [vmem:[%s8386_s9 + $0x470] sm:$0xff] }
 0x327   : > { %6860 = vmatprep.subr.mxu1 %v5356_v0  ;;  %6826 = vmatpush3.msra.mxu0 %v5308_v34  ;;  %v5224_v0 = vmax.f32 %v9088_v40, 0.0  ;;  %v5227_v15 = vmax.f32 %v4968_v43, 0.0  ;;  %v5390_v34 = vld [vmem:[%s8386_s9 + $0x4f0] sm:$0xff]  ;;  %v5389_v40 = vld [vmem:[%s8386_s9 + $0x4e8] sm:$0xff]  ;;  %v5395_v43 = vld [vmem:[%s8386_s9 + $0x518] sm:$0xff] }
 0x328   : > { %6861 = vmatpush3.msra.mxu1 %v5340_v18  ;;  %6827 = vmatprep.subr.mxu0 %v5323_v5  ;;  %v5407_v18 = vld [vmem:[%s8386_s9 + $0x578] sm:$0xff]  ;;  %v5422_v5 = vld [vmem:[%s8386_s9 + $0x5f0] sm:$0xff]  ;;  %v5373_v10 = vld [vmem:[%s8386_s9 + $0x468] sm:$0xff] }
 0x329   : > { %6862 = vmatprep.subr.mxu1 %v5355_v46  ;;  %6828 = vmatpush3.msra.mxu0 %v5307_v11  ;;  %v5406_v46 = vld [vmem:[%s8386_s9 + $0x570] sm:$0xff]  ;;  %v5388_v11 = vld [vmem:[%s8386_s9 + $0x4e0] sm:$0xff] }
 0x32a   : > { %6863 = vmatpush3.msra.mxu1 %v5339_v12  ;;  %6829 = vmatprep.subr.mxu0 %v5322_v51  ;;  %v5421_v12 = vld [vmem:[%s8386_s9 + $0x5e8] sm:$0xff]  ;;  %v5372_v51 = vld [vmem:[%s8386_s9 + $0x460] sm:$0xff] }
 0x32b   : > { %6864 = vmatprep.subr.mxu1 %v5354_v42  ;;  %6830 = vmatpush3.msra.mxu0 %v5306_v16  ;;  %v5405_v42 = vld [vmem:[%s8386_s9 + $0x568] sm:$0xff]  ;;  %v5387_v16 = vld [vmem:[%s8386_s9 + $0x4d8] sm:$0xff] }
 0x32c   : > { %6865 = vmatpush3.msra.mxu1 %v5338_v17  ;;  %6831 = vmatprep.subr.mxu0 %v5321_v19  ;;  %v5420_v17 = vld [vmem:[%s8386_s9 + $0x5e0] sm:$0xff]  ;;  %v5371_v19 = vld [vmem:[%s8386_s9 + $0x458] sm:$0xff] }
 0x32d   : > { %6866 = vmatprep.subr.mxu1 %v5353_v23  ;;  %6832 = vmatpush3.msra.mxu0 %v5305_v20  ;;  %v5404_v23 = vld [vmem:[%s8386_s9 + $0x560] sm:$0xff]  ;;  %v5386_v20 = vld [vmem:[%s8386_s9 + $0x4d0] sm:$0xff] }
 0x32e   : > { %6867 = vmatpush3.msra.mxu1 %v5337_v50  ;;  %6833 = vmatprep.subr.mxu0 %v5320_v21  ;;  %v5419_v50 = vld [vmem:[%s8386_s9 + $0x5d8] sm:$0xff]  ;;  %v5370_v21 = vld [vmem:[%s8386_s9 + $0x450] sm:$0xff] }
 0x32f   : > { %6868 = vmatprep.subr.mxu1 %v5352_v22  ;;  %6834 = vmatpush3.msra.mxu0 %v5304_v24  ;;  %v5403_v22 = vld [vmem:[%s8386_s9 + $0x558] sm:$0xff]  ;;  %v5385_v24 = vld [vmem:[%s8386_s9 + $0x4c8] sm:$0xff] }
 0x330   : > { %6869 = vmatpush3.msra.mxu1 %v5336_v25  ;;  %6835 = vmatprep.subr.mxu0 %v5319_v26  ;;  %v5418_v25 = vld [vmem:[%s8386_s9 + $0x5d0] sm:$0xff]  ;;  %v5369_v26 = vld [vmem:[%s8386_s9 + $0x448] sm:$0xff] }
 0x331   : > { %6870 = vmatprep.subr.mxu1 %v5351_v27  ;;  %6836 = vmatpush3.msra.mxu0 %v5303_v28  ;;  %v5402_v27 = vld [vmem:[%s8386_s9 + $0x550] sm:$0xff]  ;;  %v5384_v28 = vld [vmem:[%s8386_s9 + $0x4c0] sm:$0xff] }
 0x332   : > { %6871 = vmatpush3.msra.mxu1 %v5335_v29  ;;  %6837 = vmatprep.subr.mxu0 %v5318_v31  ;;  %v5417_v29 = vld [vmem:[%s8386_s9 + $0x5c8] sm:$0xff]  ;;  %v5368_v31 = vld [vmem:[%s8386_s9 + $0x440] sm:$0xff] }
 0x333   : > { %6872 = vmatprep.subr.mxu1 %v5350_v32  ;;  %6838 = vmatpush3.msra.mxu0 %v5302_v1  ;;  %v5401_v32 = vld [vmem:[%s8386_s9 + $0x548] sm:$0xff]  ;;  %v5383_v1 = vld [vmem:[%s8386_s9 + $0x4b8] sm:$0xff] }
 0x334   : > { %6873 = vmatpush3.msra.mxu1 %v5334_v33  ;;  %6839 = vmatprep.subr.mxu0 %v5317_v35  ;;  %v5416_v33 = vld [vmem:[%s8386_s9 + $0x5c0] sm:$0xff]  ;;  %v5367_v35 = vld [vmem:[%s8386_s9 + $0x438] sm:$0xff] }
 0x335   : > { %6874 = vmatprep.subr.mxu1 %v5349_v7  ;;  %6840 = vmatpush3.msra.mxu0 %v5301_v36  ;;  %v5400_v7 = vld [vmem:[%s8386_s9 + $0x540] sm:$0xff]  ;;  %v5382_v36 = vld [vmem:[%s8386_s9 + $0x4b0] sm:$0xff] }
 0x336   : > { %6875 = vmatpush3.msra.mxu1 %v5333_v37  ;;  %6841 = vmatprep.subr.mxu0 %v5316_v38  ;;  %v5415_v37 = vld [vmem:[%s8386_s9 + $0x5b8] sm:$0xff]  ;;  %v5366_v38 = vld [vmem:[%s8386_s9 + $0x430] sm:$0xff] }
 0x337   : > { %6876 = vmatprep.subr.mxu1 %v5348_v39  ;;  %6842 = vmatpush3.msra.mxu0 %v5300_v6  ;;  %v5399_v39 = vld [vmem:[%s8386_s9 + $0x538] sm:$0xff]  ;;  %v5381_v6 = vld [vmem:[%s8386_s9 + $0x4a8] sm:$0xff] }
 0x338   : > { %6877 = vmatpush3.msra.mxu1 %v5332_v41  ;;  %6843 = vmatprep.subr.mxu0 %v5315_v44  ;;  %v5414_v41 = vld [vmem:[%s8386_s9 + $0x5b0] sm:$0xff]  ;;  %v5365_v44 = vld [vmem:[%s8386_s9 + $0x428] sm:$0xff] }
 0x339   : > { %6878 = vmatprep.subr.mxu1 %v5347_v45  ;;  %6844 = vmatpush3.msra.mxu0 %v5299_v47  ;;  %v5398_v45 = vld [vmem:[%s8386_s9 + $0x530] sm:$0xff]  ;;  %v5380_v47 = vld [vmem:[%s8386_s9 + $0x4a0] sm:$0xff] }
 0x33a   : > { %6879 = vmatpush3.msra.mxu1 %v5331_v62  ;;  %6845 = vmatprep.subr.mxu0 %v5314_v14  ;;  %v5413_v62 = vld [vmem:[%s8386_s9 + $0x5a8] sm:$0xff]  ;;  %v5364_v14 = vld [vmem:[%s8386_s9 + $0x420] sm:$0xff] }
 0x33b   : > { %6880 = vmatprep.subr.mxu1 %v5346_v3  ;;  %6846 = vmatpush3.msra.mxu0 %v5298_v48  ;;  %v5397_v3 = vld [vmem:[%s8386_s9 + $0x528] sm:$0xff]  ;;  %v5379_v48 = vld [vmem:[%s8386_s9 + $0x498] sm:$0xff] }
 0x33c   : > { %6881 = vmatpush3.msra.mxu1 %v5330_v52  ;;  %6847 = vmatprep.subr.mxu0 %v5313_v53  ;;  %v5412_v52 = vld [vmem:[%s8386_s9 + $0x5a0] sm:$0xff]  ;;  %v5363_v53 = vld [vmem:[%s8386_s9 + $0x418] sm:$0xff] }
 0x33d   : > { %6882 = vmatprep.subr.mxu1 %v5345_v54  ;;  %6848 = vmatpush3.msra.mxu0 %v5297_v55  ;;  %v5396_v54 = vld [vmem:[%s8386_s9 + $0x520] sm:$0xff]  ;;  %v5378_v55 = vld [vmem:[%s8386_s9 + $0x490] sm:$0xff] }
 0x33e   : > { %6883 = vmatpush3.msra.mxu1 %v5329_v63  ;;  %6849 = vmatprep.subr.mxu0 %v5312_v56  ;;  %v5411_v63 = vld [vmem:[%s8386_s9 + $0x598] sm:$0xff]  ;;  %v5362_v56 = vld [vmem:[%s8386_s9 + $0x410] sm:$0xff] }
 0x33f   : > { %6884 = vmatprep.subr.mxu1 %v5344_v59  ;;  %6850 = vmatpush3.msra.mxu0 %v5296_v60  ;;  %v5377_v59 = vld [vmem:[%s8386_s9 + $0x488] sm:$0xff]  ;;  %v5410_v60 = vld [vmem:[%s8386_s9 + $0x590] sm:$0xff] }
 0x340   : > { %6885 = vmatpush3.msra.mxu1 %v5328_v2  ;;  %5661 = vmatmul.mubr.f32.vlgmr.msra.gmra.mxu0 %v5222_v61  ;;  %v4966_v2 = vadd.f32 %v9260_v49, %v9158_v58  ;;  %v5361_v61 = vld [vmem:[%s8386_s9 + $0x408] sm:$0xff] }
 0x341   : > { %5731 = vmatmul.mubr.f32.vlgmr.msra.gmra.mxu1 %v5224_v0  ;;  %6889 = vmatprep.subr.mxu0 %v5391_v8  ;;  %v5394_v8 = vld [vmem:[%s8386_s9 + $0x510] sm:$0xff]  ;;  %v5376_v0 = vld [vmem:[%s8386_s9 + $0x480] sm:$0xff] }
 0x342   : > { %6890 = vmatpush3.msra.mxu0 %v5375_v13  ;;  %5800 = vmatprep.mubr.f32.mxu0 %v5227_v15  ;;  %v5409_v13 = vld [vmem:[%s8386_s9 + $0x588] sm:$0xff]  ;;  %v5360_v15 = vld [vmem:[%s8386_s9 + $0x400] sm:$0xff]  ;;  %v5226_v58 = vmax.f32 %v4966_v2, 0.0 }
 0x343   : > { %6891 = vmatprep.subr.mxu0 %v5390_v34  ;;  %6924 = vmatprep.subr.mxu1 %v5423_v4  ;;  %v5393_v34 = vld [vmem:[%s8386_s9 + $0x508] sm:$0xff]  ;;  %v5408_v4 = vld [vmem:[%s8386_s9 + $0x580] sm:$0xff] }
 0x344   : > { %6892 = vmatpush3.msra.mxu0 %v5374_v9  ;;  %6925 = vmatpush3.msra.mxu1 %v5407_v18  ;;  %v5392_v18 = vld [vmem:[%s8386_s9 + $0x500] sm:$0xff] }
 0x345   : > { %6893 = vmatprep.subr.mxu0 %v5389_v40  ;;  %6926 = vmatprep.subr.mxu1 %v5422_v5  ;;  %v5455_v40 = vld [vmem:[%s8386_s9 + $0x6f8] sm:$0xff] }
 0x346   : > { %6894 = vmatpush3.msra.mxu0 %v5373_v10  ;;  %6927 = vmatpush3.msra.mxu1 %v5406_v46  ;;  %v5439_v10 = vld [vmem:[%s8386_s9 + $0x678] sm:$0xff] }
 0x347   : > { %6895 = vmatprep.subr.mxu0 %v5388_v11  ;;  %6928 = vmatprep.subr.mxu1 %v5421_v12  ;;  %v5454_v12 = vld [vmem:[%s8386_s9 + $0x6f0] sm:$0xff] }
 0x348   : > { %6896 = vmatpush3.msra.mxu0 %v5372_v51  ;;  %6929 = vmatpush3.msra.mxu1 %v5405_v42  ;;  %v5438_v42 = vld [vmem:[%s8386_s9 + $0x670] sm:$0xff] }
 0x349   : > { %6897 = vmatprep.subr.mxu0 %v5387_v16  ;;  %6930 = vmatprep.subr.mxu1 %v5420_v17 }
 0x34a   : > { %6898 = vmatpush3.msra.mxu0 %v5371_v19  ;;  %6931 = vmatpush3.msra.mxu1 %v5404_v23  ;;  %v5453_v19 = vld [vmem:[%s8386_s9 + $0x6e8] sm:$0xff] }
 0x34b   : > { %6899 = vmatprep.subr.mxu0 %v5386_v20  ;;  %6932 = vmatprep.subr.mxu1 %v5419_v50  ;;  %v5437_v20 = vld [vmem:[%s8386_s9 + $0x668] sm:$0xff] }
 0x34c   : > { %6900 = vmatpush3.msra.mxu0 %v5370_v21  ;;  %6933 = vmatpush3.msra.mxu1 %v5403_v22 }
 0x34d   : > { %6901 = vmatprep.subr.mxu0 %v5385_v24  ;;  %6934 = vmatprep.subr.mxu1 %v5418_v25  ;;  %v5436_v24 = vld [vmem:[%s8386_s9 + $0x660] sm:$0xff] }
 0x34e   : > { %6902 = vmatpush3.msra.mxu0 %v5369_v26  ;;  %6935 = vmatpush3.msra.mxu1 %v5402_v27  ;;  %v5451_v26 = vld [vmem:[%s8386_s9 + $0x6d8] sm:$0xff] }
 0x34f   : > { %6903 = vmatprep.subr.mxu0 %v5384_v28  ;;  %6936 = vmatprep.subr.mxu1 %v5417_v29  ;;  %v5435_v27 = vld [vmem:[%s8386_s9 + $0x658] sm:$0xff]  ;;  %v5450_v28 = vld [vmem:[%s8386_s9 + $0x6d0] sm:$0xff] }
 0x350   : > { %6904 = vmatpush3.msra.mxu0 %v5368_v31  ;;  %6937 = vmatpush3.msra.mxu1 %v5401_v32  ;;  %v5434_v29 = vld [vmem:[%s8386_s9 + $0x650] sm:$0xff]  ;;  %v5449_v31 = vld [vmem:[%s8386_s9 + $0x6c8] sm:$0xff] }
 0x351   : > { %6905 = vmatprep.subr.mxu0 %v5383_v1  ;;  %6938 = vmatprep.subr.mxu1 %v5416_v33  ;;  %v5433_v32 = vld [vmem:[%s8386_s9 + $0x648] sm:$0xff]  ;;  %v5448_v1 = vld [vmem:[%s8386_s9 + $0x6c0] sm:$0xff] }
 0x352   : > { %6906 = vmatpush3.msra.mxu0 %v5367_v35  ;;  %6939 = vmatpush3.msra.mxu1 %v5400_v7  ;;  %v5432_v33 = vld [vmem:[%s8386_s9 + $0x640] sm:$0xff]  ;;  %v5447_v35 = vld [vmem:[%s8386_s9 + $0x6b8] sm:$0xff] }
 0x353   : > { %6907 = vmatprep.subr.mxu0 %v5382_v36  ;;  %6940 = vmatprep.subr.mxu1 %v5415_v37  ;;  %v5431_v7 = vld [vmem:[%s8386_s9 + $0x638] sm:$0xff]  ;;  %v5446_v36 = vld [vmem:[%s8386_s9 + $0x6b0] sm:$0xff] }
 0x354   : > { %6908 = vmatpush3.msra.mxu0 %v5366_v38  ;;  %6941 = vmatpush3.msra.mxu1 %v5399_v39  ;;  %v5430_v37 = vld [vmem:[%s8386_s9 + $0x630] sm:$0xff]  ;;  %v5445_v38 = vld [vmem:[%s8386_s9 + $0x6a8] sm:$0xff] }
 0x355   : > { %6909 = vmatprep.subr.mxu0 %v5381_v6  ;;  %6942 = vmatprep.subr.mxu1 %v5414_v41  ;;  %v5429_v39 = vld [vmem:[%s8386_s9 + $0x628] sm:$0xff]  ;;  %v5444_v6 = vld [vmem:[%s8386_s9 + $0x6a0] sm:$0xff] }
 0x356   : > { %6910 = vmatpush3.msra.mxu0 %v5365_v44  ;;  %6943 = vmatpush3.msra.mxu1 %v5398_v45  ;;  %v5428_v41 = vld [vmem:[%s8386_s9 + $0x620] sm:$0xff]  ;;  %v5443_v44 = vld [vmem:[%s8386_s9 + $0x698] sm:$0xff] }
 0x357   : > { %6911 = vmatprep.subr.mxu0 %v5380_v47  ;;  %6944 = vmatprep.subr.mxu1 %v5413_v62  ;;  %v5427_v45 = vld [vmem:[%s8386_s9 + $0x618] sm:$0xff]  ;;  %v5442_v47 = vld [vmem:[%s8386_s9 + $0x690] sm:$0xff] }
 0x358   : > { %6912 = vmatpush3.msra.mxu0 %v5364_v14  ;;  %6945 = vmatpush3.msra.mxu1 %v5397_v3  ;;  %v5426_v62 = vld [vmem:[%s8386_s9 + $0x610] sm:$0xff]  ;;  %v5441_v14 = vld [vmem:[%s8386_s9 + $0x688] sm:$0xff] }
 0x359   : > { %6913 = vmatprep.subr.mxu0 %v5379_v48  ;;  %6946 = vmatprep.subr.mxu1 %v5412_v52  ;;  %v5425_v3 = vld [vmem:[%s8386_s9 + $0x608] sm:$0xff]  ;;  %v5440_v48 = vld [vmem:[%s8386_s9 + $0x680] sm:$0xff] }
 0x35a   : > { %6914 = vmatpush3.msra.mxu0 %v5363_v53  ;;  %6947 = vmatpush3.msra.mxu1 %v5396_v54  ;;  %v5424_v52 = vld [vmem:[%s8386_s9 + $0x600] sm:$0xff] }
 0x35b   : > { %6915 = vmatprep.subr.mxu0 %v5378_v55  ;;  %6948 = vmatprep.subr.mxu1 %v5411_v63 }
 0x35c   : > { %6916 = vmatpush3.msra.mxu0 %v5362_v56  ;;  %6949 = vmatpush3.msra.mxu1 %v5395_v43 }
 0x35d   : > { %6917 = vmatprep.subr.mxu0 %v5377_v59  ;;  %6950 = vmatprep.subr.mxu1 %v5410_v60 }
 0x35e   : > { %6918 = vmatpush3.msra.mxu0 %v5361_v61  ;;  %6951 = vmatpush3.msra.mxu1 %v5394_v8  ;;  %v5047_v49 = vpop.f32.mrf.mxu0 }
 0x35f   : > { %6919 = vmatprep.subr.mxu0 %v5376_v0  ;;  %v5088_v9 = vpop.f32.mrf.mxu1  ;;  %6952 = vmatprep.subr.mxu1 %v5409_v13  ;;  %v5048_v5 = vadd.f32 %v5047_v49, %v9264_v30 }
 0x360   : > { %6920 = vmatpush3.msra.mxu0 %v5360_v15  ;;  %6953 = vmatpush3.msra.mxu1 %v5393_v34  ;;  %v5049_v46 = vpop.f32.mrf.mxu0 }
 0x361   : > { %5801 = vmatmul.mubr.f32.vlgmr.msra.gmra.mxu0 %v5226_v58  ;;  %v5090_v11 = vpop.f32.mrf.mxu1  ;;  %6954 = vmatprep.subr.mxu1 %v5408_v4  ;;  %v5050_v51 = vadd.f32 %v5049_v46, %v9273_v57  ;;  %v5089_v16 = vadd.f32 %v5088_v9, %v5048_v5  ;;  %v5452_v57 = vld [vmem:[%s8386_s9 + $0x6e0] sm:$0xff] }
 0x362   : > { %6955 = vmatpush3.msra.mxu1 %v5392_v18  ;;  %6959 = vmatprep.subr.mxu0 %v5455_v40  ;;  %v5051_v17 = vpop.f32.mrf.mxu0 }
 0x363   : > { %v5092_v30 = vpop.f32.mrf.mxu1  ;;  %6960 = vmatpush3.msra.mxu0 %v5439_v10  ;;  %v5091_v23 = vadd.f32 %v5090_v11, %v5050_v51  ;;  %v5228_v25 = vmax.f32 %v5089_v16, 0.0 }
 0x364   : > { %6961 = vmatprep.subr.mxu0 %v5454_v12  ;;  %v5052_v50 = vpop.f32.mrf.mxu0 }
 0x365   : > { %v5093_v21 = vpop.f32.mrf.mxu1  ;;  %6962 = vmatpush3.msra.mxu0 %v5438_v42  ;;  %v5229_v22 = vmax.f32 %v5091_v23, 0.0 }
 0x366   : > { %6963 = vmatprep.subr.mxu0 %v5453_v19 }
 0x367   : > { %6964 = vmatpush3.msra.mxu0 %v5437_v20  ;;  %5870 = vmatprep.mubr.f32.mxu1 %v5229_v22 }
 0x368   : > { %6965 = vmatprep.subr.mxu0 %v5452_v57  ;;  %5871 = vmatmul.mubr.f32.vlgmr.msra.gmra.mxu1 %v5228_v25 }
 0x369   : > { %6966 = vmatpush3.msra.mxu0 %v5436_v24 }
 0x36a   : > { %6967 = vmatprep.subr.mxu0 %v5451_v26 }
 0x36b   : > { %6968 = vmatpush3.msra.mxu0 %v5435_v27 }
 0x36c   : > { %6969 = vmatprep.subr.mxu0 %v5450_v28 }
 0x36d   : > { %6970 = vmatpush3.msra.mxu0 %v5434_v29 }
 0x36e   : > { %6971 = vmatprep.subr.mxu0 %v5449_v31 }
 0x36f   : > { %6972 = vmatpush3.msra.mxu0 %v5433_v32 }
 0x370   : > { %6973 = vmatprep.subr.mxu0 %v5448_v1 }
 0x371   : > { %6974 = vmatpush3.msra.mxu0 %v5432_v33 }
 0x372   : > { %6975 = vmatprep.subr.mxu0 %v5447_v35 }
 0x373   : > { %6976 = vmatpush3.msra.mxu0 %v5431_v7 }
 0x374   : > { %6977 = vmatprep.subr.mxu0 %v5446_v36 }
 0x375   : > { %6978 = vmatpush3.msra.mxu0 %v5430_v37 }
 0x376   : > { %6979 = vmatprep.subr.mxu0 %v5445_v38 }
 0x377   : > { %6980 = vmatpush3.msra.mxu0 %v5429_v39 }
 0x378   : > { %6981 = vmatprep.subr.mxu0 %v5444_v6 }
 0x379   : > { %6982 = vmatpush3.msra.mxu0 %v5428_v41 }
 0x37a   : > { %6983 = vmatprep.subr.mxu0 %v5443_v44 }
 0x37b   : > { %6984 = vmatpush3.msra.mxu0 %v5427_v45 }
 0x37c   : > { %6985 = vmatprep.subr.mxu0 %v5442_v47 }
 0x37d   : > { %6986 = vmatpush3.msra.mxu0 %v5426_v62 }
 0x37e   : > { %6987 = vmatprep.subr.mxu0 %v5441_v14 }
 0x37f   : > { %6988 = vmatpush3.msra.mxu0 %v5425_v3 }
 0x380   : > { %6989 = vmatprep.subr.mxu0 %v5440_v48 }
 0x381   : > { %6990 = vmatpush3.msra.mxu0 %v5424_v52 }
 0x39e   : > { %v5129_v53 = vpop.f32.mrf.mxu0 }
 0x39f   : > { %v5170_v54 = vpop.f32.mrf.mxu1 }
 0x3a0   : > { %v5171_v55 = vadd.f32 %v5170_v54, %v5129_v53  ;;  %v5131_v63 = vpop.f32.mrf.mxu0 }
 0x3a1   : > { %v5172_v56 = vpop.f32.mrf.mxu1 }
 0x3a2   : > { %v5133_v43 = vpop.f32.mrf.mxu0  ;;  %v5173_v8 = vadd.f32 %v5172_v56, %v5131_v63 }
 0x3a3   : > { %v5174_v59 = vpop.f32.mrf.mxu1 }
 0x3a4   : > { %v5134_v60 = vpop.f32.mrf.mxu0 }
 0x3a5   : > { %v5175_v2 = vpop.f32.mrf.mxu1 }
 0x3bf   : > { %v6781_v9 = vpop.f32.mrf.mxu1 }
 0x3c1   : > { %v6782_v18 = vpop.f32.mrf.mxu1 }
 0x3c2   : > { %v6783_v16 = vadd.f32 %v6782_v18, %v6781_v9 }
 0x3df   : > { %v5211_v61 = vpop.f32.mrf.mxu0  ;;  %v6816_v40 = vpop.f32.mrf.mxu1 }
 0x3e0   : > { %v5212_v0 = vadd.f32 %v5211_v61, %v5171_v55 }
 0x3e1   : > { %v5213_v13 = vpop.f32.mrf.mxu0  ;;  %v6817_v5 = vpop.f32.mrf.mxu1 }
 0x3e2   : > { %v5214_v15 = vadd.f32 %v5213_v13, %v5173_v8  ;;  %v5230_v58 = vmax.f32 %v5212_v0, 0.0  ;;  %v6818_v12 = vadd.f32 %v6817_v5, %v6816_v40 }
 0x3e3   : > { %v5215_v34 = vpop.f32.mrf.mxu0 }
 0x3e4   : > { %v5231_v4 = vmax.f32 %v5214_v15, 0.0  ;;  %v5593_v19 = vadd.f32 %v6818_v12, %v6783_v16 }
 0x3e5   : > { %v5216_v49 = vpop.f32.mrf.mxu0 }
 0x3e6   : > { %5940 = vmatprep.mubr.f32.mxu0 %v5231_v4 }
 0x3e7   : > { %5941 = vmatmul.mubr.f32.vlgmr.msra.gmra.mxu0 %v5230_v58 }
 0x400   : > { %v6851_v10 = vpop.f32.mrf.mxu0 }
 0x401   : > { %v6886_v46 = vpop.f32.mrf.mxu1 }
 0x402   : > { %v6852_v11 = vpop.f32.mrf.mxu0 }
 0x403   : > { %v6887_v51 = vpop.f32.mrf.mxu1  ;;  %v6853_v17 = vadd.f32 %v6852_v11, %v6851_v10 }
 0x404   : > { %v6888_v21 = vadd.f32 %v6887_v51, %v6886_v46 }
 0x405   : > { %v5663_v20 = vadd.f32 %v6853_v17, %v5593_v19 }
 0x407   : > { %v5733_v22 = vadd.f32 %v6888_v21, %v5663_v20 }
 0x421   : > { %v6921_v42 = vpop.f32.mrf.mxu0 }
 0x423   : > { %v6922_v23 = vpop.f32.mrf.mxu0 }
 0x424   : > { %v6923_v57 = vadd.f32 %v6922_v23, %v6921_v42 }
 0x426   : > { %v5803_v26 = vadd.f32 %v6923_v57, %v5733_v22 }
 0x428   : > { %v6956_v30 = vpop.f32.mrf.mxu1 }
 0x42a   : > { %v6957_v50 = vpop.f32.mrf.mxu1 }
 0x42b   : > { %v6958_v24 = vadd.f32 %v6957_v50, %v6956_v30 }
 0x42d   : > { %v5873_v28 = vadd.f32 %v6958_v24, %v5803_v26 }
 0x4a7   : > { %v6991_v25 = vpop.f32.mrf.mxu0 }
 0x4a8   : > { %5949 = sbr.rel (%p9468_p3) target bundleno = 1201 (0x4b1), region = 52 }
 0x4a9   : > { %v6992_v27 = vpop.f32.mrf.mxu0 }
 0x4aa   : > { %v6993_v29 = vadd.f32 %v6992_v27, %v6991_v25 }
 0x4ac   : > { %v5943_v31 = vadd.f32 %v6993_v29, %v5873_v28 }
 0x4ad   : > { %v6743_v32 = vld [vmem:[#allocation6] ss:$0 sm:$0xff] }
 0x4ae   : > { %v5957_v1 = vadd.f32 %v6743_v32, %v5943_v31 }
 0x4b0   : > { %5958 = vst [vmem:[%s8401_s14] sm:$0x3] %v5957_v1 }
 0x4b1 PF: > { %p9469_p6 = scmp.eq.s32.totalorder %s8247_s19, 0 }
 0x4b3   : > { %5962 = sbr.rel (%p9469_p6) target bundleno = 1209 (0x4b9), region = 56 }
 0x4b8   : > { %5963 = vst [vmem:[%s8401_s14] sm:$0x3] %v5943_v31 }
 0x4b9 PF: > { %p17_p7 = scmp.ge.s32.totalorder %s8250_s20, 4   ;;  %s9470_s15 = smov %s8184_s16 }
 0x4ba   : > { %s9471_s16 = smov %s8188_s17  ;;  %s9472_s17 = smov %s8260_s23 }
 0x4bb   : > { %s9473_s18 = smov %s8250_s20  ;;  %19 = sbr.rel (!%p17_p7) target bundleno = 5 (0x5), region = 101 }
 0x4c0   :  { %5983 = vsyncpa [#allocation3], 1 }
 0x4c1   :  { %5985 = vsyncpa [#allocation3 + $0x1], 1 }
 0x4c2   :  { %5986 = vsyncpa [#allocation5], 1 }
 0x4c3   :  { %5988 = vsyncpa [#allocation5 + $0x1], 1 }

</bundles_post_ra>
